<compile_context>
chip_gen: v6e
topology: v6e:2x2x1
jax: 0.10.0
libtpu: 0.0.40
codegen_flags: <defaults>
</compile_context>

<pallas_src>
import functools

import jax
import jax.numpy as jnp
from jax import lax
from jax.experimental import pallas as pl
from jax.experimental.pallas import tpu as pltpu


# ------------------------------------------------------------------
# Fused kernel: one grid step = one sample (T, H*W, Cin) -> (T, H*W, Cout)
# ------------------------------------------------------------------
def _fused_bottleneck_kernel(x_ref, w1_ref, w2_ref, w3_ref,
                             s1_ref, b1_ref, s2_ref, b2_ref, s3_ref, b3_ref,
                             o_ref, *, T, H, W):
    HW = H * W
    Cin = x_ref.shape[-1]
    Cmid = w1_ref.shape[-1]
    Cout = w3_ref.shape[-1]

    x = x_ref[...]                                    # (T, HW, Cin) bf16
    xf = x.reshape(T * HW, Cin)

    # ---- conv1: (3,1,1) temporal conv, pad (1,0,0), + bn1 + relu ----------
    # out[t] = x[t-1] @ w1[0] + x[t] @ w1[1] + x[t+1] @ w1[2]
    acc1 = jnp.dot(xf, w1_ref[1], preferred_element_type=jnp.float32)
    acc1 = acc1.reshape(T, HW, Cmid)
    if T > 1:
        m_p = jnp.dot(xf, w1_ref[0], preferred_element_type=jnp.float32)
        m_n = jnp.dot(xf, w1_ref[2], preferred_element_type=jnp.float32)
        m_p = m_p.reshape(T, HW, Cmid)
        m_n = m_n.reshape(T, HW, Cmid)
        zpad = jnp.zeros((1, HW, Cmid), jnp.float32)
        acc1 = acc1 + jnp.concatenate([zpad, m_p[:-1]], axis=0)   # t-1 tap
        acc1 = acc1 + jnp.concatenate([m_n[1:], zpad], axis=0)    # t+1 tap
    y1 = jnp.maximum(acc1 * s1_ref[0] + b1_ref[0], 0.0)
    y1 = y1.astype(jnp.bfloat16)                      # (T, HW, Cmid)

    # ---- conv2: (1,3,3) spatial conv, pad (0,1,1), stride 1, + bn2 + relu --
    # Each tap is a 1x1 matmul whose output is shifted (with zero fill) along
    # the flattened H*W axis; the row wrap along W is killed with an iota mask.
    y1f = y1.reshape(T * HW, Cmid)
    wcol = lax.broadcasted_iota(jnp.int32, (T, HW, 1), 1) % W
    acc2 = jnp.zeros((T, HW, Cmid), jnp.float32)
    for dh in (-1, 0, 1):
        for dw in (-1, 0, 1):
            m = jnp.dot(y1f, w2_ref[dh + 1, dw + 1],
                        preferred_element_type=jnp.float32)
            m = m.reshape(T, HW, Cmid)
            d = dh * W + dw
            if d > 0:
                m = jnp.concatenate(
                    [m[:, d:, :], jnp.zeros((T, d, Cmid), jnp.float32)],
                    axis=1)
            elif d < 0:
                m = jnp.concatenate(
                    [jnp.zeros((T, -d, Cmid), jnp.float32), m[:, :d, :]],
                    axis=1)
            if dw != 0:
                valid = jnp.logical_and(wcol + dw >= 0, wcol + dw < W)
                m = jnp.where(valid, m, 0.0)
            acc2 = acc2 + m
    y2 = jnp.maximum(acc2 * s2_ref[0] + b2_ref[0], 0.0)
    y2 = y2.astype(jnp.bfloat16)                      # (T, HW, Cmid)

    # ---- conv3: 1x1x1 conv + bn3 + residual add + relu --------------------
    acc3 = jnp.dot(y2.reshape(T * HW, Cmid), w3_ref[...],
                   preferred_element_type=jnp.float32)        # (T*HW, Cout)
    out = acc3 * s3_ref[0] + b3_ref[0] + xf.astype(jnp.float32)
    out = jnp.maximum(out, 0.0)
    o_ref[...] = out.reshape(T, HW, Cout).astype(o_ref.dtype)


# ------------------------------------------------------------------
# Wrapper: NCDHW <-> channels-last glue + the single pallas_call
# ------------------------------------------------------------------
def i3d_bottleneck_forward(x_ncthw, p):
    N, Cin, T, H, W = x_ncthw.shape
    Cmid = p["w1"].shape[-1]
    Cout = p["w3"].shape[-1]
    assert Cin == Cout, "identity residual requires inplanes == 4 * planes"
    HW = H * W

    # NCDHW -> (N, T, H*W, C): channels on the lane axis (Cin = Cout = 128).
    x = jnp.transpose(x_ncthw, (0, 2, 3, 4, 1)).reshape(N, T, HW, Cin)
    x_bf = x.astype(jnp.bfloat16)

    w1 = p["w1"].astype(jnp.bfloat16)
    w2 = p["w2"].astype(jnp.bfloat16)
    w3 = p["w3"].astype(jnp.bfloat16)
    s1, b1 = p["s1"][None, :], p["b1"][None, :]
    s2, b2 = p["s2"][None, :], p["b2"][None, :]
    s3, b3 = p["s3"][None, :], p["b3"][None, :]

    kernel = functools.partial(_fused_bottleneck_kernel, T=T, H=H, W=W)
    y = pl.pallas_call(
        kernel,
        out_shape=jax.ShapeDtypeStruct((N, T, HW, Cout), jnp.float32),
        grid=(N,),
        in_specs=[
            pl.BlockSpec((None, T, HW, Cin), lambda n: (n, 0, 0, 0)),
            pl.BlockSpec((3, Cin, Cmid), lambda n: (0, 0, 0)),
            pl.BlockSpec((3, 3, Cmid, Cmid), lambda n: (0, 0, 0, 0)),
            pl.BlockSpec((Cmid, Cout), lambda n: (0, 0)),
            pl.BlockSpec((1, Cmid), lambda n: (0, 0)),
            pl.BlockSpec((1, Cmid), lambda n: (0, 0)),
            pl.BlockSpec((1, Cmid), lambda n: (0, 0)),
            pl.BlockSpec((1, Cmid), lambda n: (0, 0)),
            pl.BlockSpec((1, Cout), lambda n: (0, 0)),
            pl.BlockSpec((1, Cout), lambda n: (0, 0)),
        ],
        out_specs=pl.BlockSpec((None, T, HW, Cout), lambda n: (n, 0, 0, 0)),
        compiler_params=pltpu.CompilerParams(
            dimension_semantics=("parallel",)),
    )(x_bf, w1, w2, w3, s1, b1, s2, b2, s3, b3)

    y = y.reshape(N, T, H, W, Cout)
    return jnp.transpose(y, (0, 4, 1, 2, 3))            # back to NCDHW


# ------------------------------------------------------------------
# Reference: bf16-operand / f32-accumulate convs mirroring the kernel numerics
# ------------------------------------------------------------------
def reference_forward(x_ncthw, p):
    Cin = x_ncthw.shape[1]
    Cmid = p["w1"].shape[-1]
    Cout = p["w3"].shape[-1]
    x = jnp.transpose(x_ncthw, (0, 2, 3, 4, 1))          # NDHWC, f32
    xq = x.astype(jnp.bfloat16)

    def conv3d(inp, w, padding):
        return lax.conv_general_dilated(
            inp, w, window_strides=(1, 1, 1), padding=padding,
            dimension_numbers=("NDHWC", "DHWIO", "NDHWC"),
            preferred_element_type=jnp.float32)

    y = conv3d(xq, p["w1"].reshape(3, 1, 1, Cin, Cmid).astype(jnp.bfloat16),
               padding=((1, 1), (0, 0), (0, 0)))
    y = jnp.maximum(y * p["s1"] + p["b1"], 0.0).astype(jnp.bfloat16)
    y = conv3d(y, p["w2"].reshape(1, 3, 3, Cmid, Cmid).astype(jnp.bfloat16),
               padding=((0, 0), (1, 1), (1, 1)))
    y = jnp.maximum(y * p["s2"] + p["b2"], 0.0).astype(jnp.bfloat16)
    y = conv3d(y, p["w3"].reshape(1, 1, 1, Cmid, Cout).astype(jnp.bfloat16),
               padding=((0, 0), (0, 0), (0, 0)))
    y = jnp.maximum(y * p["s3"] + p["b3"] + xq.astype(jnp.float32), 0.0)
    return jnp.transpose(y, (0, 4, 1, 2, 3))


def init_params(key, inplanes, planes):
    eps = 1e-5
    Cout = planes * 4
    ks = jax.random.split(key, 16)

    def bn(kg, kb, km, kv, c):
        gamma = jax.random.uniform(kg, (c,), jnp.float32, 0.5, 1.5)
        beta = 0.1 * jax.random.normal(kb, (c,), jnp.float32)
        mean = 0.1 * jax.random.normal(km, (c,), jnp.float32)
        var = jax.random.uniform(kv, (c,), jnp.float32, 0.5, 1.5)
        scale = gamma / jnp.sqrt(var + eps)
        bias = beta - mean * scale
        return scale, bias

    s1, b1 = bn(ks[3], ks[4], ks[5], ks[6], planes)
    s2, b2 = bn(ks[7], ks[8], ks[9], ks[10], planes)
    s3, b3 = bn(ks[11], ks[12], ks[13], ks[14], Cout)
    return {
        # conv1: PyTorch (planes, inplanes, 3, 1, 1) stored as (3, Cin, Cmid)
        "w1": 0.1 * jax.random.normal(ks[0], (3, inplanes, planes), jnp.float32),
        # conv2: PyTorch (planes, planes, 1, 3, 3) stored as (3, 3, Cmid, Cmid)
        "w2": 0.1 * jax.random.normal(ks[1], (3, 3, planes, planes), jnp.float32),
        # conv3: PyTorch (4*planes, planes, 1, 1, 1) stored as (Cmid, Cout)
        "w3": 0.1 * jax.random.normal(ks[2], (planes, planes * 4), jnp.float32),
        "s1": s1, "b1": b1, "s2": s2, "b2": b2, "s3": s3, "b3": b3,
    }


if __name__ == "__main__":
    key = jax.random.PRNGKey(0)
    kx, kp = jax.random.split(key)

    N, T, H, W = 2, 4, 8, 8
    planes = 32
    inplanes = planes * 4          # identity residual (downsample=None)

    x = jax.random.normal(kx, (N, inplanes, T, H, W), jnp.float32)
    params = init_params(kp, inplanes, planes)

    out = jax.block_until_ready(i3d_bottleneck_forward(x, params))
    assert out.shape == (N, planes * 4, T, H, W), out.shape

    ref = jax.block_until_ready(reference_forward(x, params))
    err = float(jnp.max(jnp.abs(out - ref)))
    assert err < 1e-2, f"max abs error vs reference: {err}"

    print("KERNEL_OK")
</pallas_src>

<mosaic_0001>
module attributes {stable_mosaic.version = 11 : i64} {
  func.func @_fused_bottleneck_kernel(%arg0: i32, %arg1: memref<1x4x64x128xbf16, #tpu.memory_space<vmem>>, %arg2: memref<3x128x32xbf16, #tpu.memory_space<vmem>>, %arg3: memref<3x3x32x32xbf16, #tpu.memory_space<vmem>>, %arg4: memref<32x128xbf16, #tpu.memory_space<vmem>>, %arg5: memref<1x32xf32, #tpu.memory_space<vmem>>, %arg6: memref<1x32xf32, #tpu.memory_space<vmem>>, %arg7: memref<1x32xf32, #tpu.memory_space<vmem>>, %arg8: memref<1x32xf32, #tpu.memory_space<vmem>>, %arg9: memref<1x128xf32, #tpu.memory_space<vmem>>, %arg10: memref<1x128xf32, #tpu.memory_space<vmem>>, %arg11: memref<1x4x64x128xf32, #tpu.memory_space<vmem>>) attributes {dimension_semantics = [#tpu.dimension_semantics<parallel>], iteration_bounds = array<i64: 2>, scalar_prefetch = 0 : i64, scratch_operands = 0 : i64, tpu.core_type = #tpu.core_type<tc>, window_params = [{transform_indices = @transform_0, window_bounds = array<i64: 1, 4, 64, 128>}, {pipeline_mode = #tpu.pipeline_mode<synchronous>, transform_indices = @transform_1, window_bounds = array<i64: 3, 128, 32>}, {pipeline_mode = #tpu.pipeline_mode<synchronous>, transform_indices = @transform_2, window_bounds = array<i64: 3, 3, 32, 32>}, {pipeline_mode = #tpu.pipeline_mode<synchronous>, transform_indices = @transform_3, window_bounds = array<i64: 32, 128>}, {pipeline_mode = #tpu.pipeline_mode<synchronous>, transform_indices = @transform_4, window_bounds = array<i64: 1, 32>}, {pipeline_mode = #tpu.pipeline_mode<synchronous>, transform_indices = @transform_5, window_bounds = array<i64: 1, 32>}, {pipeline_mode = #tpu.pipeline_mode<synchronous>, transform_indices = @transform_6, window_bounds = array<i64: 1, 32>}, {pipeline_mode = #tpu.pipeline_mode<synchronous>, transform_indices = @transform_7, window_bounds = array<i64: 1, 32>}, {pipeline_mode = #tpu.pipeline_mode<synchronous>, transform_indices = @transform_8, window_bounds = array<i64: 1, 128>}, {pipeline_mode = #tpu.pipeline_mode<synchronous>, transform_indices = @transform_9, window_bounds = array<i64: 1, 128>}, {transform_indices = @transform_10, window_bounds = array<i64: 1, 4, 64, 128>}]} {
    %c0 = arith.constant 0 : index
    %c0_0 = arith.constant 0 : index
    %c0_1 = arith.constant 0 : index
    %c0_2 = arith.constant 0 : index
    %0 = vector.load %arg1[%c0, %c0_0, %c0_1, %c0_2] : memref<1x4x64x128xbf16, #tpu.memory_space<vmem>>, vector<1x4x64x128xbf16>
    %1 = vector.shape_cast %0 : vector<1x4x64x128xbf16> to vector<4x64x128xbf16>
    %2 = vector.shape_cast %1 : vector<4x64x128xbf16> to vector<256x128xbf16>
    %c1 = arith.constant 1 : index
    %c0_3 = arith.constant 0 : index
    %c0_4 = arith.constant 0 : index
    %3 = vector.load %arg2[%c1, %c0_3, %c0_4] : memref<3x128x32xbf16, #tpu.memory_space<vmem>>, vector<1x128x32xbf16>
    %4 = vector.shape_cast %3 : vector<1x128x32xbf16> to vector<128x32xbf16>
    %cst = arith.constant dense<0.000000e+00> : vector<256x32xf32>
    %5 = tpu.matmul %2, %4, %cst {dimension_numbers = #tpu.dot_dimension_numbers<[1], [0], [0], [1], [0, 0, 1, 1], [], []>} : vector<256x128xbf16>, vector<128x32xbf16>, vector<256x32xf32> -> vector<256x32xf32>
    %6 = vector.shape_cast %5 : vector<256x32xf32> to vector<4x64x32xf32>
    %c0_5 = arith.constant 0 : index
    %c0_6 = arith.constant 0 : index
    %c0_7 = arith.constant 0 : index
    %7 = vector.load %arg2[%c0_5, %c0_6, %c0_7] : memref<3x128x32xbf16, #tpu.memory_space<vmem>>, vector<1x128x32xbf16>
    %8 = vector.shape_cast %7 : vector<1x128x32xbf16> to vector<128x32xbf16>
    %cst_8 = arith.constant dense<0.000000e+00> : vector<256x32xf32>
    %9 = tpu.matmul %2, %8, %cst_8 {dimension_numbers = #tpu.dot_dimension_numbers<[1], [0], [0], [1], [0, 0, 1, 1], [], []>} : vector<256x128xbf16>, vector<128x32xbf16>, vector<256x32xf32> -> vector<256x32xf32>
    %c2 = arith.constant 2 : index
    %c0_9 = arith.constant 0 : index
    %c0_10 = arith.constant 0 : index
    %10 = vector.load %arg2[%c2, %c0_9, %c0_10] : memref<3x128x32xbf16, #tpu.memory_space<vmem>>, vector<1x128x32xbf16>
    %11 = vector.shape_cast %10 : vector<1x128x32xbf16> to vector<128x32xbf16>
    %cst_11 = arith.constant dense<0.000000e+00> : vector<256x32xf32>
    %12 = tpu.matmul %2, %11, %cst_11 {dimension_numbers = #tpu.dot_dimension_numbers<[1], [0], [0], [1], [0, 0, 1, 1], [], []>} : vector<256x128xbf16>, vector<128x32xbf16>, vector<256x32xf32> -> vector<256x32xf32>
    %13 = vector.shape_cast %9 : vector<256x32xf32> to vector<4x64x32xf32>
    %14 = vector.shape_cast %12 : vector<256x32xf32> to vector<4x64x32xf32>
    %cst_12 = arith.constant 0.000000e+00 : f32
    %15 = vector.broadcast %cst_12 : f32 to vector<1x64x32xf32>
    %16 = vector.extract_strided_slice %13 {offsets = [0, 0, 0], sizes = [3, 64, 32], strides = [1, 1, 1]} : vector<4x64x32xf32> to vector<3x64x32xf32>
    %17 = tpu.concatenate %15, %16 in 0 : vector<1x64x32xf32>, vector<3x64x32xf32> -> vector<4x64x32xf32>
    %18 = arith.addf %6, %17 : vector<4x64x32xf32>
    %19 = vector.extract_strided_slice %14 {offsets = [1, 0, 0], sizes = [3, 64, 32], strides = [1, 1, 1]} : vector<4x64x32xf32> to vector<3x64x32xf32>
    %20 = tpu.concatenate %19, %15 in 0 : vector<3x64x32xf32>, vector<1x64x32xf32> -> vector<4x64x32xf32>
    %21 = arith.addf %18, %20 : vector<4x64x32xf32>
    %c0_13 = arith.constant 0 : index
    %c0_14 = arith.constant 0 : index
    %22 = vector.load %arg5[%c0_13, %c0_14] : memref<1x32xf32, #tpu.memory_space<vmem>>, vector<1x32xf32>
    %23 = vector.shape_cast %22 : vector<1x32xf32> to vector<32xf32>
    %24 = vector.shape_cast %23 : vector<32xf32> to vector<1x1x32xf32>
    %25 = vector.broadcast %24 : vector<1x1x32xf32> to vector<4x64x32xf32>
    %26 = arith.mulf %21, %25 : vector<4x64x32xf32>
    %c0_15 = arith.constant 0 : index
    %c0_16 = arith.constant 0 : index
    %27 = vector.load %arg6[%c0_15, %c0_16] : memref<1x32xf32, #tpu.memory_space<vmem>>, vector<1x32xf32>
    %28 = vector.shape_cast %27 : vector<1x32xf32> to vector<32xf32>
    %29 = vector.shape_cast %28 : vector<32xf32> to vector<1x1x32xf32>
    %30 = vector.broadcast %29 : vector<1x1x32xf32> to vector<4x64x32xf32>
    %31 = arith.addf %26, %30 : vector<4x64x32xf32>
    %cst_17 = arith.constant 0.000000e+00 : f32
    %32 = vector.broadcast %cst_17 : f32 to vector<4x64x32xf32>
    %33 = arith.maximumf %31, %32 : vector<4x64x32xf32>
    %34 = arith.truncf %33 : vector<4x64x32xf32> to vector<4x64x32xbf16>
    %35 = vector.shape_cast %34 : vector<4x64x32xbf16> to vector<256x32xbf16>
    %36 = tpu.iota {dimensions = array<i32: 1>} : vector<4x64x1xi32>
    %c8_i32 = arith.constant 8 : i32
    %c0_i32 = arith.constant 0 : i32
    %37 = arith.cmpi eq, %c8_i32, %c0_i32 : i32
    %c1_i32 = arith.constant 1 : i32
    %38 = arith.select %37, %c1_i32, %c8_i32 : i32
    %39 = vector.broadcast %38 : i32 to vector<4x64x1xi32>
    %40 = arith.remsi %36, %39 : vector<4x64x1xi32>
    %c0_i32_18 = arith.constant 0 : i32
    %41 = vector.broadcast %c0_i32_18 : i32 to vector<4x64x1xi32>
    %42 = arith.cmpi ne, %40, %41 : vector<4x64x1xi32>
    %c0_i32_19 = arith.constant 0 : i32
    %43 = vector.broadcast %c0_i32_19 : i32 to vector<4x64x1xi32>
    %44 = arith.cmpi slt, %40, %43 : vector<4x64x1xi32>
    %c0_i32_20 = arith.constant 0 : i32
    %45 = arith.cmpi slt, %38, %c0_i32_20 : i32
    %46 = vector.broadcast %45 : i1 to vector<4x64x1xi1>
    %47 = vector.broadcast %46 : vector<4x64x1xi1> to vector<4x64x1xi1>
    %48 = arith.xori %44, %47 : vector<4x64x1xi1>
    %49 = arith.andi %48, %42 : vector<4x64x1xi1>
    %50 = vector.broadcast %38 : i32 to vector<4x64x1xi32>
    %51 = arith.addi %40, %50 : vector<4x64x1xi32>
    %52 = arith.select %49, %51, %40 : vector<4x64x1xi1>, vector<4x64x1xi32>
    %cst_21 = arith.constant 0.000000e+00 : f32
    %53 = vector.broadcast %cst_21 : f32 to vector<4x64x32xf32>
    %c0_22 = arith.constant 0 : index
    %c0_23 = arith.constant 0 : index
    %c0_24 = arith.constant 0 : index
    %c0_25 = arith.constant 0 : index
    %54 = vector.load %arg3[%c0_22, %c0_23, %c0_24, %c0_25] : memref<3x3x32x32xbf16, #tpu.memory_space<vmem>>, vector<1x1x32x32xbf16>
    %55 = vector.shape_cast %54 : vector<1x1x32x32xbf16> to vector<32x32xbf16>
    %cst_26 = arith.constant dense<0.000000e+00> : vector<256x32xf32>
    %56 = tpu.matmul %35, %55, %cst_26 {dimension_numbers = #tpu.dot_dimension_numbers<[1], [0], [0], [1], [0, 0, 1, 1], [], []>} : vector<256x32xbf16>, vector<32x32xbf16>, vector<256x32xf32> -> vector<256x32xf32>
    %57 = vector.shape_cast %56 : vector<256x32xf32> to vector<4x64x32xf32>
    %cst_27 = arith.constant 0.000000e+00 : f32
    %58 = vector.broadcast %cst_27 : f32 to vector<4x9x32xf32>
    %59 = vector.extract_strided_slice %57 {offsets = [0, 0, 0], sizes = [4, 55, 32], strides = [1, 1, 1]} : vector<4x64x32xf32> to vector<4x55x32xf32>
    %60 = tpu.concatenate %58, %59 in 1 : vector<4x9x32xf32>, vector<4x55x32xf32> -> vector<4x64x32xf32>
    %c-1_i32 = arith.constant -1 : i32
    %61 = vector.broadcast %c-1_i32 : i32 to vector<4x64x1xi32>
    %62 = arith.addi %52, %61 : vector<4x64x1xi32>
    %c0_i32_28 = arith.constant 0 : i32
    %63 = vector.broadcast %c0_i32_28 : i32 to vector<4x64x1xi32>
    %64 = arith.cmpi sge, %62, %63 : vector<4x64x1xi32>
    %c-1_i32_29 = arith.constant -1 : i32
    %65 = vector.broadcast %c-1_i32_29 : i32 to vector<4x64x1xi32>
    %66 = arith.addi %52, %65 : vector<4x64x1xi32>
    %c8_i32_30 = arith.constant 8 : i32
    %67 = vector.broadcast %c8_i32_30 : i32 to vector<4x64x1xi32>
    %68 = arith.cmpi slt, %66, %67 : vector<4x64x1xi32>
    %69 = arith.andi %64, %68 : vector<4x64x1xi1>
    %cst_31 = arith.constant 0.000000e+00 : f32
    %70 = vector.shape_cast %69 : vector<4x64x1xi1> to vector<4x64x1xi1>
    %71 = vector.broadcast %70 : vector<4x64x1xi1> to vector<4x64x32xi1>
    %72 = vector.broadcast %cst_31 : f32 to vector<4x64x32xf32>
    %73 = arith.select %71, %60, %72 : vector<4x64x32xi1>, vector<4x64x32xf32>
    %74 = arith.addf %53, %73 : vector<4x64x32xf32>
    %c0_32 = arith.constant 0 : index
    %c1_33 = arith.constant 1 : index
    %c0_34 = arith.constant 0 : index
    %c0_35 = arith.constant 0 : index
    %75 = vector.load %arg3[%c0_32, %c1_33, %c0_34, %c0_35] : memref<3x3x32x32xbf16, #tpu.memory_space<vmem>>, vector<1x1x32x32xbf16>
    %76 = vector.shape_cast %75 : vector<1x1x32x32xbf16> to vector<32x32xbf16>
    %cst_36 = arith.constant dense<0.000000e+00> : vector<256x32xf32>
    %77 = tpu.matmul %35, %76, %cst_36 {dimension_numbers = #tpu.dot_dimension_numbers<[1], [0], [0], [1], [0, 0, 1, 1], [], []>} : vector<256x32xbf16>, vector<32x32xbf16>, vector<256x32xf32> -> vector<256x32xf32>
    %78 = vector.shape_cast %77 : vector<256x32xf32> to vector<4x64x32xf32>
    %cst_37 = arith.constant 0.000000e+00 : f32
    %79 = vector.broadcast %cst_37 : f32 to vector<4x8x32xf32>
    %80 = vector.extract_strided_slice %78 {offsets = [0, 0, 0], sizes = [4, 56, 32], strides = [1, 1, 1]} : vector<4x64x32xf32> to vector<4x56x32xf32>
    %81 = tpu.concatenate %79, %80 in 1 : vector<4x8x32xf32>, vector<4x56x32xf32> -> vector<4x64x32xf32>
    %82 = arith.addf %74, %81 : vector<4x64x32xf32>
    %c0_38 = arith.constant 0 : index
    %c2_39 = arith.constant 2 : index
    %c0_40 = arith.constant 0 : index
    %c0_41 = arith.constant 0 : index
    %83 = vector.load %arg3[%c0_38, %c2_39, %c0_40, %c0_41] : memref<3x3x32x32xbf16, #tpu.memory_space<vmem>>, vector<1x1x32x32xbf16>
    %84 = vector.shape_cast %83 : vector<1x1x32x32xbf16> to vector<32x32xbf16>
    %cst_42 = arith.constant dense<0.000000e+00> : vector<256x32xf32>
    %85 = tpu.matmul %35, %84, %cst_42 {dimension_numbers = #tpu.dot_dimension_numbers<[1], [0], [0], [1], [0, 0, 1, 1], [], []>} : vector<256x32xbf16>, vector<32x32xbf16>, vector<256x32xf32> -> vector<256x32xf32>
    %86 = vector.shape_cast %85 : vector<256x32xf32> to vector<4x64x32xf32>
    %cst_43 = arith.constant 0.000000e+00 : f32
    %87 = vector.broadcast %cst_43 : f32 to vector<4x7x32xf32>
    %88 = vector.extract_strided_slice %86 {offsets = [0, 0, 0], sizes = [4, 57, 32], strides = [1, 1, 1]} : vector<4x64x32xf32> to vector<4x57x32xf32>
    %89 = tpu.concatenate %87, %88 in 1 : vector<4x7x32xf32>, vector<4x57x32xf32> -> vector<4x64x32xf32>
    %c1_i32_44 = arith.constant 1 : i32
    %90 = vector.broadcast %c1_i32_44 : i32 to vector<4x64x1xi32>
    %91 = arith.addi %52, %90 : vector<4x64x1xi32>
    %c0_i32_45 = arith.constant 0 : i32
    %92 = vector.broadcast %c0_i32_45 : i32 to vector<4x64x1xi32>
    %93 = arith.cmpi sge, %91, %92 : vector<4x64x1xi32>
    %c1_i32_46 = arith.constant 1 : i32
    %94 = vector.broadcast %c1_i32_46 : i32 to vector<4x64x1xi32>
    %95 = arith.addi %52, %94 : vector<4x64x1xi32>
    %c8_i32_47 = arith.constant 8 : i32
    %96 = vector.broadcast %c8_i32_47 : i32 to vector<4x64x1xi32>
    %97 = arith.cmpi slt, %95, %96 : vector<4x64x1xi32>
    %98 = arith.andi %93, %97 : vector<4x64x1xi1>
    %cst_48 = arith.constant 0.000000e+00 : f32
    %99 = vector.shape_cast %98 : vector<4x64x1xi1> to vector<4x64x1xi1>
    %100 = vector.broadcast %99 : vector<4x64x1xi1> to vector<4x64x32xi1>
    %101 = vector.broadcast %cst_48 : f32 to vector<4x64x32xf32>
    %102 = arith.select %100, %89, %101 : vector<4x64x32xi1>, vector<4x64x32xf32>
    %103 = arith.addf %82, %102 : vector<4x64x32xf32>
    %c1_49 = arith.constant 1 : index
    %c0_50 = arith.constant 0 : index
    %c0_51 = arith.constant 0 : index
    %c0_52 = arith.constant 0 : index
    %104 = vector.load %arg3[%c1_49, %c0_50, %c0_51, %c0_52] : memref<3x3x32x32xbf16, #tpu.memory_space<vmem>>, vector<1x1x32x32xbf16>
    %105 = vector.shape_cast %104 : vector<1x1x32x32xbf16> to vector<32x32xbf16>
    %cst_53 = arith.constant dense<0.000000e+00> : vector<256x32xf32>
    %106 = tpu.matmul %35, %105, %cst_53 {dimension_numbers = #tpu.dot_dimension_numbers<[1], [0], [0], [1], [0, 0, 1, 1], [], []>} : vector<256x32xbf16>, vector<32x32xbf16>, vector<256x32xf32> -> vector<256x32xf32>
    %107 = vector.shape_cast %106 : vector<256x32xf32> to vector<4x64x32xf32>
    %cst_54 = arith.constant 0.000000e+00 : f32
    %108 = vector.broadcast %cst_54 : f32 to vector<4x1x32xf32>
    %109 = vector.extract_strided_slice %107 {offsets = [0, 0, 0], sizes = [4, 63, 32], strides = [1, 1, 1]} : vector<4x64x32xf32> to vector<4x63x32xf32>
    %110 = tpu.concatenate %108, %109 in 1 : vector<4x1x32xf32>, vector<4x63x32xf32> -> vector<4x64x32xf32>
    %c-1_i32_55 = arith.constant -1 : i32
    %111 = vector.broadcast %c-1_i32_55 : i32 to vector<4x64x1xi32>
    %112 = arith.addi %52, %111 : vector<4x64x1xi32>
    %c0_i32_56 = arith.constant 0 : i32
    %113 = vector.broadcast %c0_i32_56 : i32 to vector<4x64x1xi32>
    %114 = arith.cmpi sge, %112, %113 : vector<4x64x1xi32>
    %c-1_i32_57 = arith.constant -1 : i32
    %115 = vector.broadcast %c-1_i32_57 : i32 to vector<4x64x1xi32>
    %116 = arith.addi %52, %115 : vector<4x64x1xi32>
    %c8_i32_58 = arith.constant 8 : i32
    %117 = vector.broadcast %c8_i32_58 : i32 to vector<4x64x1xi32>
    %118 = arith.cmpi slt, %116, %117 : vector<4x64x1xi32>
    %119 = arith.andi %114, %118 : vector<4x64x1xi1>
    %cst_59 = arith.constant 0.000000e+00 : f32
    %120 = vector.shape_cast %119 : vector<4x64x1xi1> to vector<4x64x1xi1>
    %121 = vector.broadcast %120 : vector<4x64x1xi1> to vector<4x64x32xi1>
    %122 = vector.broadcast %cst_59 : f32 to vector<4x64x32xf32>
    %123 = arith.select %121, %110, %122 : vector<4x64x32xi1>, vector<4x64x32xf32>
    %124 = arith.addf %103, %123 : vector<4x64x32xf32>
    %c1_60 = arith.constant 1 : index
    %c1_61 = arith.constant 1 : index
    %c0_62 = arith.constant 0 : index
    %c0_63 = arith.constant 0 : index
    %125 = vector.load %arg3[%c1_60, %c1_61, %c0_62, %c0_63] : memref<3x3x32x32xbf16, #tpu.memory_space<vmem>>, vector<1x1x32x32xbf16>
    %126 = vector.shape_cast %125 : vector<1x1x32x32xbf16> to vector<32x32xbf16>
    %cst_64 = arith.constant dense<0.000000e+00> : vector<256x32xf32>
    %127 = tpu.matmul %35, %126, %cst_64 {dimension_numbers = #tpu.dot_dimension_numbers<[1], [0], [0], [1], [0, 0, 1, 1], [], []>} : vector<256x32xbf16>, vector<32x32xbf16>, vector<256x32xf32> -> vector<256x32xf32>
    %128 = vector.shape_cast %127 : vector<256x32xf32> to vector<4x64x32xf32>
    %129 = arith.addf %124, %128 : vector<4x64x32xf32>
    %c1_65 = arith.constant 1 : index
    %c2_66 = arith.constant 2 : index
    %c0_67 = arith.constant 0 : index
    %c0_68 = arith.constant 0 : index
    %130 = vector.load %arg3[%c1_65, %c2_66, %c0_67, %c0_68] : memref<3x3x32x32xbf16, #tpu.memory_space<vmem>>, vector<1x1x32x32xbf16>
    %131 = vector.shape_cast %130 : vector<1x1x32x32xbf16> to vector<32x32xbf16>
    %cst_69 = arith.constant dense<0.000000e+00> : vector<256x32xf32>
    %132 = tpu.matmul %35, %131, %cst_69 {dimension_numbers = #tpu.dot_dimension_numbers<[1], [0], [0], [1], [0, 0, 1, 1], [], []>} : vector<256x32xbf16>, vector<32x32xbf16>, vector<256x32xf32> -> vector<256x32xf32>
    %133 = vector.shape_cast %132 : vector<256x32xf32> to vector<4x64x32xf32>
    %134 = vector.extract_strided_slice %133 {offsets = [0, 1, 0], sizes = [4, 63, 32], strides = [1, 1, 1]} : vector<4x64x32xf32> to vector<4x63x32xf32>
    %cst_70 = arith.constant 0.000000e+00 : f32
    %135 = vector.broadcast %cst_70 : f32 to vector<4x1x32xf32>
    %136 = tpu.concatenate %134, %135 in 1 : vector<4x63x32xf32>, vector<4x1x32xf32> -> vector<4x64x32xf32>
    %c1_i32_71 = arith.constant 1 : i32
    %137 = vector.broadcast %c1_i32_71 : i32 to vector<4x64x1xi32>
    %138 = arith.addi %52, %137 : vector<4x64x1xi32>
    %c0_i32_72 = arith.constant 0 : i32
    %139 = vector.broadcast %c0_i32_72 : i32 to vector<4x64x1xi32>
    %140 = arith.cmpi sge, %138, %139 : vector<4x64x1xi32>
    %c1_i32_73 = arith.constant 1 : i32
    %141 = vector.broadcast %c1_i32_73 : i32 to vector<4x64x1xi32>
    %142 = arith.addi %52, %141 : vector<4x64x1xi32>
    %c8_i32_74 = arith.constant 8 : i32
    %143 = vector.broadcast %c8_i32_74 : i32 to vector<4x64x1xi32>
    %144 = arith.cmpi slt, %142, %143 : vector<4x64x1xi32>
    %145 = arith.andi %140, %144 : vector<4x64x1xi1>
    %cst_75 = arith.constant 0.000000e+00 : f32
    %146 = vector.shape_cast %145 : vector<4x64x1xi1> to vector<4x64x1xi1>
    %147 = vector.broadcast %146 : vector<4x64x1xi1> to vector<4x64x32xi1>
    %148 = vector.broadcast %cst_75 : f32 to vector<4x64x32xf32>
    %149 = arith.select %147, %136, %148 : vector<4x64x32xi1>, vector<4x64x32xf32>
    %150 = arith.addf %129, %149 : vector<4x64x32xf32>
    %c2_76 = arith.constant 2 : index
    %c0_77 = arith.constant 0 : index
    %c0_78 = arith.constant 0 : index
    %c0_79 = arith.constant 0 : index
    %151 = vector.load %arg3[%c2_76, %c0_77, %c0_78, %c0_79] : memref<3x3x32x32xbf16, #tpu.memory_space<vmem>>, vector<1x1x32x32xbf16>
    %152 = vector.shape_cast %151 : vector<1x1x32x32xbf16> to vector<32x32xbf16>
    %cst_80 = arith.constant dense<0.000000e+00> : vector<256x32xf32>
    %153 = tpu.matmul %35, %152, %cst_80 {dimension_numbers = #tpu.dot_dimension_numbers<[1], [0], [0], [1], [0, 0, 1, 1], [], []>} : vector<256x32xbf16>, vector<32x32xbf16>, vector<256x32xf32> -> vector<256x32xf32>
    %154 = vector.shape_cast %153 : vector<256x32xf32> to vector<4x64x32xf32>
    %155 = vector.extract_strided_slice %154 {offsets = [0, 7, 0], sizes = [4, 57, 32], strides = [1, 1, 1]} : vector<4x64x32xf32> to vector<4x57x32xf32>
    %cst_81 = arith.constant 0.000000e+00 : f32
    %156 = vector.broadcast %cst_81 : f32 to vector<4x7x32xf32>
    %157 = tpu.concatenate %155, %156 in 1 : vector<4x57x32xf32>, vector<4x7x32xf32> -> vector<4x64x32xf32>
    %c-1_i32_82 = arith.constant -1 : i32
    %158 = vector.broadcast %c-1_i32_82 : i32 to vector<4x64x1xi32>
    %159 = arith.addi %52, %158 : vector<4x64x1xi32>
    %c0_i32_83 = arith.constant 0 : i32
    %160 = vector.broadcast %c0_i32_83 : i32 to vector<4x64x1xi32>
    %161 = arith.cmpi sge, %159, %160 : vector<4x64x1xi32>
    %c-1_i32_84 = arith.constant -1 : i32
    %162 = vector.broadcast %c-1_i32_84 : i32 to vector<4x64x1xi32>
    %163 = arith.addi %52, %162 : vector<4x64x1xi32>
    %c8_i32_85 = arith.constant 8 : i32
    %164 = vector.broadcast %c8_i32_85 : i32 to vector<4x64x1xi32>
    %165 = arith.cmpi slt, %163, %164 : vector<4x64x1xi32>
    %166 = arith.andi %161, %165 : vector<4x64x1xi1>
    %cst_86 = arith.constant 0.000000e+00 : f32
    %167 = vector.shape_cast %166 : vector<4x64x1xi1> to vector<4x64x1xi1>
    %168 = vector.broadcast %167 : vector<4x64x1xi1> to vector<4x64x32xi1>
    %169 = vector.broadcast %cst_86 : f32 to vector<4x64x32xf32>
    %170 = arith.select %168, %157, %169 : vector<4x64x32xi1>, vector<4x64x32xf32>
    %171 = arith.addf %150, %170 : vector<4x64x32xf32>
    %c2_87 = arith.constant 2 : index
    %c1_88 = arith.constant 1 : index
    %c0_89 = arith.constant 0 : index
    %c0_90 = arith.constant 0 : index
    %172 = vector.load %arg3[%c2_87, %c1_88, %c0_89, %c0_90] : memref<3x3x32x32xbf16, #tpu.memory_space<vmem>>, vector<1x1x32x32xbf16>
    %173 = vector.shape_cast %172 : vector<1x1x32x32xbf16> to vector<32x32xbf16>
    %cst_91 = arith.constant dense<0.000000e+00> : vector<256x32xf32>
    %174 = tpu.matmul %35, %173, %cst_91 {dimension_numbers = #tpu.dot_dimension_numbers<[1], [0], [0], [1], [0, 0, 1, 1], [], []>} : vector<256x32xbf16>, vector<32x32xbf16>, vector<256x32xf32> -> vector<256x32xf32>
    %175 = vector.shape_cast %174 : vector<256x32xf32> to vector<4x64x32xf32>
    %176 = vector.extract_strided_slice %175 {offsets = [0, 8, 0], sizes = [4, 56, 32], strides = [1, 1, 1]} : vector<4x64x32xf32> to vector<4x56x32xf32>
    %cst_92 = arith.constant 0.000000e+00 : f32
    %177 = vector.broadcast %cst_92 : f32 to vector<4x8x32xf32>
    %178 = tpu.concatenate %176, %177 in 1 : vector<4x56x32xf32>, vector<4x8x32xf32> -> vector<4x64x32xf32>
    %179 = arith.addf %171, %178 : vector<4x64x32xf32>
    %c2_93 = arith.constant 2 : index
    %c2_94 = arith.constant 2 : index
    %c0_95 = arith.constant 0 : index
    %c0_96 = arith.constant 0 : index
    %180 = vector.load %arg3[%c2_93, %c2_94, %c0_95, %c0_96] : memref<3x3x32x32xbf16, #tpu.memory_space<vmem>>, vector<1x1x32x32xbf16>
    %181 = vector.shape_cast %180 : vector<1x1x32x32xbf16> to vector<32x32xbf16>
    %cst_97 = arith.constant dense<0.000000e+00> : vector<256x32xf32>
    %182 = tpu.matmul %35, %181, %cst_97 {dimension_numbers = #tpu.dot_dimension_numbers<[1], [0], [0], [1], [0, 0, 1, 1], [], []>} : vector<256x32xbf16>, vector<32x32xbf16>, vector<256x32xf32> -> vector<256x32xf32>
    %183 = vector.shape_cast %182 : vector<256x32xf32> to vector<4x64x32xf32>
    %184 = vector.extract_strided_slice %183 {offsets = [0, 9, 0], sizes = [4, 55, 32], strides = [1, 1, 1]} : vector<4x64x32xf32> to vector<4x55x32xf32>
    %cst_98 = arith.constant 0.000000e+00 : f32
    %185 = vector.broadcast %cst_98 : f32 to vector<4x9x32xf32>
    %186 = tpu.concatenate %184, %185 in 1 : vector<4x55x32xf32>, vector<4x9x32xf32> -> vector<4x64x32xf32>
    %c1_i32_99 = arith.constant 1 : i32
    %187 = vector.broadcast %c1_i32_99 : i32 to vector<4x64x1xi32>
    %188 = arith.addi %52, %187 : vector<4x64x1xi32>
    %c0_i32_100 = arith.constant 0 : i32
    %189 = vector.broadcast %c0_i32_100 : i32 to vector<4x64x1xi32>
    %190 = arith.cmpi sge, %188, %189 : vector<4x64x1xi32>
    %c1_i32_101 = arith.constant 1 : i32
    %191 = vector.broadcast %c1_i32_101 : i32 to vector<4x64x1xi32>
    %192 = arith.addi %52, %191 : vector<4x64x1xi32>
    %c8_i32_102 = arith.constant 8 : i32
    %193 = vector.broadcast %c8_i32_102 : i32 to vector<4x64x1xi32>
    %194 = arith.cmpi slt, %192, %193 : vector<4x64x1xi32>
    %195 = arith.andi %190, %194 : vector<4x64x1xi1>
    %cst_103 = arith.constant 0.000000e+00 : f32
    %196 = vector.shape_cast %195 : vector<4x64x1xi1> to vector<4x64x1xi1>
    %197 = vector.broadcast %196 : vector<4x64x1xi1> to vector<4x64x32xi1>
    %198 = vector.broadcast %cst_103 : f32 to vector<4x64x32xf32>
    %199 = arith.select %197, %186, %198 : vector<4x64x32xi1>, vector<4x64x32xf32>
    %200 = arith.addf %179, %199 : vector<4x64x32xf32>
    %c0_104 = arith.constant 0 : index
    %c0_105 = arith.constant 0 : index
    %201 = vector.load %arg7[%c0_104, %c0_105] : memref<1x32xf32, #tpu.memory_space<vmem>>, vector<1x32xf32>
    %202 = vector.shape_cast %201 : vector<1x32xf32> to vector<32xf32>
    %203 = vector.shape_cast %202 : vector<32xf32> to vector<1x1x32xf32>
    %204 = vector.broadcast %203 : vector<1x1x32xf32> to vector<4x64x32xf32>
    %205 = arith.mulf %200, %204 : vector<4x64x32xf32>
    %c0_106 = arith.constant 0 : index
    %c0_107 = arith.constant 0 : index
    %206 = vector.load %arg8[%c0_106, %c0_107] : memref<1x32xf32, #tpu.memory_space<vmem>>, vector<1x32xf32>
    %207 = vector.shape_cast %206 : vector<1x32xf32> to vector<32xf32>
    %208 = vector.shape_cast %207 : vector<32xf32> to vector<1x1x32xf32>
    %209 = vector.broadcast %208 : vector<1x1x32xf32> to vector<4x64x32xf32>
    %210 = arith.addf %205, %209 : vector<4x64x32xf32>
    %cst_108 = arith.constant 0.000000e+00 : f32
    %211 = vector.broadcast %cst_108 : f32 to vector<4x64x32xf32>
    %212 = arith.maximumf %210, %211 : vector<4x64x32xf32>
    %213 = arith.truncf %212 : vector<4x64x32xf32> to vector<4x64x32xbf16>
    %214 = vector.shape_cast %213 : vector<4x64x32xbf16> to vector<256x32xbf16>
    %c0_109 = arith.constant 0 : index
    %c0_110 = arith.constant 0 : index
    %215 = vector.load %arg4[%c0_109, %c0_110] : memref<32x128xbf16, #tpu.memory_space<vmem>>, vector<32x128xbf16>
    %cst_111 = arith.constant dense<0.000000e+00> : vector<256x128xf32>
    %216 = tpu.matmul %214, %215, %cst_111 {dimension_numbers = #tpu.dot_dimension_numbers<[1], [0], [0], [1], [0, 0, 1, 1], [], []>} : vector<256x32xbf16>, vector<32x128xbf16>, vector<256x128xf32> -> vector<256x128xf32>
    %c0_112 = arith.constant 0 : index
    %c0_113 = arith.constant 0 : index
    %217 = vector.load %arg9[%c0_112, %c0_113] : memref<1x128xf32, #tpu.memory_space<vmem>>, vector<1x128xf32>
    %218 = vector.shape_cast %217 : vector<1x128xf32> to vector<128xf32>
    %219 = vector.shape_cast %218 : vector<128xf32> to vector<1x128xf32>
    %220 = vector.broadcast %219 : vector<1x128xf32> to vector<256x128xf32>
    %221 = arith.mulf %216, %220 : vector<256x128xf32>
    %c0_114 = arith.constant 0 : index
    %c0_115 = arith.constant 0 : index
    %222 = vector.load %arg10[%c0_114, %c0_115] : memref<1x128xf32, #tpu.memory_space<vmem>>, vector<1x128xf32>
    %223 = vector.shape_cast %222 : vector<1x128xf32> to vector<128xf32>
    %224 = vector.shape_cast %223 : vector<128xf32> to vector<1x128xf32>
    %225 = vector.broadcast %224 : vector<1x128xf32> to vector<256x128xf32>
    %226 = arith.addf %221, %225 : vector<256x128xf32>
    %227 = arith.extf %2 : vector<256x128xbf16> to vector<256x128xf32>
    %228 = arith.addf %226, %227 : vector<256x128xf32>
    %cst_116 = arith.constant 0.000000e+00 : f32
    %229 = vector.broadcast %cst_116 : f32 to vector<256x128xf32>
    %230 = arith.maximumf %228, %229 : vector<256x128xf32>
    %231 = vector.shape_cast %230 : vector<256x128xf32> to vector<4x64x128xf32>
    %c0_117 = arith.constant 0 : index
    %c0_118 = arith.constant 0 : index
    %c0_119 = arith.constant 0 : index
    %c0_120 = arith.constant 0 : index
    %232 = vector.load %arg11[%c0_117, %c0_118, %c0_119, %c0_120] : memref<1x4x64x128xf32, #tpu.memory_space<vmem>>, vector<1x4x64x128xf32>
    %233 = vector.shape_cast %232 : vector<1x4x64x128xf32> to vector<4x64x128xf32>
    %234 = vector.shape_cast %231 : vector<4x64x128xf32> to vector<1x4x64x128xf32>
    tpu.vector_store %arg11[%c0_117, %c0_118, %c0_119, %c0_120], %234 {strides = array<i32>} : memref<1x4x64x128xf32, #tpu.memory_space<vmem>>, vector<1x4x64x128xf32>,
    return
  }
  func.func @transform_0(%arg0: i32) -> (i32, i32, i32, i32) {
    %c0_i32 = arith.constant 0 : i32
    %c0_i32_0 = arith.constant 0 : i32
    %c0_i32_1 = arith.constant 0 : i32
    %c0_i32_2 = arith.constant 0 : i32
    return %arg0, %c0_i32, %c0_i32_0, %c0_i32_1 : i32, i32, i32, i32
  }
  func.func @transform_1(%arg0: i32) -> (i32, i32, i32) {
    %c0_i32 = arith.constant 0 : i32
    %c0_i32_0 = arith.constant 0 : i32
    %c0_i32_1 = arith.constant 0 : i32
    %c0_i32_2 = arith.constant 0 : i32
    return %c0_i32, %c0_i32_0, %c0_i32_1 : i32, i32, i32
  }
  func.func @transform_2(%arg0: i32) -> (i32, i32, i32, i32) {
    %c0_i32 = arith.constant 0 : i32
    %c0_i32_0 = arith.constant 0 : i32
    %c0_i32_1 = arith.constant 0 : i32
    %c0_i32_2 = arith.constant 0 : i32
    %c0_i32_3 = arith.constant 0 : i32
    return %c0_i32, %c0_i32_0, %c0_i32_1, %c0_i32_2 : i32, i32, i32, i32
  }
  func.func @transform_3(%arg0: i32) -> (i32, i32) {
    %c0_i32 = arith.constant 0 : i32
    %c0_i32_0 = arith.constant 0 : i32
    %c0_i32_1 = arith.constant 0 : i32
    return %c0_i32, %c0_i32_0 : i32, i32
  }
  func.func @transform_4(%arg0: i32) -> (i32, i32) {
    %c0_i32 = arith.constant 0 : i32
    %c0_i32_0 = arith.constant 0 : i32
    %c0_i32_1 = arith.constant 0 : i32
    return %c0_i32, %c0_i32_0 : i32, i32
  }
  func.func @transform_5(%arg0: i32) -> (i32, i32) {
    %c0_i32 = arith.constant 0 : i32
    %c0_i32_0 = arith.constant 0 : i32
    %c0_i32_1 = arith.constant 0 : i32
    return %c0_i32, %c0_i32_0 : i32, i32
  }
  func.func @transform_6(%arg0: i32) -> (i32, i32) {
    %c0_i32 = arith.constant 0 : i32
    %c0_i32_0 = arith.constant 0 : i32
    %c0_i32_1 = arith.constant 0 : i32
    return %c0_i32, %c0_i32_0 : i32, i32
  }
  func.func @transform_7(%arg0: i32) -> (i32, i32) {
    %c0_i32 = arith.constant 0 : i32
    %c0_i32_0 = arith.constant 0 : i32
    %c0_i32_1 = arith.constant 0 : i32
    return %c0_i32, %c0_i32_0 : i32, i32
  }
  func.func @transform_8(%arg0: i32) -> (i32, i32) {
    %c0_i32 = arith.constant 0 : i32
    %c0_i32_0 = arith.constant 0 : i32
    %c0_i32_1 = arith.constant 0 : i32
    return %c0_i32, %c0_i32_0 : i32, i32
  }
  func.func @transform_9(%arg0: i32) -> (i32, i32) {
    %c0_i32 = arith.constant 0 : i32
    %c0_i32_0 = arith.constant 0 : i32
    %c0_i32_1 = arith.constant 0 : i32
    return %c0_i32, %c0_i32_0 : i32, i32
  }
  func.func @transform_10(%arg0: i32) -> (i32, i32, i32, i32) {
    %c0_i32 = arith.constant 0 : i32
    %c0_i32_0 = arith.constant 0 : i32
    %c0_i32_1 = arith.constant 0 : i32
    %c0_i32_2 = arith.constant 0 : i32
    return %arg0, %c0_i32, %c0_i32_0, %c0_i32_1 : i32, i32, i32, i32
  }
}

</mosaic_0001>

<bundles_post_ra>
// kernel: tpu_custom_call.1
= control target key start
LH: loop header
LB: loop body
LE: loop exit
PB: predicated region body
PF: predicated region fallthrough
CT: control target
= control target key end

     0   :  { %15 = vsyncpa [#allocation3], 0  ;;  %s8609_s0 = inlined_call_operand.hbm [shape: bf16[2,4,64,128], index: 0, kind: input, shape index: {}]   ;;  %s8610_s1 = inlined_call_operand.vmem [shape: bf16[3,128,32], index: 1, kind: input, shape index: {}]   ;;  %s8611_s2 = inlined_call_operand.vmem [shape: bf16[3,3,32,32], index: 2, kind: input, shape index: {}]   ;;  %s8612_s3 = inlined_call_operand.vmem [shape: bf16[32,128], index: 3, kind: input, shape index: {}]   ;;  %s8613_s4 = inlined_call_operand.vmem [shape: f32[1,32], index: 4, kind: input, shape index: {}]   ;;  %s8614_s5 = inlined_call_operand.vmem [shape: f32[1,32], index: 5, kind: input, shape index: {}]   ;;  %s8615_s6 = inlined_call_operand.vmem [shape: f32[1,32], index: 6, kind: input, shape index: {}]   ;;  %s8616_s7 = inlined_call_operand.vmem [shape: f32[1,32], index: 7, kind: input, shape index: {}]   ;;  %s8617_s8 = inlined_call_operand.vmem [shape: f32[1,128], index: 8, kind: input, shape index: {}]   ;;  %s8618_s9 = inlined_call_operand.vmem [shape: f32[1,128], index: 9, kind: input, shape index: {}]   ;;  %s8619_s10 = inlined_call_operand.hbm [shape: f32[2,4,64,128], index: 10, kind: output, shape index: {}]  }
   0x1   :  { %17 = vsyncpa [#allocation3 + $0x1], 0 }
   0x2   :  { %18 = vsyncpa [#allocation4], 0 }
   0x3   :  { %20 = vsyncpa [#allocation4 + $0x1], 0  ;;  %s6414_s13 = smov 0   ;;  %s6416_s14 = smov 0  }
   0x4   :  { %s6418_s15 = smov 0   ;;  %s6420_s16 = smov 0  }
   0x5 LB: > { %8655 = sst [smem:[#allocation8_spill]] %s6347_s15  ;;  %s6435_s17 = sadd.s32 4294967295, %s6351_s16   ;;  %s6351_s16 = sphi %s6420_s16, %s8778_s16   ;;  %s6347_s15 = sphi %s6418_s15, %s8780_s15   ;;  %s6343_s14 = sphi %s6416_s14, %s8782_s14   ;;  %s6339_s13 = sphi %s6414_s13, %s8781_s13  }
   0x6   : > { %s5039_s18 = sadd.s32 4294967294, %s6351_s16   ;;  %s6439_s19 = sadd.s32 1, %s6351_s16  }
   0x7   : > { %8656 = sst [smem:[#allocation9_spill]] %s6439_s19  ;;  %s33_s20 = sadd.s32 1, %s6347_s15 }
   0x8   : > { %s30_s21 = ssub.s32 %s6351_s16, %s6439_s19  ;;  %p40_p0 = scmp.ne.s32.totalorder %s6347_s15, %s6343_s14 }
   0x9   : > { %p31_p1 = scmp.eq.s32.totalorder %s30_s21, 0  ;;  %p41_p2 = scmp.eq.s32.totalorder %s6351_s16, 0 }
   0xa   : > { %p46_p3 = scmp.ne.s32.totalorder %s6343_s14, %s6339_s13  ;;  %p47_p4 = scmp.eq.s32.totalorder %s6435_s17, 0 }
   0xb   : > { %s6451_s22 = scalar_select %p31_p1, %s6347_s15, %s33_s20  }
   0xc   : > { %p6453_p5 = por %p41_p2, %p40_p0  ;;  %p6457_p6 = por %p47_p4, %p46_p3 }
   0xd   : > { %8657 = sst [smem:[#allocation10_spill]] %s6451_s22  ;;  %p259_p7 = scmp.eq.s32.totalorder %s6435_s17, 1 }
   0xe   : > { %s8659_s24 = scalar_select %p6457_p6, 1, 0 }
   0xf   : > { %p265_p8 = scmp.eq.s32.totalorder %s5039_s18, 1  ;;  %p6129_p10 = scmp.lt.s32.totalorder %s6351_s16, 2 }
  0x10   : > { %p6464_p11 = por %p259_p7, %p40_p0  ;;  %s312_s27 = sand.u32 1, %s6347_s15  }
  0x11   : > { %p6468_p12 = por %p265_p8, %p46_p3  ;;  %s5343_s28 = sshll.u32 %s6351_s16, 11 }
  0x12   : > { %s8660_s25 = scalar_select %p6464_p11, 1, 0 }
  0x13   : > { %s8661_s26 = scalar_select %p6468_p12, 1, 0 }
  0x14   : > { %s5042_s29 = sshll.u32 %s312_s27, 7  ;;  %s6477_s12 = scalar_lea.hbm %s8609_s0, %s5343_s28 }
  0x15   : > { %s316_s18 = scalar_lea.vmem [#allocation2], %s5042_s29  ;;  %p6481_p13 = pnand %p6129_p10, %p6453_p5 }
  0x16   : > { %s323_s20 = sshll.u32 %s316_s18, 4  ;;  %s6487_s22 = scalar_lea.sflag [#allocation3], %s312_s27  ;;  %s6485_s20 = int_to_ptr.vmem [resolvable:$true] %s323_s20 }
  0x17   : > { %s6259_s15 = scalar_lea.hbm %s6477_s12, 2048  ;;  %p6261_p1 = pneg %p6481_p13 }
  0x18   : > { %p6260_p0 = scmp.ne.s32.totalorder %s6477_s12, %s6259_s15  ;;  %s6264_s29 = scalar_lea.hbm %s8609_s0, 4096 }
  0x19   : > { %p6265_p4 = scmp.lt.s32.totalorder %s6477_s12, %s8609_s0  ;;  %p6266_p5 = scmp.lt.s32.totalorder %s6264_s29, %s6259_s15 }
  0x1a   : > { %p6262_p2 = pnand %p6261_p1, %p6260_p0 }
  0x1b   : > { %p6267_p7 = por %p6266_p5, %p6265_p4 }
  0x1c   : > { %p6263_p3 = pneg %p6262_p2 }
  0x1e   : > { %p6268_p8 = pnand %p6267_p7, %p6263_p3 }
  0x20   : > { %6271 = shalt.err (!%p6268_p8)
}
  0x21   : > { %s6272_s27 = scalar_lea.vmem %s6485_s20, 2048  ;;  %s6353_s18 = smov [#allocation2]  }
  0x22   : > { %p6273_p10 = scmp.ne.s32.totalorder %s6485_s20, %s6272_s27  ;;  %s6277_s19 = sshll.u32 %s6353_s18, 4  ;;  %s6278_s19 = int_to_ptr.vmem [resolvable:$false] %s6277_s19 }
  0x23   : > { %s6279_s28 = scalar_lea.vmem %s6278_s19, 4096  ;;  %p6280_p2 = scmp.lt.s32.totalorder %s6485_s20, %s6278_s19 }
  0x24   : > { %p6275_p9 = pnand %p6273_p10, %p6261_p1  ;;  %p6281_p12 = scmp.lt.s32.totalorder %s6279_s28, %s6272_s27 }
  0x26   : > { %p6276_p0 = pneg %p6275_p9  ;;  %p6282_p11 = por %p6281_p12, %p6280_p2 }
  0x28   : > { %p6283_p6 = pnand %p6282_p11, %p6276_p0 }
  0x2a   : > { %6286 = shalt.err (!%p6283_p6)
}
  0x2b   : > { %s6354_s15 = smov 64   ;;  %s6355_s30 = smov 4  }
  0x2c   : > { %6124 = dma.hbm_to_vmem [thread:$0]  (!%p6481_p13), %s6477_s12, 2048, %s6485_s20, %s6487_s22, %s6354_s15, %s6354_s15, %s6355_s30  }
  0x2d   : > { %p5045_p9 = scmp.ge.s32.totalorder %s6351_s16, 1  ;;  %p331_p1 = scmp.lt.s32.totalorder %s6351_s16, 3 }
  0x2f   : > { %p332_p3 = pnand %p5045_p9, %p331_p1 }
  0x31   : > { %335 = sbr.rel (%p332_p3) target bundleno = 1105 (0x451), region = 60 }
  0x36   : > { %s6511_s19 = sand.u32 1, %s6343_s14   ;;  %p8663_p6 = scmp.ne.s32.totalorder %s8659_s24, 0 }
  0x37   : > { %s5046_s29 = sshll.u32 %s6511_s19, 7  ;;  %s338_s23 = scalar_lea.sflag [#allocation3], %s6511_s19 }
  0x38   : > { %s6515_s11 = scalar_lea.vmem [#allocation2], %s5046_s29 }
  0x39   : > { %6330 = dma.done.wait (%p8663_p6), %s338_s23, 2048  }
  0x3a   : > { %6332 = vsyncadd (%p8663_p6), %s338_s23, 4294965248  ;;  %v6167_v0 = vld [vmem:[%s8610_s1 + $0x78] sm:$0xff]   ;;  %v6168_v1 = vld [vmem:[%s8610_s1 + $0x70] sm:$0xff]   ;;  %vm1479_vm0 = vcmask 261120   ;;  %vm1713_vm1 = vcmask 1040384   ;;  %vm2314_vm9 = vcmask 1046528  }
  0x3b   : > { %5597 = vmatprep.subr.bf16.mxu0 %v6167_v0  ;;  %6101 = vmatprep.subr.bf16.mxu1 %v6167_v0  ;;  %v6169_v2 = vld [vmem:[%s8610_s1 + $0x68] sm:$0xff]   ;;  %v6170_v3 = vld [vmem:[%s8610_s1 + $0x60] sm:$0xff]   ;;  %v6171_v6 = vld [vmem:[%s8610_s1 + $0x58] sm:$0xff]   ;;  %s5047_s27 = sshll.u32 %s6511_s19, 8  ;;  %s4953_s29 = scalar_lea.sflag [#allocation4], %s6511_s19 }
  0x3c   : > { %5598 = vmatpush3.bf16.msra.mxu0 %v6167_v0  ;;  %6109 = vmatpush3.bf16.msra.mxu1 %v6167_v0  ;;  %v6534_v4 = vld [vmem:[%s6515_s11] sm:$0xff]   ;;  %v6172_v7 = vld [vmem:[%s8610_s1 + $0x50] sm:$0xff]   ;;  %v6173_v8 = vld [vmem:[%s8610_s1 + $0x48] sm:$0xff]   ;;  %s8455_s18 = scalar_lea.vmem [#allocation5], %s5047_s27  ;;  %p8775_p12 = scmp.ne.s32.totalorder %s8660_s25, 0 }
  0x3d   : > { %5599 = vmatprep.subr.bf16.mxu0 %v6168_v1  ;;  %6102 = vmatprep.subr.bf16.mxu1 %v6168_v1  ;;  %v6537_v5 = vld [vmem:[%s6515_s11 + $0x40] sm:$0xff]   ;;  %v6554_v10 = vld [vmem:[%s6515_s11 + $0x8] sm:$0xff]   ;;  %v6179_v12 = vld [vmem:[%s8610_s1 + $0x38] sm:$0xff]   ;;  %s4966_s24 = sshll.u32 %s8455_s18, 4  ;;  %s8564_s24 = int_to_ptr.vmem [resolvable:$true] %s4966_s24 }
  0x3e   : > { %5613 = vmatprep.mubr.bf16.mxu0 %v6534_v4  ;;  %5629 = vmatprep.mubr.bf16.mxu1 %v6537_v5  ;;  %v6174_v9 = vld [vmem:[%s8610_s1 + $0x40] sm:$0xff]   ;;  %v6557_v11 = vld [vmem:[%s6515_s11 + $0x48] sm:$0xff]   ;;  %v6180_v13 = vld [vmem:[%s8610_s1 + $0xb8] sm:$0xff]   ;;  %s6287_s23 = scalar_lea.vmem %s8564_s24, 4096 }
  0x3f   : > { %v6566_v14 = vld [vmem:[%s6515_s11 + $0x10] sm:$0xff]   ;;  %v6578_v18 = vld [vmem:[%s6515_s11 + $0x18] sm:$0xff]   ;;  %v6187_v20 = vld [vmem:[%s8610_s1 + $0x28] sm:$0xff]   ;;  %p6288_p11 = scmp.ne.s32.totalorder %s8564_s24, %s6287_s23 }
  0x40   : > { %5600 = vmatpush3.bf16.msra.mxu0 %v6168_v1  ;;  %6110 = vmatpush3.bf16.msra.mxu1 %v6168_v1  ;;  %v6569_v15 = vld [vmem:[%s6515_s11 + $0x50] sm:$0xff]   ;;  %v6581_v19 = vld [vmem:[%s6515_s11 + $0x58] sm:$0xff]   ;;  %v6188_v21 = vld [vmem:[%s8610_s1 + $0xa8] sm:$0xff]  }
  0x41   : > { %5601 = vmatprep.subr.bf16.mxu0 %v6169_v2  ;;  %6103 = vmatprep.subr.bf16.mxu1 %v6169_v2  ;;  %v6181_v16 = vld [vmem:[%s8610_s1 + $0x30] sm:$0xff]   ;;  %v6592_v22 = vld [vmem:[%s6515_s11 + $0x20] sm:$0xff]   ;;  %v389_v26 = vld [vmem:[%s6515_s11 + $0x28] sm:$0xff]   ;;  %p6289_p13 = pnand %p6288_p11, %p8775_p12 }
  0x42   : > { %v6182_v17 = vld [vmem:[%s8610_s1 + $0xb0] sm:$0xff]   ;;  %v6595_v23 = vld [vmem:[%s6515_s11 + $0x60] sm:$0xff]   ;;  %v6609_v27 = vld [vmem:[%s6515_s11 + $0x68] sm:$0xff]  }
  0x43   : > { %v6189_v24 = vld [vmem:[%s8610_s1 + $0x20] sm:$0xff]   ;;  %v6195_v28 = vld [vmem:[%s8610_s1 + $0x18] sm:$0xff]   ;;  %v391_v30 = vld [vmem:[%s6515_s11 + $0x30] sm:$0xff]   ;;  %p6290_p4 = pneg %p6289_p13 }
  0x44   : > { %5602 = vmatpush3.bf16.msra.mxu0 %v6169_v2  ;;  %6111 = vmatpush3.bf16.msra.mxu1 %v6169_v2  ;;  %v6190_v25 = vld [vmem:[%s8610_s1 + $0xa0] sm:$0xff]   ;;  %v6196_v29 = vld [vmem:[%s8610_s1 + $0x98] sm:$0xff]   ;;  %v6621_v31 = vld [vmem:[%s6515_s11 + $0x70] sm:$0xff]  }
  0x45   : > { %5603 = vmatprep.subr.bf16.mxu0 %v6170_v3  ;;  %6104 = vmatprep.subr.bf16.mxu1 %v6170_v3  ;;  %v6197_v32 = vld [vmem:[%s8610_s1 + $0x10] sm:$0xff]   ;;  %v393_v34 = vld [vmem:[%s6515_s11 + $0x38] sm:$0xff]   ;;  %v6203_v36 = vld [vmem:[%s8610_s1 + $0x8] sm:$0xff]  }
  0x46   : > { %v6198_v33 = vld [vmem:[%s8610_s1 + $0x90] sm:$0xff]   ;;  %v409_v35 = vld [vmem:[%s6515_s11 + $0x78] sm:$0xff]   ;;  %v6204_v37 = vld [vmem:[%s8610_s1 + $0x88] sm:$0xff]  }
  0x47   : > { %v6205_v38 = vld [vmem:[%s8610_s1] sm:$0xff]   ;;  %v6207_v40 = vld [vmem:[%s8611_s2 + $0x8] sm:$0xff]   ;;  %v6209_v42 = vld [vmem:[%s8611_s2 + $0x18] sm:$0xff]  }
  0x48   : > { %5604 = vmatpush3.bf16.msra.mxu0 %v6170_v3  ;;  %6112 = vmatpush3.bf16.msra.mxu1 %v6170_v3  ;;  %v6206_v39 = vld [vmem:[%s8610_s1 + $0x80] sm:$0xff]   ;;  %v6210_v43 = vld [vmem:[%s8611_s2 + $0x10] sm:$0xff]   ;;  %v6684_v44 = vld [vmem:[%s8611_s2 + $0x28] sm:$0xff]  }
  0x49   : > { %5605 = vmatprep.subr.bf16.mxu0 %v6171_v6  ;;  %6105 = vmatprep.subr.bf16.mxu1 %v6171_v6  ;;  %v6208_v41 = vld [vmem:[%s8611_s2] sm:$0xff]   ;;  %v6690_v45 = vld [vmem:[%s8611_s2 + $0x38] sm:$0xff]  }
  0x4c   : > { %5606 = vmatpush3.bf16.msra.mxu0 %v6171_v6  ;;  %6113 = vmatpush3.bf16.msra.mxu1 %v6171_v6 }
  0x4d   : > { %5607 = vmatprep.subr.bf16.mxu0 %v6172_v7  ;;  %6106 = vmatprep.subr.bf16.mxu1 %v6172_v7 }
  0x50   : > { %5608 = vmatpush3.bf16.msra.mxu0 %v6172_v7  ;;  %6114 = vmatpush3.bf16.msra.mxu1 %v6172_v7 }
  0x51   : > { %5609 = vmatprep.subr.bf16.mxu0 %v6173_v8  ;;  %6107 = vmatprep.subr.bf16.mxu1 %v6173_v8 }
  0x54   : > { %5610 = vmatpush3.bf16.msra.mxu0 %v6173_v8  ;;  %6115 = vmatpush3.bf16.msra.mxu1 %v6173_v8 }
  0x55   : > { %5611 = vmatprep.subr.bf16.mxu0 %v6174_v9  ;;  %6108 = vmatprep.subr.bf16.mxu1 %v6174_v9 }
  0x58   : > { %5612 = vmatpush3.bf16.msra.mxu0 %v6174_v9  ;;  %6116 = vmatpush3.bf16.msra.mxu1 %v6174_v9 }
  0x59   : > { %5645 = vmatprep.subr.bf16.mxu1 %v6179_v12  ;;  %5693 = vmatprep.subr.bf16.mxu0 %v6180_v13 }
  0x5b   : > { %5614 = vmatmul.mubr.bf16.vlgmr.msra.gmra.mxu0 %v6554_v10  ;;  %5630 = vmatmul.mubr.bf16.vlgmr.msra.gmra.mxu1 %v6557_v11 }
  0x5c   : > { %5646 = vmatpush3.bf16.msra.mxu1 %v6179_v12  ;;  %5694 = vmatpush3.bf16.msra.mxu0 %v6180_v13 }
  0x5d   : > { %5647 = vmatprep.subr.bf16.mxu1 %v6181_v16  ;;  %5695 = vmatprep.subr.bf16.mxu0 %v6182_v17 }
  0x5e   : > { %5617 = vmatprep.mubr.bf16.mxu0 %v6566_v14  ;;  %5633 = vmatprep.mubr.bf16.mxu1 %v6569_v15 }
  0x60   : > { %5648 = vmatpush3.bf16.msra.mxu1 %v6181_v16  ;;  %5696 = vmatpush3.bf16.msra.mxu0 %v6182_v17 }
  0x61   : > { %5649 = vmatprep.subr.bf16.mxu1 %v6187_v20  ;;  %5697 = vmatprep.subr.bf16.mxu0 %v6188_v21 }
  0x63   : > { %5618 = vmatmul.mubr.bf16.gmra.mxu0 %v6578_v18  ;;  %5634 = vmatmul.mubr.bf16.gmra.mxu1 %v6581_v19 }
  0x64   : > { %5650 = vmatpush3.bf16.msra.mxu1 %v6187_v20  ;;  %5698 = vmatpush3.bf16.msra.mxu0 %v6188_v21 }
  0x65   : > { %5651 = vmatprep.subr.bf16.mxu1 %v6189_v24  ;;  %5699 = vmatprep.subr.bf16.mxu0 %v6190_v25 }
  0x66   : > { %5621 = vmatprep.mubr.bf16.mxu0 %v6592_v22  ;;  %5637 = vmatprep.mubr.bf16.mxu1 %v6595_v23 }
  0x68   : > { %5652 = vmatpush3.bf16.msra.mxu1 %v6189_v24  ;;  %5700 = vmatpush3.bf16.msra.mxu0 %v6190_v25 }
  0x69   : > { %5653 = vmatprep.subr.bf16.mxu1 %v6195_v28  ;;  %5701 = vmatprep.subr.bf16.mxu0 %v6196_v29 }
  0x6b   : > { %5622 = vmatmul.mubr.bf16.gmra.mxu0 %v389_v26  ;;  %5638 = vmatmul.mubr.bf16.gmra.mxu1 %v6609_v27 }
  0x6c   : > { %5654 = vmatpush3.bf16.msra.mxu1 %v6195_v28  ;;  %5702 = vmatpush3.bf16.msra.mxu0 %v6196_v29 }
  0x6d   : > { %5655 = vmatprep.subr.bf16.mxu1 %v6197_v32  ;;  %5703 = vmatprep.subr.bf16.mxu0 %v6198_v33 }
  0x6e   : > { %5625 = vmatprep.mubr.bf16.mxu0 %v391_v30  ;;  %5641 = vmatprep.mubr.bf16.mxu1 %v6621_v31 }
  0x70   : > { %5656 = vmatpush3.bf16.msra.mxu1 %v6197_v32  ;;  %5704 = vmatpush3.bf16.msra.mxu0 %v6198_v33 }
  0x71   : > { %5657 = vmatprep.subr.bf16.mxu1 %v6203_v36  ;;  %5705 = vmatprep.subr.bf16.mxu0 %v6204_v37 }
  0x73   : > { %5626 = vmatmul.mubr.bf16.gmra.mxu0 %v393_v34  ;;  %5642 = vmatmul.mubr.bf16.gmra.mxu1 %v409_v35 }
  0x74   : > { %5658 = vmatpush3.bf16.msra.mxu1 %v6203_v36  ;;  %5706 = vmatpush3.bf16.msra.mxu0 %v6204_v37  ;;  %v6768_v36 = vld [vmem:[%s8613_s4] ss:$0 sm:$0xff] }
  0x75   : > { %5659 = vmatprep.subr.bf16.mxu1 %v6205_v38  ;;  %5707 = vmatprep.subr.bf16.mxu0 %v6206_v39 }
  0x76   : > { %5661 = vmatprep.mubr.bf16.mxu1 %v6534_v4  ;;  %5709 = vmatprep.mubr.bf16.mxu0 %v6534_v4 }
  0x78   : > { %5660 = vmatpush3.bf16.msra.mxu1 %v6205_v38  ;;  %5708 = vmatpush3.bf16.msra.mxu0 %v6206_v39 }
  0x79   : > { %5741 = vmatprep.subr.bf16.mxu1 %v6207_v40  ;;  %5777 = vmatprep.subr.bf16.mxu0 %v6209_v42 }
  0x7b   : > { %5662 = vmatmul.mubr.bf16.vlgmr.msra.gmra.mxu1 %v6554_v10  ;;  %5710 = vmatmul.mubr.bf16.vlgmr.msra.gmra.mxu0 %v6554_v10 }
  0x7c   : > { %5665 = vmatprep.mubr.bf16.mxu1 %v6566_v14  ;;  %5713 = vmatprep.mubr.bf16.mxu0 %v6566_v14 }
  0x7d   : > { %5742 = vmatpush3.bf16.msra.mxu1 %v6207_v40  ;;  %5778 = vmatpush3.bf16.msra.mxu0 %v6209_v42 }
  0x7e   : > { %5743 = vmatprep.subr.bf16.mxu1 %v6208_v41  ;;  %5779 = vmatprep.subr.bf16.mxu0 %v6210_v43 }
  0x81   : > { %5744 = vmatpush3.bf16.msra.mxu1 %v6208_v41  ;;  %5780 = vmatpush3.bf16.msra.mxu0 %v6210_v43 }
  0x82   : > { %5813 = vmatprep.subr.bf16.mxu1 %v6684_v44  ;;  %5849 = vmatprep.subr.bf16.mxu0 %v6690_v45 }
  0x83   : > { %5666 = vmatmul.mubr.bf16.gmra.mxu1 %v6578_v18  ;;  %5714 = vmatmul.mubr.bf16.gmra.mxu0 %v6578_v18 }
  0x84   : > { %5669 = vmatprep.mubr.bf16.mxu1 %v6592_v22  ;;  %5717 = vmatprep.mubr.bf16.mxu0 %v6592_v22 }
  0x8b   : > { %5670 = vmatmul.mubr.bf16.gmra.mxu1 %v389_v26  ;;  %5718 = vmatmul.mubr.bf16.gmra.mxu0 %v389_v26 }
  0x8c   : > { %5673 = vmatprep.mubr.bf16.mxu1 %v391_v30  ;;  %5721 = vmatprep.mubr.bf16.mxu0 %v391_v30 }
  0x93   : > { %5674 = vmatmul.mubr.bf16.gmra.mxu1 %v393_v34  ;;  %5722 = vmatmul.mubr.bf16.gmra.mxu0 %v393_v34 }
  0x94   : > { %5677 = vmatprep.mubr.bf16.mxu1 %v6537_v5  ;;  %5725 = vmatprep.mubr.bf16.mxu0 %v6537_v5 }
  0x9b   : > { %5678 = vmatmul.mubr.bf16.gmra.mxu1 %v6557_v11  ;;  %5726 = vmatmul.mubr.bf16.gmra.mxu0 %v6557_v11 }
  0x9c   : > { %5681 = vmatprep.mubr.bf16.mxu1 %v6569_v15  ;;  %5729 = vmatprep.mubr.bf16.mxu0 %v6569_v15 }
  0xa3   : > { %5682 = vmatmul.mubr.bf16.gmra.mxu1 %v6581_v19  ;;  %5730 = vmatmul.mubr.bf16.gmra.mxu0 %v6581_v19 }
  0xa4   : > { %5733 = vmatprep.mubr.bf16.mxu0 %v6595_v23  ;;  %5685 = vmatprep.mubr.bf16.mxu1 %v6595_v23 }
  0xab   : > { %5734 = vmatmul.mubr.bf16.gmra.mxu0 %v6609_v27  ;;  %5686 = vmatmul.mubr.bf16.gmra.mxu1 %v6609_v27 }
  0xac   : > { %5737 = vmatprep.mubr.bf16.mxu0 %v6621_v31  ;;  %5689 = vmatprep.mubr.bf16.mxu1 %v6621_v31 }
  0xb3   : > { %5738 = vmatmul.mubr.bf16.gmra.mxu0 %v409_v35  ;;  %5690 = vmatmul.mubr.bf16.gmra.mxu1 %v409_v35 }
 0x11b   : > { %v5615_v46 = vpop.f32.mrf.mxu0  ;;  %v6693_v47 = vpop.f32.mrf.mxu1 }
 0x11d   : > { %v606_v48 = vpop.f32.mrf.mxu0  ;;  %v6695_v49 = vpop.f32.mrf.mxu1 }
 0x11f   : > { %v5616_v50 = vpop.f32.mrf.mxu0  ;;  %v6697_v51 = vpop.f32.mrf.mxu1 }
 0x121   : > { %v609_v52 = vpop.f32.mrf.mxu0  ;;  %v6699_v53 = vpop.f32.mrf.mxu1 }
 0x123   : > { %v5619_v54 = vpop.f32.mrf.mxu0  ;;  %v6701_v55 = vpop.f32.mrf.mxu1 }
 0x125   : > { %v6703_v56 = vpop.f32.mrf.mxu0  ;;  %v6705_v57 = vpop.f32.mrf.mxu1 }
 0x127   : > { %v6707_v58 = vpop.f32.mrf.mxu0  ;;  %v6709_v59 = vpop.f32.mrf.mxu1 }
 0x129   : > { %v6711_v60 = vpop.f32.mrf.mxu0  ;;  %v6713_v61 = vpop.f32.mrf.mxu1 }
 0x12b   : > { %v6715_v62 = vpop.f32.mrf.mxu0  ;;  %v6717_v63 = vpop.f32.mrf.mxu1 }
 0x12d   : > { %v6719_v0 = vpop.f32.mrf.mxu0  ;;  %v6721_v1 = vpop.f32.mrf.mxu1 }
 0x12f   : > { %v6723_v2 = vpop.f32.mrf.mxu0  ;;  %v6725_v3 = vpop.f32.mrf.mxu1 }
 0x131   : > { %v6727_v4 = vpop.f32.mrf.mxu0  ;;  %v6729_v5 = vpop.f32.mrf.mxu1 }
 0x133   : > { %v6731_v6 = vpop.f32.mrf.mxu0  ;;  %v6733_v7 = vpop.f32.mrf.mxu1 }
 0x135   : > { %v6735_v8 = vpop.f32.mrf.mxu0  ;;  %v6737_v9 = vpop.f32.mrf.mxu1 }
 0x137   : > { %v6739_v10 = vpop.f32.mrf.mxu0  ;;  %v6741_v11 = vpop.f32.mrf.mxu1 }
 0x139   : > { %v6743_v12 = vpop.f32.mrf.mxu0  ;;  %v6745_v13 = vpop.f32.mrf.mxu1 }
 0x13b   : > { %v5663_v14 = vpop.f32.mrf.mxu1  ;;  %v5711_v15 = vpop.f32.mrf.mxu0 }
 0x13d   : > { %v6747_v16 = vpop.f32.mrf.mxu1  ;;  %v1049_v17 = vpop.f32.mrf.mxu0 }
 0x13f   : > { %v6749_v18 = vpop.f32.mrf.mxu1  ;;  %v5712_v19 = vpop.f32.mrf.mxu0 }
 0x141   : > { %v6751_v20 = vpop.f32.mrf.mxu1  ;;  %v1051_v21 = vpop.f32.mrf.mxu0 }
 0x143   : > { %v6753_v22 = vpop.f32.mrf.mxu1  ;;  %v5715_v23 = vpop.f32.mrf.mxu0 }
 0x145   : > { %v6755_v24 = vpop.f32.mrf.mxu1  ;;  %v1061_v25 = vpop.f32.mrf.mxu0 }
 0x147   : > { %v6757_v26 = vpop.f32.mrf.mxu1  ;;  %v5716_v27 = vpop.f32.mrf.mxu0 }
 0x149   : > { %v6759_v28 = vpop.f32.mrf.mxu1  ;;  %v1063_v29 = vpop.f32.mrf.mxu0 }
 0x14b   : > { %v6761_v30 = vpop.f32.mrf.mxu1  ;;  %v5719_v31 = vpop.f32.mrf.mxu0 }
 0x14c   : > { %v1202_v34 = vadd.f32 %v5719_v31, %v5615_v46  ;;  %v6780_v46 = vld [vmem:[%s8614_s5] ss:$0 sm:$0xff] }
 0x14d   : > { %v6763_v32 = vpop.f32.mrf.mxu1  ;;  %v1073_v33 = vpop.f32.mrf.mxu0 }
 0x14e   : > { %v1200_v35 = vadd.f32 %v1073_v33, %v606_v48  ;;  %v1241_v43 = vmul.f32 %v6768_v36, %v1202_v34 }
 0x14f   : > { %v6770_v37 = vpop.f32.mrf.mxu1  ;;  %v5720_v38 = vpop.f32.mrf.mxu0 }
 0x150   : > { %v1203_v39 = vadd.f32 %v5720_v38, %v5616_v50  ;;  %v1239_v40 = vmul.f32 %v6768_v36, %v1200_v35  ;;  %v1280_v31 = vadd.f32 %v6780_v46, %v1241_v43 }
 0x151   : > { %v6773_v41 = vpop.f32.mrf.mxu1  ;;  %v1076_v42 = vpop.f32.mrf.mxu0 }
 0x152   : > { %v1242_v15 = vmul.f32 %v6768_v36, %v1203_v39  ;;  %v1201_v48 = vadd.f32 %v1076_v42, %v609_v52  ;;  %v1278_v21 = vadd.f32 %v6780_v46, %v1239_v40  ;;  %v1312_v43 = vmax.f32 %v1280_v31, 0.0 }
 0x153   : > { %v6782_v17 = vpop.f32.mrf.mxu1  ;;  %v5723_v19 = vpop.f32.mrf.mxu0 }
 0x154   : > { %v1281_v50 = vadd.f32 %v6780_v46, %v1242_v15  ;;  %v1240_v23 = vmul.f32 %v6768_v36, %v1201_v48  ;;  %v1206_v25 = vadd.f32 %v5723_v19, %v5619_v54  ;;  %v1310_v42 = vmax.f32 %v1278_v21, 0.0 }
 0x155   : > { %v6787_v27 = vpop.f32.mrf.mxu1  ;;  %v1089_v29 = vpop.f32.mrf.mxu0 }
 0x156   : > { %v1204_v33 = vadd.f32 %v1089_v29, %v6703_v56  ;;  %v1279_v34 = vadd.f32 %v6780_v46, %v1240_v23  ;;  %v1313_v38 = vmax.f32 %v1281_v50, 0.0  ;;  %v1245_v15 = vmul.f32 %v6768_v36, %v1206_v25 }
 0x157   : > { %v6792_v52 = vpop.f32.mrf.mxu1  ;;  %v5724_v35 = vpop.f32.mrf.mxu0  ;;  %v1178_v23 = vadd.f32 %v5663_v14, %v6715_v62  ;;  %v1176_v62 = vadd.f32 %v6747_v16, %v6719_v0  ;;  %v1179_v16 = vadd.f32 %v6749_v18, %v6723_v2 }
 0x158   : > { %v1243_v39 = vmul.f32 %v6768_v36, %v1204_v33  ;;  %v1311_v40 = vmax.f32 %v1279_v34, 0.0  ;;  %v1207_v54 = vadd.f32 %v5724_v35, %v6707_v58  ;;  %v6804_v34 = vpack.c.bf16 %v1313_v38, %v1312_v43 }
 0x159   : > { %v6797_v48 = vpop.f32.mrf.mxu1  ;;  %v1092_v19 = vpop.f32.mrf.mxu0  ;;  %v1284_v14 = vadd.f32 %v6780_v46, %v1245_v15 }
 0x15a   : > { %v1205_v56 = vadd.f32 %v1092_v19, %v6711_v60  ;;  %v6801_v29 = vpack.c.bf16 %v1311_v40, %v1310_v42  ;;  %v1246_v50 = vmul.f32 %v6768_v36, %v1207_v54  ;;  %v1282_v25 = vadd.f32 %v6780_v46, %v1243_v39  ;;  %v6212_v60 = vld [vmem:[%s8611_s2 + $0x20] sm:$0xff]   ;;  %v6214_v39 = vld [vmem:[%s8611_s2 + $0x30] sm:$0xff]  }
 0x15b   : > { %v5679_v33 = vpop.f32.mrf.mxu1  ;;  %v5727_v21 = vpop.f32.mrf.mxu0  ;;  %v1316_v2 = vmax.f32 %v1284_v14, 0.0 }
 0x15c   : > { %v1244_v58 = vmul.f32 %v6768_v36, %v1205_v56  ;;  %v1194_v35 = vadd.f32 %v5679_v33, %v6717_v63  ;;  %v1285_v31 = vadd.f32 %v6780_v46, %v1246_v50  ;;  %5745 = vmatprep.mubr.msk.bf16.mxu1 %vm1479_vm0, %v6801_v29  ;;  %5781 = vmatprep.mubr.msk.bf16.mxu0 %vm1479_vm0, %v6801_v29  ;;  %v1314_v56 = vmax.f32 %v1282_v25, 0.0 }
 0x15d   : > { %v6820_v38 = vpop.f32.mrf.mxu1  ;;  %v1105_v63 = vpop.f32.mrf.mxu0  ;;  %v1210_v0 = vadd.f32 %v5727_v21, %v1178_v23  ;;  %5746 = vmatmul.mubr.msk.bf16.vlgmr.msra.gmra.mxu1 %vm1479_vm0, %v6804_v34  ;;  %5782 = vmatmul.mubr.msk.bf16.vlgmr.msra.gmra.mxu0 %vm1479_vm0, %v6804_v34  ;;  %v1177_v23 = vadd.f32 %v6751_v20, %v6727_v4  ;;  %v1182_v25 = vadd.f32 %v6753_v22, %v6731_v6  ;;  %v6859_v6 = vld [vmem:[%s8611_s2 + $0x58] sm:$0xff]  }
 0x15e   : > { %v1283_v42 = vadd.f32 %v6780_v46, %v1244_v58  ;;  %v1317_v40 = vmax.f32 %v1285_v31, 0.0  ;;  %v1265_v15 = vmul.f32 %v6768_v36, %v1194_v35  ;;  %v1208_v54 = vadd.f32 %v1176_v62, %v1105_v63  ;;  %5814 = vmatpush3.bf16.msra.mxu1 %v6684_v44  ;;  %5850 = vmatpush3.bf16.msra.mxu0 %v6690_v45  ;;  %v6843_v44 = vld [vmem:[%s8611_s2 + $0x48] sm:$0xff]  }
 0x15f   : > { %v5680_v19 = vpop.f32.mrf.mxu1  ;;  %v5728_v43 = vpop.f32.mrf.mxu0  ;;  %5815 = vmatprep.subr.bf16.mxu1 %v6212_v60  ;;  %5851 = vmatprep.subr.bf16.mxu0 %v6214_v39  ;;  %v1249_v4 = vmul.f32 %v6768_v36, %v1210_v0 }
 0x160   : > { %v1315_v50 = vmax.f32 %v1283_v42, 0.0  ;;  %v1195_v18 = vadd.f32 %v5680_v19, %v6725_v3  ;;  %v1211_v33 = vadd.f32 %v5728_v43, %v1179_v16  ;;  %v1247_v20 = vmul.f32 %v6768_v36, %v1208_v54 }
 0x161   : > { %v6838_v21 = vpop.f32.mrf.mxu1  ;;  %v1108_v58 = vpop.f32.mrf.mxu0  ;;  %v6851_v3 = vpack.c.bf16 %v1317_v40, %v1316_v2  ;;  %v1304_v35 = vadd.f32 %v6780_v46, %v1265_v15  ;;  %v1180_v16 = vadd.f32 %v6755_v24, %v6735_v8  ;;  %v1288_v8 = vadd.f32 %v6780_v46, %v1249_v4 }
 0x162   : > { %v6847_v45 = vpack.c.bf16 %v1315_v50, %v1314_v56  ;;  %v1266_v62 = vmul.f32 %v6768_v36, %v1195_v18  ;;  %v1250_v14 = vmul.f32 %v6768_v36, %v1211_v33  ;;  %5816 = vmatpush3.bf16.msra.mxu1 %v6212_v60  ;;  %v1209_v22 = vadd.f32 %v1177_v23, %v1108_v58 }
 0x163   : > { %v5683_v31 = vpop.f32.mrf.mxu1  ;;  %v5731_v63 = vpop.f32.mrf.mxu0  ;;  %5852 = vmatpush3.bf16.msra.mxu0 %v6214_v39  ;;  %5885 = vmatprep.subr.bf16.mxu1 %v6843_v44  ;;  %v1336_v43 = vmax.f32 %v1304_v35, 0.0  ;;  %v1183_v39 = vadd.f32 %v6757_v26, %v6739_v10  ;;  %v1181_v58 = vadd.f32 %v6759_v28, %v6743_v12  ;;  %v1184_v10 = vadd.f32 %v6763_v32, %v6695_v49 }
 0x164   : > { %v1198_v42 = vadd.f32 %v5683_v31, %v6733_v7  ;;  %v1214_v0 = vadd.f32 %v5731_v63, %v1182_v25  ;;  %5749 = vmatprep.mubr.msk.bf16.mxu1 %vm1479_vm0, %v6847_v45  ;;  %5785 = vmatprep.mubr.msk.bf16.mxu0 %vm1479_vm0, %v6847_v45  ;;  %v1305_v60 = vadd.f32 %v6780_v46, %v1266_v62  ;;  %v1320_v12 = vmax.f32 %v1288_v8, 0.0 }
 0x165   : > { %v1289_v40 = vadd.f32 %v6780_v46, %v1250_v14  ;;  %v6870_v15 = vpop.f32.mrf.mxu1  ;;  %v1121_v54 = vpop.f32.mrf.mxu0  ;;  %v1286_v7 = vadd.f32 %v6780_v46, %v1247_v20  ;;  %v1248_v19 = vmul.f32 %v6768_v36, %v1209_v22  ;;  %5750 = vmatmul.mubr.msk.bf16.gmra.mxu1 %vm1479_vm0, %v6851_v3  ;;  %5786 = vmatmul.mubr.msk.bf16.gmra.mxu0 %vm1479_vm0, %v6851_v3 }
 0x166   : > { %v1337_v24 = vmax.f32 %v1305_v60, 0.0  ;;  %v1212_v56 = vadd.f32 %v1180_v16, %v1121_v54  ;;  %5921 = vmatprep.subr.bf16.mxu0 %v6859_v6  ;;  %v1269_v18 = vmul.f32 %v6768_v36, %v1198_v42  ;;  %v1253_v33 = vmul.f32 %v6768_v36, %v1214_v0 }
 0x167   : > { %v5684_v50 = vpop.f32.mrf.mxu1  ;;  %v5732_v23 = vpop.f32.mrf.mxu0  ;;  %v1287_v2 = vadd.f32 %v6780_v46, %v1248_v19  ;;  %v1186_v25 = vadd.f32 %v6761_v30, %v6693_v47  ;;  %v1321_v20 = vmax.f32 %v1289_v40, 0.0  ;;  %v1318_v26 = vmax.f32 %v1286_v7, 0.0 }
 0x168   : > { %v6890_v4 = vpack.c.bf16 %v1337_v24, %v1336_v43  ;;  %v1251_v31 = vmul.f32 %v6768_v36, %v1212_v56  ;;  %v1187_v63 = vadd.f32 %v6770_v37, %v6697_v51  ;;  %v1199_v28 = vadd.f32 %v5684_v50, %v6741_v11 }
 0x169   : > { %v6892_v35 = vpop.f32.mrf.mxu1  ;;  %v1124_v62 = vpop.f32.mrf.mxu0  ;;  %v1319_v14 = vmax.f32 %v1287_v2, 0.0  ;;  %v1215_v47 = vadd.f32 %v5732_v23, %v1183_v39  ;;  %v1308_v0 = vadd.f32 %v6780_v46, %v1269_v18  ;;  %v1292_v16 = vadd.f32 %v6780_v46, %v1253_v33 }
 0x16a   : > { %8664 = vst [vmem:[#allocation11_spill] sm:$0xff] %v6890_v4  ;;  %v1213_v49 = vadd.f32 %v1181_v58, %v1124_v62  ;;  %v6904_v32 = vpack.c.bf16 %v1321_v20, %v1320_v12  ;;  %v1270_v60 = vmul.f32 %v6768_v36, %v1199_v28  ;;  %v1290_v11 = vadd.f32 %v6780_v46, %v1251_v31 }
 0x16b   : > { %v5735_v30 = vpop.f32.mrf.mxu0  ;;  %v5687_v22 = vpop.f32.mrf.mxu1  ;;  %v6900_v42 = vpack.c.bf16 %v1319_v14, %v1318_v26  ;;  %v1254_v40 = vmul.f32 %v6768_v36, %v1215_v47  ;;  %v1185_v23 = vadd.f32 %v6773_v41, %v6699_v53  ;;  %v1340_v18 = vmax.f32 %v1308_v0, 0.0 }
 0x16c   : > { %v1218_v51 = vadd.f32 %v5735_v30, %v1186_v25  ;;  %v1252_v7 = vmul.f32 %v6768_v36, %v1213_v49  ;;  %v1309_v43 = vadd.f32 %v6780_v46, %v1270_v60  ;;  %v1190_v12 = vadd.f32 %v6782_v17, %v6701_v55 }
 0x16d   : > { %v1137_v37 = vpop.f32.mrf.mxu0  ;;  %v927_v54 = vpop.f32.mrf.mxu1  ;;  %5753 = vmatprep.mubr.msk.bf16.mxu1 %vm1479_vm0, %v6900_v42  ;;  %5789 = vmatprep.mubr.msk.bf16.mxu0 %vm1479_vm0, %v6900_v42  ;;  %v1293_v8 = vadd.f32 %v6780_v46, %v1254_v40  ;;  %v1324_v53 = vmax.f32 %v1292_v16, 0.0  ;;  %v1188_v30 = vadd.f32 %v6787_v27, %v6705_v57  ;;  %v1193_v22 = vadd.f32 %v6838_v21, %v6729_v5 }
 0x16e   : > { %v1216_v19 = vadd.f32 %v1184_v10, %v1137_v37  ;;  %v1257_v24 = vmul.f32 %v6768_v36, %v1218_v51  ;;  %5754 = vmatmul.mubr.msk.bf16.gmra.mxu1 %vm1479_vm0, %v6904_v32  ;;  %5790 = vmatmul.mubr.msk.bf16.gmra.mxu0 %vm1479_vm0, %v6904_v32  ;;  %v1291_v39 = vadd.f32 %v6780_v46, %v1252_v7  ;;  %v1341_v33 = vmax.f32 %v1309_v43, 0.0 }
 0x16f   : > { %v5736_v56 = vpop.f32.mrf.mxu0  ;;  %v5688_v50 = vpop.f32.mrf.mxu1  ;;  %v1325_v58 = vmax.f32 %v1293_v8, 0.0  ;;  %v1322_v10 = vmax.f32 %v1290_v11, 0.0  ;;  %v1191_v37 = vadd.f32 %v6792_v52, %v6709_v59  ;;  %v1192_v21 = vadd.f32 %v6820_v38, %v6721_v1 }
 0x170   : > { %v1219_v2 = vadd.f32 %v5736_v56, %v1187_v63  ;;  %v1255_v25 = vmul.f32 %v6768_v36, %v1216_v19  ;;  %v1323_v26 = vmax.f32 %v1291_v39, 0.0  ;;  %v1296_v14 = vadd.f32 %v6780_v46, %v1257_v24 }
 0x171   : > { %v1140_v20 = vpop.f32.mrf.mxu0  ;;  %v929_v62 = vpop.f32.mrf.mxu1  ;;  %v6929_v41 = vpack.c.bf16 %v1341_v33, %v1340_v18  ;;  %v6938_v60 = vpack.c.bf16 %v1325_v58, %v1324_v53  ;;  %v1189_v7 = vadd.f32 %v6797_v48, %v6713_v61  ;;  %v1264_v38 = vmul.f32 %v6768_v36, %v1193_v22 }
 0x172   : > { %v1258_v31 = vmul.f32 %v6768_v36, %v1219_v2  ;;  %v1217_v63 = vadd.f32 %v1185_v23, %v1140_v20  ;;  %v6935_v0 = vpack.c.bf16 %v1323_v26, %v1322_v10  ;;  %v1294_v55 = vadd.f32 %v6780_v46, %v1255_v25 }
 0x173   : > { %8665 = vst [vmem:[#allocation12_spill] sm:$0xff] %v6929_v41  ;;  %v5739_v28 = vpop.f32.mrf.mxu0  ;;  %v5691_v47 = vpop.f32.mrf.mxu1  ;;  %v1328_v57 = vmax.f32 %v1296_v14, 0.0  ;;  %v1263_v18 = vmul.f32 %v6768_v36, %v1192_v21  ;;  %v1303_v25 = vadd.f32 %v6780_v46, %v1264_v38  ;;  %v1197_v20 = vadd.f32 %v6892_v35, %v6745_v13 }
 0x174   : > { %v1297_v49 = vadd.f32 %v6780_v46, %v1258_v31  ;;  %v1256_v17 = vmul.f32 %v6768_v36, %v1217_v63  ;;  %v1222_v16 = vadd.f32 %v5739_v28, %v1190_v12  ;;  %5757 = vmatprep.mubr.msk.bf16.mxu1 %vm1479_vm0, %v6935_v0  ;;  %5793 = vmatprep.mubr.msk.bf16.mxu0 %vm1479_vm0, %v6935_v0  ;;  %v1326_v8 = vmax.f32 %v1294_v55, 0.0 }
 0x175   : > { %v1153_v40 = vpop.f32.mrf.mxu0  ;;  %v939_v51 = vpop.f32.mrf.mxu1  ;;  %v1302_v14 = vadd.f32 %v6780_v46, %v1263_v18  ;;  %v1196_v31 = vadd.f32 %v6870_v15, %v6737_v9  ;;  %v1335_v13 = vmax.f32 %v1303_v25, 0.0  ;;  %v1268_v35 = vmul.f32 %v6768_v36, %v1197_v20 }
 0x176   : > { %v1329_v27 = vmax.f32 %v1297_v49, 0.0  ;;  %v1220_v5 = vadd.f32 %v1188_v30, %v1153_v40  ;;  %v1295_v54 = vadd.f32 %v6780_v46, %v1256_v17  ;;  %v1261_v11 = vmul.f32 %v6768_v36, %v1222_v16  ;;  %5758 = vmatmul.mubr.msk.bf16.gmra.mxu1 %vm1479_vm0, %v6938_v60  ;;  %5794 = vmatmul.mubr.msk.bf16.gmra.mxu0 %vm1479_vm0, %v6938_v60  ;;  %v6218_v17 = vld [vmem:[%s8611_s2 + $0x50] sm:$0xff]   ;;  %v6219_v16 = vld [vmem:[%s8611_s2 + $0x68] sm:$0xff]   ;;  %v6221_v40 = vld [vmem:[%s8611_s2 + $0x78] sm:$0xff]  }
 0x177   : > { %v5740_v59 = vpop.f32.mrf.mxu0  ;;  %v5692_v52 = vpop.f32.mrf.mxu1  ;;  %v1334_v47 = vmax.f32 %v1302_v14, 0.0  ;;  %v1267_v30 = vmul.f32 %v6768_v36, %v1196_v31  ;;  %v1307_v9 = vadd.f32 %v6780_v46, %v1268_v35  ;;  %v6223_v51 = vld [vmem:[%s8611_s2 + $0x88] sm:$0xff]  }
 0x178   : > { %v6958_v19 = vpack.c.bf16 %v1329_v27, %v1328_v57  ;;  %v1259_v43 = vmul.f32 %v6768_v36, %v1220_v5  ;;  %v1223_v1 = vadd.f32 %v5740_v59, %v1191_v37  ;;  %v1327_v24 = vmax.f32 %v1295_v54, 0.0 }
 0x179   : > { %v1156_v56 = vpop.f32.mrf.mxu0  ;;  %v941_v50 = vpop.f32.mrf.mxu1  ;;  %v1300_v23 = vadd.f32 %v6780_v46, %v1261_v11  ;;  %v6995_v22 = vpack.c.bf16 %v1335_v13, %v1334_v47  ;;  %v1306_v15 = vadd.f32 %v6780_v46, %v1267_v30  ;;  %v1358_v37 = vlaneseq }
 0x17a   : > { %v1262_v39 = vmul.f32 %v6768_v36, %v1223_v1  ;;  %v1221_v2 = vadd.f32 %v1189_v7, %v1156_v56  ;;  %v6965_v33 = vpack.c.bf16 %v1327_v24, %v1326_v8  ;;  %v1298_v61 = vadd.f32 %v6780_v46, %v1259_v43  ;;  %v6224_v24 = vld [vmem:[%s8611_s2 + $0x80] sm:$0xff]  }
 0x17b   : > { %v1332_v62 = vmax.f32 %v1300_v23, 0.0  ;;  %8667 = vst [vmem:[#allocation14_spill] sm:$0xff] %v6995_v22  ;;  %v1338_v49 = vmax.f32 %v1306_v15, 0.0  ;;  %v7168_v57 = vshrl.u32 %v1358_v37, 7 }
 0x17c   : > { %v1301_v48 = vadd.f32 %v6780_v46, %v1262_v39  ;;  %v1260_v58 = vmul.f32 %v6768_v36, %v1221_v2  ;;  %5761 = vmatprep.mubr.msk.bf16.mxu1 %vm1479_vm0, %v6965_v33  ;;  %5797 = vmatprep.mubr.msk.bf16.mxu0 %vm1479_vm0, %v6965_v33  ;;  %v1330_v12 = vmax.f32 %v1298_v61, 0.0  ;;  %v1339_v36 = vmax.f32 %v1307_v9, 0.0 }
 0x17d   : > { %v7171_v27 = vadd.s32 8, %v7168_v57  ;;  %v7174_v5 = vadd.s32 32, %v7168_v57  ;;  %v7181_v21 = vadd.s32 24, %v7168_v57  ;;  %v7188_v54 = vadd.s32 16, %v7168_v57 }
 0x17e   : > { %v1333_v10 = vmax.f32 %v1301_v48, 0.0  ;;  %v1299_v26 = vadd.f32 %v6780_v46, %v1260_v58  ;;  %5762 = vmatmul.mubr.msk.bf16.gmra.mxu1 %vm1479_vm0, %v6958_v19  ;;  %5798 = vmatmul.mubr.msk.bf16.gmra.mxu0 %vm1479_vm0, %v6958_v19  ;;  %v7007_v55 = vpack.c.bf16 %v1339_v36, %v1338_v49  ;;  %v6216_v46 = vld [vmem:[%s8611_s2 + $0x40] sm:$0xff]   ;;  %v7195_v43 = vadd.s32 40, %v7168_v57 }
 0x17f   : > { %v8629_v11 = vand.u32 7, %v7171_v27  ;;  %v8628_v59 = vand.u32 7, %v7174_v5  ;;  %v8631_v52 = vand.u32 7, %v7181_v21  ;;  %v8630_v7 = vand.u32 7, %v7188_v54 }
 0x180   : > { %v6985_v53 = vpack.c.bf16 %v1333_v10, %v1332_v62  ;;  %v1331_v63 = vmax.f32 %v1299_v26, 0.0  ;;  %8668 = vst [vmem:[#allocation15_spill] sm:$0xff] %v7007_v55  ;;  %v8625_v2 = vand.u32 7, %v7195_v43  ;;  %v7226_v18 = vadd.s32 56, %v7168_v57 }
 0x181   : > { %v7199_v1 = vadd.s32 4294967295, %v8629_v11  ;;  %v7203_v8 = vadd.s32 4294967295, %v8628_v59  ;;  %v7214_v50 = vadd.s32 4294967295, %v8631_v52  ;;  %v7222_v39 = vadd.s32 4294967295, %v8630_v7 }
 0x182   : > { %8666 = vst [vmem:[#allocation13_spill] sm:$0xff] %v6985_v53  ;;  %v6988_v28 = vpack.c.bf16 %v1331_v63, %v1330_v12  ;;  %v7230_v58 = vadd.s32 48, %v7168_v57  ;;  %v7240_v12 = vadd.s32 4294967295, %v8625_v2  ;;  %v8627_v63 = vand.u32 7, %v7226_v18 }
 0x183   : > { %8669 = vst [vmem:[#allocation16_spill] sm:$0xff] %v7214_v50  ;;  %vm1807_vm2 = vcmp.ge.s32.totalorder %v7199_v1, 0  ;;  %vm1810_vm3 = vcmp.ge.s32.totalorder %v7203_v8, 0  ;;  %vm1809_vm4 = vcmp.ge.s32.totalorder %v7214_v50, 0  ;;  %vm1808_vm5 = vcmp.ge.s32.totalorder %v7222_v39, 0 }
 0x184   : > { %5765 = vmatprep.mubr.msk.bf16.mxu1 %vm1479_vm0, %v6988_v28  ;;  %5801 = vmatprep.mubr.msk.bf16.mxu0 %vm1479_vm0, %v6988_v28  ;;  %v8626_v9 = vand.u32 7, %v7230_v58  ;;  %vm8637_vm6 = vcmp.ge.s32.totalorder %v7240_v12, 0 }
 0x186   : > { %5766 = vmatmul.mubr.msk.bf16.gmra.mxu1 %vm1479_vm0, %v6985_v53  ;;  %5802 = vmatmul.mubr.msk.bf16.gmra.mxu0 %vm1479_vm0, %v6985_v53 }
 0x187   : > { %5769 = vmatprep.mubr.msk.bf16.mxu1 %vm1479_vm0, %v6995_v22  ;;  %5805 = vmatprep.mubr.msk.bf16.mxu0 %vm1479_vm0, %v6995_v22 }
 0x18e   : > { %5770 = vmatmul.mubr.msk.bf16.gmra.mxu1 %vm1479_vm0, %v6890_v4  ;;  %5806 = vmatmul.mubr.msk.bf16.gmra.mxu0 %vm1479_vm0, %v6890_v4 }
 0x18f   : > { %5773 = vmatprep.mubr.msk.bf16.mxu1 %vm1479_vm0, %v7007_v55  ;;  %5809 = vmatprep.mubr.msk.bf16.mxu0 %vm1479_vm0, %v7007_v55 }
 0x196   : > { %5774 = vmatmul.mubr.msk.bf16.gmra.mxu1 %vm1479_vm0, %v6929_v41  ;;  %5810 = vmatmul.mubr.msk.bf16.gmra.mxu0 %vm1479_vm0, %v6929_v41 }
 0x197   : > { %5817 = vmatprep.mubr.msk.bf16.mxu1 %vm1479_vm0, %v6801_v29  ;;  %5853 = vmatprep.mubr.msk.bf16.mxu0 %vm1479_vm0, %v6801_v29 }
 0x19e   : > { %5818 = vmatmul.mubr.msk.bf16.vlgmr.msra.gmra.mxu1 %vm1479_vm0, %v6804_v34  ;;  %5854 = vmatmul.mubr.msk.bf16.vlgmr.msra.gmra.mxu0 %vm1479_vm0, %v6804_v34 }
 0x19f   : > { %5821 = vmatprep.mubr.msk.bf16.mxu1 %vm1479_vm0, %v6847_v45  ;;  %5857 = vmatprep.mubr.msk.bf16.mxu0 %vm1479_vm0, %v6847_v45 }
 0x1a0   : > { %5886 = vmatpush3.bf16.msra.mxu1 %v6843_v44  ;;  %5922 = vmatpush3.bf16.msra.mxu0 %v6859_v6  ;;  %v6220_v44 = vld [vmem:[%s8611_s2 + $0x60] sm:$0xff]   ;;  %v6222_v6 = vld [vmem:[%s8611_s2 + $0x70] sm:$0xff]  }
 0x1a1   : > { %5887 = vmatprep.subr.bf16.mxu1 %v6216_v46  ;;  %5923 = vmatprep.subr.bf16.mxu0 %v6218_v17 }
 0x1a4   : > { %5888 = vmatpush3.bf16.msra.mxu1 %v6216_v46  ;;  %5924 = vmatpush3.bf16.msra.mxu0 %v6218_v17 }
 0x1a5   : > { %5957 = vmatprep.subr.bf16.mxu1 %v6219_v16  ;;  %5993 = vmatprep.subr.bf16.mxu0 %v6221_v40 }
 0x1a6   : > { %5822 = vmatmul.mubr.msk.bf16.gmra.mxu1 %vm1479_vm0, %v6851_v3  ;;  %5858 = vmatmul.mubr.msk.bf16.gmra.mxu0 %vm1479_vm0, %v6851_v3 }
 0x1a7   : > { %5825 = vmatprep.mubr.msk.bf16.mxu1 %vm1479_vm0, %v6900_v42  ;;  %5861 = vmatprep.mubr.msk.bf16.mxu0 %vm1479_vm0, %v6900_v42 }
 0x1ae   : > { %5826 = vmatmul.mubr.msk.bf16.gmra.mxu1 %vm1479_vm0, %v6904_v32  ;;  %5862 = vmatmul.mubr.msk.bf16.gmra.mxu0 %vm1479_vm0, %v6904_v32 }
 0x1af   : > { %5829 = vmatprep.mubr.msk.bf16.mxu1 %vm1479_vm0, %v6935_v0  ;;  %5865 = vmatprep.mubr.msk.bf16.mxu0 %vm1479_vm0, %v6935_v0 }
 0x1b6   : > { %5830 = vmatmul.mubr.msk.bf16.gmra.mxu1 %vm1479_vm0, %v6938_v60  ;;  %5866 = vmatmul.mubr.msk.bf16.gmra.mxu0 %vm1479_vm0, %v6938_v60 }
 0x1b7   : > { %5833 = vmatprep.mubr.msk.bf16.mxu1 %vm1479_vm0, %v6965_v33  ;;  %5869 = vmatprep.mubr.msk.bf16.mxu0 %vm1479_vm0, %v6965_v33 }
 0x1be   : > { %5834 = vmatmul.mubr.msk.bf16.gmra.mxu1 %vm1479_vm0, %v6958_v19  ;;  %5870 = vmatmul.mubr.msk.bf16.gmra.mxu0 %vm1479_vm0, %v6958_v19 }
 0x1bf   : > { %5837 = vmatprep.mubr.msk.bf16.mxu1 %vm1479_vm0, %v6988_v28  ;;  %5873 = vmatprep.mubr.msk.bf16.mxu0 %vm1479_vm0, %v6988_v28 }
 0x1c6   : > { %5838 = vmatmul.mubr.msk.bf16.gmra.mxu1 %vm1479_vm0, %v6985_v53  ;;  %5874 = vmatmul.mubr.msk.bf16.gmra.mxu0 %vm1479_vm0, %v6985_v53 }
 0x1c7   : > { %5841 = vmatprep.mubr.msk.bf16.mxu1 %vm1479_vm0, %v6995_v22  ;;  %5877 = vmatprep.mubr.msk.bf16.mxu0 %vm1479_vm0, %v6995_v22 }
 0x1ce   : > { %5842 = vmatmul.mubr.msk.bf16.gmra.mxu1 %vm1479_vm0, %v6890_v4  ;;  %5878 = vmatmul.mubr.msk.bf16.gmra.mxu0 %vm1479_vm0, %v6890_v4 }
 0x1cf   : > { %5845 = vmatprep.mubr.msk.bf16.mxu1 %vm1479_vm0, %v7007_v55  ;;  %5881 = vmatprep.mubr.msk.bf16.mxu0 %vm1479_vm0, %v7007_v55 }
 0x1d6   : > { %5846 = vmatmul.mubr.msk.bf16.gmra.mxu1 %vm1479_vm0, %v6929_v41  ;;  %5882 = vmatmul.mubr.msk.bf16.gmra.mxu0 %vm1479_vm0, %v6929_v41 }
 0x1d7   : > { %5889 = vmatprep.mubr.msk.bf16.mxu1 %vm1479_vm0, %v6801_v29  ;;  %5925 = vmatprep.mubr.msk.bf16.mxu0 %vm1479_vm0, %v6801_v29 }
 0x1de   : > { %5890 = vmatmul.mubr.msk.bf16.vlgmr.msra.gmra.mxu1 %vm1479_vm0, %v6804_v34  ;;  %5926 = vmatmul.mubr.msk.bf16.vlgmr.msra.gmra.mxu0 %vm1479_vm0, %v6804_v34 }
 0x1df   : > { %5893 = vmatprep.mubr.msk.bf16.mxu1 %vm1479_vm0, %v6847_v45  ;;  %5929 = vmatprep.mubr.msk.bf16.mxu0 %vm1479_vm0, %v6847_v45 }
 0x1e0   : > { %5958 = vmatpush3.bf16.msra.mxu1 %v6219_v16  ;;  %5994 = vmatpush3.bf16.msra.mxu0 %v6221_v40 }
 0x1e1   : > { %5959 = vmatprep.subr.bf16.mxu1 %v6220_v44  ;;  %5995 = vmatprep.subr.bf16.mxu0 %v6222_v6 }
 0x1e4   : > { %5960 = vmatpush3.bf16.msra.mxu1 %v6220_v44  ;;  %5996 = vmatpush3.bf16.msra.mxu0 %v6222_v6 }
 0x1e5   : > { %6029 = vmatprep.subr.bf16.mxu1 %v6223_v51 }
 0x1e6   : > { %5894 = vmatmul.mubr.msk.bf16.gmra.mxu1 %vm1479_vm0, %v6851_v3  ;;  %5930 = vmatmul.mubr.msk.bf16.gmra.mxu0 %vm1479_vm0, %v6851_v3 }
 0x1e7   : > { %5897 = vmatprep.mubr.msk.bf16.mxu1 %vm1479_vm0, %v6900_v42  ;;  %5933 = vmatprep.mubr.msk.bf16.mxu0 %vm1479_vm0, %v6900_v42 }
 0x1ee   : > { %5898 = vmatmul.mubr.msk.bf16.gmra.mxu1 %vm1479_vm0, %v6904_v32  ;;  %5934 = vmatmul.mubr.msk.bf16.gmra.mxu0 %vm1479_vm0, %v6904_v32 }
 0x1ef   : > { %5901 = vmatprep.mubr.msk.bf16.mxu1 %vm1479_vm0, %v6935_v0  ;;  %5937 = vmatprep.mubr.msk.bf16.mxu0 %vm1479_vm0, %v6935_v0 }
 0x1f6   : > { %5902 = vmatmul.mubr.msk.bf16.gmra.mxu1 %vm1479_vm0, %v6938_v60  ;;  %5938 = vmatmul.mubr.msk.bf16.gmra.mxu0 %vm1479_vm0, %v6938_v60 }
 0x1f7   : > { %5905 = vmatprep.mubr.msk.bf16.mxu1 %vm1479_vm0, %v6965_v33  ;;  %5941 = vmatprep.mubr.msk.bf16.mxu0 %vm1479_vm0, %v6965_v33 }
 0x1fe   : > { %5906 = vmatmul.mubr.msk.bf16.gmra.mxu1 %vm1479_vm0, %v6958_v19  ;;  %5942 = vmatmul.mubr.msk.bf16.gmra.mxu0 %vm1479_vm0, %v6958_v19 }
 0x1ff   : > { %5909 = vmatprep.mubr.msk.bf16.mxu1 %vm1479_vm0, %v6988_v28  ;;  %5945 = vmatprep.mubr.msk.bf16.mxu0 %vm1479_vm0, %v6988_v28 }
 0x206   : > { %5910 = vmatmul.mubr.msk.bf16.gmra.mxu1 %vm1479_vm0, %v6985_v53  ;;  %5946 = vmatmul.mubr.msk.bf16.gmra.mxu0 %vm1479_vm0, %v6985_v53 }
 0x207   : > { %5913 = vmatprep.mubr.msk.bf16.mxu1 %vm1479_vm0, %v6995_v22  ;;  %5949 = vmatprep.mubr.msk.bf16.mxu0 %vm1479_vm0, %v6995_v22 }
 0x20e   : > { %5914 = vmatmul.mubr.msk.bf16.gmra.mxu1 %vm1479_vm0, %v6890_v4  ;;  %5950 = vmatmul.mubr.msk.bf16.gmra.mxu0 %vm1479_vm0, %v6890_v4 }
 0x20f   : > { %5917 = vmatprep.mubr.msk.bf16.mxu1 %vm1479_vm0, %v7007_v55  ;;  %5953 = vmatprep.mubr.msk.bf16.mxu0 %vm1479_vm0, %v7007_v55 }
 0x216   : > { %5918 = vmatmul.mubr.msk.bf16.gmra.mxu1 %vm1479_vm0, %v6929_v41  ;;  %5954 = vmatmul.mubr.msk.bf16.gmra.mxu0 %vm1479_vm0, %v6929_v41 }
 0x217   : > { %5961 = vmatprep.mubr.msk.bf16.mxu1 %vm1479_vm0, %v6801_v29  ;;  %5997 = vmatprep.mubr.msk.bf16.mxu0 %vm1479_vm0, %v6801_v29 }
 0x21d   : > { %v5747_v38 = vpop.f32.mrf.mxu1  ;;  %v5783_v56 = vpop.f32.mrf.mxu0 }
 0x21e   : > { %5962 = vmatmul.mubr.msk.bf16.vlgmr.msra.gmra.mxu1 %vm1479_vm0, %v6804_v34  ;;  %5998 = vmatmul.mubr.msk.bf16.vlgmr.msra.gmra.mxu0 %vm1479_vm0, %v6804_v34  ;;  %v1717_v20 = vrot.slane %v5747_v38, 7 }
 0x21f   : > { %5965 = vmatprep.mubr.msk.bf16.mxu1 %vm1479_vm0, %v6847_v45  ;;  %6001 = vmatprep.mubr.msk.bf16.mxu0 %vm1479_vm0, %v6847_v45  ;;  %v1562_v23 = vpop.f32.mrf.mxu1  ;;  %v1953_v48 = vpop.f32.mrf.mxu0 }
 0x220   : > { %6030 = vmatpush3.bf16.msra.mxu1 %v6223_v51  ;;  %v1714_v61 = vrot.slane %v1562_v23, 7  ;;  %v7268_v51 = vadd.s32 4294967295, %v8627_v63  ;;  %v7274_v23 = vadd.s32 4294967295, %v8626_v9 }
 0x221   : > { %v5748_v25 = vpop.f32.mrf.mxu1  ;;  %6031 = vmatprep.subr.bf16.mxu1 %v6224_v24  ;;  %v5784_v26 = vpop.f32.mrf.mxu0 }
 0x222   : > { %v1794_v62 = vsel %vm1713_vm1, 0.0, %v1714_v61  ;;  %v1719_v10 = vrot.slane %v5748_v25, 7  ;;  %vm8640_vm7 = vcmp.ge.s32.totalorder %v7268_v51, 0  ;;  %vm8642_vm8 = vcmp.ge.s32.totalorder %v7274_v23, 0 }
 0x223   : > { %v1846_v14 = vsel %vm1807_vm2, %v1794_v62, 0.0  ;;  %v1565_v31 = vpop.f32.mrf.mxu1  ;;  %v1956_v30 = vpop.f32.mrf.mxu0 }
 0x224   : > { %v7243_v13 = vadd.f32 %v1953_v48, %v1846_v14  ;;  %v1720_v35 = vsel %vm1713_vm1, %v1717_v20, %v1719_v10  ;;  %v1715_v47 = vrot.slane %v1565_v31, 7  ;;  %6032 = vmatpush3.bf16.msra.mxu1 %v6224_v24 }
 0x225   : > { %v1849_v15 = vsel %vm1810_vm3, %v1720_v35, 0.0  ;;  %v5751_v36 = vpop.f32.mrf.mxu1  ;;  %v5787_v16 = vpop.f32.mrf.mxu0 }
 0x226   : > { %v7249_v49 = vadd.f32 %v5784_v26, %v1849_v15  ;;  %v1718_v46 = vsel %vm1713_vm1, %v1715_v47, %v1717_v20  ;;  %v1716_v17 = vsel %vm1713_vm1, %v1714_v61, %v1715_v47  ;;  %5966 = vmatmul.mubr.msk.bf16.gmra.mxu1 %vm1479_vm0, %v6851_v3  ;;  %6002 = vmatmul.mubr.msk.bf16.gmra.mxu0 %vm1479_vm0, %v6851_v3  ;;  %v1725_v14 = vrot.slane %v5751_v36, 7 }
 0x227   : > { %v1848_v40 = vsel %vm1809_vm4, %v1718_v46, 0.0  ;;  %v1847_v44 = vsel %vm1808_vm5, %v1716_v17, 0.0  ;;  %5969 = vmatprep.mubr.msk.bf16.mxu1 %vm1479_vm0, %v6900_v42  ;;  %6005 = vmatprep.mubr.msk.bf16.mxu0 %vm1479_vm0, %v6900_v42  ;;  %v1578_v6 = vpop.f32.mrf.mxu1  ;;  %v1969_v24 = vpop.f32.mrf.mxu0 }
 0x228   : > { %v7270_v37 = vadd.f32 %v1956_v30, %v1847_v44  ;;  %v1721_v38 = vrot.slane %v1578_v6, 7  ;;  %v7276_v61 = vadd.f32 %v5783_v56, %v1848_v40 }
 0x229   : > { %v5752_v48 = vpop.f32.mrf.mxu1  ;;  %v5788_v20 = vpop.f32.mrf.mxu0 }
 0x22a   : > { %v1722_v25 = vsel %vm1713_vm1, %v1719_v10, %v1721_v38 }
 0x22b   : > { %v1850_v62 = vsel %vm8637_vm6, %v1722_v25, 0.0  ;;  %v1581_v26 = vpop.f32.mrf.mxu1  ;;  %v1972_v47 = vpop.f32.mrf.mxu0 }
 0x22c   : > { %v7282_v31 = vadd.f32 %v1969_v24, %v1850_v62  ;;  %v1723_v35 = vrot.slane %v1581_v26, 7 }
 0x22e   : > { %v1726_v56 = vsel %vm1713_vm1, %v1723_v35, %v1725_v14  ;;  %v1724_v30 = vsel %vm1713_vm1, %v1721_v38, %v1723_v35  ;;  %v5755_v15 = vpop.f32.mrf.mxu1  ;;  %v5791_v10 = vpop.f32.mrf.mxu0  ;;  %5970 = vmatmul.mubr.msk.bf16.gmra.mxu1 %vm1479_vm0, %v6904_v32  ;;  %6006 = vmatmul.mubr.msk.bf16.gmra.mxu0 %vm1479_vm0, %v6904_v32 }
 0x22f   : > { %v1852_v36 = vsel %vm8640_vm7, %v1726_v56, 0.0  ;;  %v1851_v46 = vsel %vm8642_vm8, %v1724_v30, 0.0  ;;  %5973 = vmatprep.mubr.msk.bf16.mxu1 %vm1479_vm0, %v6935_v0  ;;  %6009 = vmatprep.mubr.msk.bf16.mxu0 %vm1479_vm0, %v6935_v0  ;;  %v1730_v25 = vrot.slane %v5755_v15, 7 }
 0x230   : > { %v7299_v17 = vadd.f32 %v1972_v47, %v1851_v46  ;;  %v1593_v40 = vpop.f32.mrf.mxu1  ;;  %v1984_v44 = vpop.f32.mrf.mxu0  ;;  %v7301_v6 = vadd.f32 %v5787_v16, %v1852_v36 }
 0x231   : > { %v1727_v38 = vrot.slane %v1593_v40, 7 }
 0x232   : > { %v5756_v24 = vpop.f32.mrf.mxu1  ;;  %v5792_v48 = vpop.f32.mrf.mxu0 }
 0x233   : > { %v1795_v20 = vsel %vm1713_vm1, 0.0, %v1727_v38  ;;  %v1732_v62 = vrot.slane %v5756_v24, 7 }
 0x234   : > { %v1853_v26 = vsel %vm1807_vm2, %v1795_v20, 0.0  ;;  %v1596_v14 = vpop.f32.mrf.mxu1  ;;  %v1987_v35 = vpop.f32.mrf.mxu0 }
 0x235   : > { %v7306_v56 = vadd.f32 %v1984_v44, %v1853_v26  ;;  %v1733_v47 = vsel %vm1713_vm1, %v1730_v25, %v1732_v62  ;;  %v1728_v30 = vrot.slane %v1596_v14, 7 }
 0x236   : > { %v1856_v16 = vsel %vm1810_vm3, %v1733_v47, 0.0  ;;  %v5759_v36 = vpop.f32.mrf.mxu1  ;;  %v5795_v46 = vpop.f32.mrf.mxu0  ;;  %5974 = vmatmul.mubr.msk.bf16.gmra.mxu1 %vm1479_vm0, %v6938_v60  ;;  %6010 = vmatmul.mubr.msk.bf16.gmra.mxu0 %vm1479_vm0, %v6938_v60 }
 0x237   : > { %v7315_v15 = vadd.f32 %v5792_v48, %v1856_v16  ;;  %v1731_v40 = vsel %vm1713_vm1, %v1728_v30, %v1730_v25  ;;  %v1729_v44 = vsel %vm1713_vm1, %v1727_v38, %v1728_v30  ;;  %5977 = vmatprep.mubr.msk.bf16.mxu1 %vm1479_vm0, %v6965_v33  ;;  %6013 = vmatprep.mubr.msk.bf16.mxu0 %vm1479_vm0, %v6965_v33 }
 0x238   : > { %v1855_v24 = vsel %vm1809_vm4, %v1731_v40, 0.0  ;;  %v1854_v20 = vsel %vm1808_vm5, %v1729_v44, 0.0  ;;  %v1609_v26 = vpop.f32.mrf.mxu1  ;;  %v2000_v14 = vpop.f32.mrf.mxu0  ;;  %v1738_v40 = vrot.slane %v5759_v36, 7 }
 0x239   : > { %v7327_v48 = vadd.f32 %v1987_v35, %v1854_v20  ;;  %v1734_v47 = vrot.slane %v1609_v26, 7  ;;  %v7329_v25 = vadd.f32 %v5791_v10, %v1855_v24 }
 0x23a   : > { %v5760_v38 = vpop.f32.mrf.mxu1  ;;  %v5796_v30 = vpop.f32.mrf.mxu0 }
 0x23b   : > { %v1735_v16 = vsel %vm1713_vm1, %v1732_v62, %v1734_v47 }
 0x23c   : > { %v1857_v2 = vsel %vm8637_vm6, %v1735_v16, 0.0  ;;  %v1612_v9 = vpop.f32.mrf.mxu1  ;;  %v2003_v63 = vpop.f32.mrf.mxu0 }
 0x23d   : > { %v7334_v59 = vadd.f32 %v2000_v14, %v1857_v2  ;;  %v1736_v44 = vrot.slane %v1612_v9, 7 }
 0x23e   : > { %v5763_v11 = vpop.f32.mrf.mxu1  ;;  %v5799_v7 = vpop.f32.mrf.mxu0  ;;  %5978 = vmatmul.mubr.msk.bf16.gmra.mxu1 %vm1479_vm0, %v6958_v19  ;;  %6014 = vmatmul.mubr.msk.bf16.gmra.mxu0 %vm1479_vm0, %v6958_v19 }
 0x23f   : > { %8670 = vst [vmem:[#allocation17_spill] sm:$0xff] %v7334_v59  ;;  %v1739_v10 = vsel %vm1713_vm1, %v1736_v44, %v1738_v40  ;;  %v1737_v62 = vsel %vm1713_vm1, %v1734_v47, %v1736_v44  ;;  %5981 = vmatprep.mubr.msk.bf16.mxu1 %vm1479_vm0, %v6988_v28  ;;  %6017 = vmatprep.mubr.msk.bf16.mxu0 %vm1479_vm0, %v6988_v28  ;;  %v1743_v38 = vrot.slane %v5763_v11, 7 }
 0x240   : > { %v1859_v2 = vsel %vm8640_vm7, %v1739_v10, 0.0  ;;  %v1858_v9 = vsel %vm8642_vm8, %v1737_v62, 0.0  ;;  %v1624_v35 = vpop.f32.mrf.mxu1  ;;  %v2015_v36 = vpop.f32.mrf.mxu0 }
 0x241   : > { %v7350_v24 = vadd.f32 %v2003_v63, %v1858_v9  ;;  %v1740_v20 = vrot.slane %v1624_v35, 7  ;;  %v7352_v26 = vadd.f32 %v5795_v46, %v1859_v2 }
 0x242   : > { %v5764_v14 = vpop.f32.mrf.mxu1  ;;  %v5800_v47 = vpop.f32.mrf.mxu0 }
 0x243   : > { %v1796_v30 = vsel %vm1713_vm1, 0.0, %v1740_v20  ;;  %v1745_v16 = vrot.slane %v5764_v14, 7 }
 0x244   : > { %v1860_v40 = vsel %vm1807_vm2, %v1796_v30, 0.0  ;;  %v1627_v44 = vpop.f32.mrf.mxu1  ;;  %v7357_v10 = vpop.f32.mrf.mxu0 }
 0x245   : > { %v7359_v62 = vadd.f32 %v2015_v36, %v1860_v40  ;;  %v1746_v63 = vsel %vm1713_vm1, %v1743_v38, %v1745_v16  ;;  %v1741_v9 = vrot.slane %v1627_v44, 7 }
 0x246   : > { %v1863_v46 = vsel %vm1810_vm3, %v1746_v63, 0.0  ;;  %v5767_v2 = vpop.f32.mrf.mxu1  ;;  %v5803_v35 = vpop.f32.mrf.mxu0  ;;  %5982 = vmatmul.mubr.msk.bf16.gmra.mxu1 %vm1479_vm0, %v6985_v53  ;;  %6018 = vmatmul.mubr.msk.bf16.gmra.mxu0 %vm1479_vm0, %v6985_v53 }
 0x247   : > { %8671 = vst [vmem:[#allocation18_spill] sm:$0xff] %v7359_v62  ;;  %v7368_v11 = vadd.f32 %v5800_v47, %v1863_v46  ;;  %v1744_v14 = vsel %vm1713_vm1, %v1741_v9, %v1743_v38  ;;  %v7372_v36 = vsel %vm1713_vm1, %v1740_v20, %v1741_v9  ;;  %5985 = vmatprep.mubr.msk.bf16.mxu1 %vm1479_vm0, %v6995_v22  ;;  %v1751_v62 = vrot.slane %v5767_v2, 7 }
 0x248   : > { %6021 = vmatprep.mubr.msk.bf16.mxu0 %vm1479_vm0, %v6995_v22  ;;  %v1862_v30 = vsel %vm1809_vm4, %v1744_v14, 0.0  ;;  %v1640_v40 = vpop.f32.mrf.mxu1  ;;  %v2031_v44 = vpop.f32.mrf.mxu0 }
 0x249   : > { %8672 = vst [vmem:[#allocation19_spill] sm:$0xff] %v7368_v11  ;;  %v1747_v63 = vrot.slane %v1640_v40, 7  ;;  %v7380_v52 = vadd.f32 %v5799_v7, %v1862_v30 }
 0x24a   : > { %v5768_v47 = vpop.f32.mrf.mxu1  ;;  %v5804_v46 = vpop.f32.mrf.mxu0 }
 0x24b   : > { %v1748_v38 = vsel %vm1713_vm1, %v1745_v16, %v1747_v63 }
 0x24c   : > { %v1864_v20 = vsel %vm8637_vm6, %v1748_v38, 0.0  ;;  %v1643_v9 = vpop.f32.mrf.mxu1  ;;  %v7385_v11 = vpop.f32.mrf.mxu0 }
 0x24d   : > { %v7387_v22 = vadd.f32 %v2031_v44, %v1864_v20  ;;  %v1749_v53 = vrot.slane %v1643_v9, 7 }
 0x24e   : > { %v5771_v14 = vpop.f32.mrf.mxu1  ;;  %v5807_v59 = vpop.f32.mrf.mxu0  ;;  %5986 = vmatmul.mubr.msk.bf16.gmra.mxu1 %vm1479_vm0, %v6890_v4  ;;  %6022 = vmatmul.mubr.msk.bf16.gmra.mxu0 %vm1479_vm0, %v6890_v4 }
 0x24f   : > { %8673 = vst [vmem:[#allocation20_spill] sm:$0xff] %v7387_v22  ;;  %v1752_v7 = vsel %vm1713_vm1, %v1749_v53, %v1751_v62  ;;  %v7395_v16 = vsel %vm1713_vm1, %v1747_v63, %v1749_v53  ;;  %5989 = vmatprep.mubr.msk.bf16.mxu1 %vm1479_vm0, %v7007_v55  ;;  %6025 = vmatprep.mubr.msk.bf16.mxu0 %vm1479_vm0, %v7007_v55  ;;  %v1756_v62 = vrot.slane %v5771_v14, 7  ;;  %v1371_v14 = vand.u32 7, %v7168_v57 }
 0x250   : > { %v1866_v2 = vsel %vm8640_vm7, %v1752_v7, 0.0  ;;  %v1655_v30 = vpop.f32.mrf.mxu1  ;;  %v2046_v40 = vpop.f32.mrf.mxu0 }
 0x251   : > { %v1753_v44 = vrot.slane %v1655_v30, 7  ;;  %v7403_v47 = vadd.f32 %v5803_v35, %v1866_v2 }
 0x252   : > { %v5772_v46 = vpop.f32.mrf.mxu1  ;;  %v5808_v38 = vpop.f32.mrf.mxu0 }
 0x253   : > { %8674 = vst [vmem:[#allocation21_spill] sm:$0xff] %v7403_v47  ;;  %v1797_v53 = vsel %vm1713_vm1, 0.0, %v1753_v44  ;;  %v1758_v63 = vrot.slane %v5772_v46, 7 }
 0x254   : > { %v1867_v20 = vsel %vm1807_vm2, %v1797_v53, 0.0  ;;  %v1658_v9 = vpop.f32.mrf.mxu1  ;;  %v7408_v22 = vpop.f32.mrf.mxu0 }
 0x255   : > { %v7410_v55 = vadd.f32 %v2046_v40, %v1867_v20  ;;  %v1759_v7 = vsel %vm1713_vm1, %v1756_v62, %v1758_v63  ;;  %v1754_v4 = vrot.slane %v1658_v9, 7 }
 0x256   : > { %v1870_v35 = vsel %vm1810_vm3, %v1759_v7, 0.0  ;;  %v5775_v2 = vpop.f32.mrf.mxu1  ;;  %v5811_v30 = vpop.f32.mrf.mxu0  ;;  %5990 = vmatmul.mubr.msk.bf16.gmra.mxu1 %vm1479_vm0, %v6929_v41  ;;  %6026 = vmatmul.mubr.msk.bf16.gmra.mxu0 %vm1479_vm0, %v6929_v41 }
 0x257   : > { %8675 = vst [vmem:[#allocation22_spill] sm:$0xff] %v7410_v55  ;;  %v7420_v46 = vadd.f32 %v5808_v38, %v1870_v35  ;;  %v1757_v40 = vsel %vm1713_vm1, %v1754_v4, %v1756_v62  ;;  %v7424_v53 = vsel %vm1713_vm1, %v1753_v44, %v1754_v4  ;;  %6033 = vmatprep.mubr.msk.bf16.mxu1 %vm1479_vm0, %v6801_v29  ;;  %v7432_v38 = vadd.s32 4294967295, %v1371_v14 }
 0x258   : > { %v1869_v20 = vsel %vm1809_vm4, %v1757_v40, 0.0  ;;  %v1671_v9 = vpop.f32.mrf.mxu1  ;;  %v2062_v7 = vpop.f32.mrf.mxu0  ;;  %v7435_v35 = vadd.s32 1, %v1371_v14  ;;  %v8679_v4 = vand.u32 7, %v7181_v21 }
 0x259   : > { %8676 = vst [vmem:[#allocation23_spill] sm:$0xff] %v7420_v46  ;;  %v1760_v55 = vrot.slane %v1671_v9, 7  ;;  %v7430_v47 = vadd.f32 %v5807_v59, %v1869_v20  ;;  %8678 = vst [vmem:[#allocation25_spill] sm:$0xff] %v7432_v38  ;;  %v8682_v59 = vand.u32 7, %v7188_v54  ;;  %v8683_v20 = vand.u32 7, %v7171_v27 }
 0x25a   : > { %v5776_v41 = vpop.f32.mrf.mxu1  ;;  %v5812_v57 = vpop.f32.mrf.mxu0  ;;  %v7439_v44 = vadd.s32 1, %v8679_v4  ;;  %vm8638_vm10 = vcmp.ge.s32.totalorder %v7432_v38, 0  ;;  %vm8639_vm11 = vcmp.lt.s32.totalorder %v7435_v35, 8 }
 0x25b   : > { %8677 = vst [vmem:[#allocation24_spill] sm:$0xff] %v7430_v47  ;;  %v1761_v62 = vsel %vm1713_vm1, %v1758_v63, %v1760_v55  ;;  %v7447_v41 = vadd.s32 1, %v8682_v59  ;;  %v7451_v9 = vadd.s32 1, %v8683_v20  ;;  %v1764_v63 = vrot.slane %v5775_v2, 7 }
 0x25c   : > { %8680 = vst [vmem:[#allocation26_spill] sm:$0xff] %v7439_v44  ;;  %v1871_v29 = vsel %vm8637_vm6, %v1761_v62, 0.0  ;;  %v1674_v40 = vpop.f32.mrf.mxu1  ;;  %v7443_v46 = vpop.f32.mrf.mxu0  ;;  %v8685_v57 = vand.u32 7, %v7174_v5  ;;  %vm2430_vm12 = vcmp.lt.s32.totalorder %v7439_v44, 8  ;;  %v1861_v59 = vsel %vm1808_vm5, %v7372_v36, 0.0 }
 0x25d   : > { %8681 = vst [vmem:[#allocation27_spill] sm:$0xff] %v7443_v46  ;;  %v7453_v14 = vadd.f32 %v2062_v7, %v1871_v29  ;;  %v1762_v21 = vrot.slane %v1674_v40, 7  ;;  %vm2429_vm13 = vcmp.lt.s32.totalorder %v7447_v41, 8  ;;  %vm2428_vm14 = vcmp.lt.s32.totalorder %v7451_v9, 8 }
 0x25e   : > { %v7457_v4 = vadd.s32 1, %v8685_v57  ;;  %v5819_v62 = vpop.f32.mrf.mxu1  ;;  %v5855_v47 = vpop.f32.mrf.mxu0  ;;  %6034 = vmatmul.mubr.msk.bf16.vlgmr.msra.gmra.mxu1 %vm1479_vm0, %v6804_v34  ;;  %v8688_v7 = vand.u32 7, %v7226_v18  ;;  %v8690_v57 = vand.u32 7, %v7230_v58  ;;  %v8692_v18 = vand.u32 7, %v7195_v43 }
 0x25f   : > { %8684 = vst [vmem:[#allocation28_spill] sm:$0xff] %v7453_v14  ;;  %v1765_v27 = vsel %vm1713_vm1, %v1762_v21, %v1764_v63  ;;  %v7464_v54 = vsel %vm1713_vm1, %v1760_v55, %v1762_v21  ;;  %6037 = vmatprep.mubr.msk.bf16.mxu1 %vm1479_vm0, %v6847_v45  ;;  %v2318_v20 = vrot.slane %v5819_v62, 1  ;;  %v2736_v14 = vrot.slane %v5855_v47, 7 }
 0x260   : > { %8686 = vst [vmem:[#allocation29_spill] sm:$0xff] %v7457_v4  ;;  %8687 = vst [vmem:[#allocation30_spill] sm:$0xff] %v7464_v54  ;;  %v1873_v5 = vsel %vm8640_vm7, %v1765_v27, 0.0  ;;  %v2155_v2 = vpop.f32.mrf.mxu1  ;;  %v2574_v34 = vpop.f32.mrf.mxu0  ;;  %v7476_v55 = vadd.s32 1, %v8688_v7  ;;  %vm2431_vm15 = vcmp.lt.s32.totalorder %v7457_v4, 8  ;;  %v7486_v27 = vadd.s32 1, %v8690_v57 }
 0x261   : > { %v2315_v29 = vrot.slane %v2155_v2, 1  ;;  %v2733_v40 = vrot.slane %v2574_v34, 7  ;;  %v7479_v45 = vadd.f32 %v5811_v30, %v1873_v5  ;;  %v7490_v7 = vadd.s32 1, %v8692_v18 }
 0x262   : > { %v5820_v63 = vpop.f32.mrf.mxu1  ;;  %v5856_v21 = vpop.f32.mrf.mxu0  ;;  %8691 = vst [vmem:[#allocation32_spill] sm:$0xff] %v7486_v27  ;;  %vm2434_vm6 = vcmp.lt.s32.totalorder %v7476_v55, 8 }
 0x263   : > { %8689 = vst [vmem:[#allocation31_spill] sm:$0xff] %v7479_v45  ;;  %8693 = vst [vmem:[#allocation33_spill] sm:$0xff] %v7490_v7  ;;  %v2407_v2 = vsel %vm2314_vm9, 0.0, %v2315_v29  ;;  %v2825_v30 = vsel %vm1713_vm1, 0.0, %v2733_v40  ;;  %v2320_v5 = vrot.slane %v5820_v63, 1  ;;  %v2738_v34 = vrot.slane %v5856_v21, 7 }
 0x264   : > { %v2158_v45 = vpop.f32.mrf.mxu1  ;;  %v2577_v36 = vpop.f32.mrf.mxu0  ;;  %v2459_v62 = vsel %vm8639_vm11, %v2407_v2, 0.0  ;;  %v2829_v58 = vsel %vm8638_vm10, %v2825_v30, 0.0  ;;  %v7503_v63 = vadd.f32 %v7357_v10, %v1861_v59  ;;  %vm2433_vm10 = vcmp.lt.s32.totalorder %v7486_v27, 8 }
 0x265   : > { %v2321_v43 = vsel %vm2314_vm9, %v2318_v20, %v2320_v5  ;;  %v2316_v57 = vrot.slane %v2158_v45, 1  ;;  %v2734_v18 = vrot.slane %v2577_v36, 7  ;;  %v7500_v46 = vadd.f32 %v2829_v58, %v2459_v62 }
 0x266   : > { %8695 = vst [vmem:[#allocation35_spill] sm:$0xff] %v7503_v63  ;;  %v5823_v47 = vpop.f32.mrf.mxu1  ;;  %v5859_v21 = vpop.f32.mrf.mxu0  ;;  %6038 = vmatmul.mubr.msk.bf16.gmra.mxu1 %vm1479_vm0, %v6851_v3  ;;  %v2462_v2 = vsel %vm2430_vm12, %v2321_v43, 0.0  ;;  %v2739_v30 = vsel %vm1713_vm1, %v2736_v14, %v2738_v34  ;;  %v1865_v45 = vsel %vm8642_vm8, %v7395_v16, 0.0  ;;  %vm8641_vm11 = vcmp.lt.s32.totalorder %v7490_v7, 8 }
 0x267   : > { %8694 = vst [vmem:[#allocation34_spill] sm:$0xff] %v7500_v46  ;;  %v2317_v36 = vsel %vm2314_vm9, %v2315_v29, %v2316_v57  ;;  %v2319_v10 = vsel %vm2314_vm9, %v2316_v57, %v2318_v20  ;;  %v2326_v59 = vrot.slane %v5823_v47, 1  ;;  %6041 = vmatprep.mubr.msk.bf16.mxu1 %vm1479_vm0, %v6900_v42  ;;  %v2744_v3 = vrot.slane %v5859_v21, 7 }
 0x268   : > { %v2171_v62 = vpop.f32.mrf.mxu1  ;;  %v2590_v58 = vpop.f32.mrf.mxu0  ;;  %v2461_v43 = vsel %vm2429_vm13, %v2319_v10, 0.0  ;;  %v2737_v46 = vsel %vm1713_vm1, %v2734_v18, %v2736_v14  ;;  %v2494_v16 = vadd.f32 %v2462_v2, %v7276_v61  ;;  %v2832_v57 = vsel %vm1809_vm4, %v2739_v30, 0.0 }
 0x269   : > { %v2322_v54 = vrot.slane %v2171_v62, 1  ;;  %v2740_v29 = vrot.slane %v2590_v58, 7  ;;  %v2493_v20 = vadd.f32 %v2461_v43, %v7270_v37  ;;  %v2831_v21 = vsel %vm1808_vm5, %v2737_v46, 0.0 }
 0x26a   : > { %v5824_v42 = vpop.f32.mrf.mxu1  ;;  %v5860_v47 = vpop.f32.mrf.mxu0  ;;  %v7528_v63 = vadd.f32 %v2832_v57, %v2494_v16  ;;  %v2460_v10 = vsel %vm2428_vm14, %v2317_v36, 0.0  ;;  %v2735_v14 = vsel %vm1713_vm1, %v2733_v40, %v2734_v18 }
 0x26b   : > { %v2323_v61 = vsel %vm2314_vm9, %v2320_v5, %v2322_v54  ;;  %v2328_v2 = vrot.slane %v5824_v42, 1  ;;  %v2746_v62 = vrot.slane %v5860_v47, 7  ;;  %v7534_v37 = vadd.f32 %v2831_v21, %v2493_v20 }
 0x26c   : > { %v2174_v58 = vpop.f32.mrf.mxu1  ;;  %v2593_v30 = vpop.f32.mrf.mxu0  ;;  %v2492_v43 = vadd.f32 %v2460_v10, %v7243_v13  ;;  %v2830_v46 = vsel %vm1807_vm2, %v2735_v14, 0.0  ;;  %v2463_v16 = vsel %vm2431_vm15, %v2323_v61, 0.0  ;;  %v2741_v36 = vsel %vm1713_vm1, %v2738_v34, %v2740_v29 }
 0x26d   : > { %v2329_v40 = vsel %vm2314_vm9, %v2326_v59, %v2328_v2  ;;  %v2324_v18 = vrot.slane %v2174_v58, 1  ;;  %v2742_v5 = vrot.slane %v2593_v30, 7  ;;  %v2495_v57 = vadd.f32 %v2463_v16, %v7249_v49 }
 0x26e   : > { %v7545_v20 = vadd.f32 %v7385_v11, %v1865_v45  ;;  %v5827_v42 = vpop.f32.mrf.mxu1  ;;  %v5863_v47 = vpop.f32.mrf.mxu0  ;;  %6042 = vmatmul.mubr.msk.bf16.gmra.mxu1 %vm1479_vm0, %v6904_v32  ;;  %v7549_v13 = vadd.f32 %v2830_v46, %v2492_v43  ;;  %v2466_v21 = vsel %vm2434_vm6, %v2329_v40, 0.0  ;;  %v2747_v34 = vsel %vm1713_vm1, %v2744_v3, %v2746_v62 }
 0x26f   : > { %v2325_v10 = vsel %vm2314_vm9, %v2322_v54, %v2324_v18  ;;  %v2327_v14 = vsel %vm2314_vm9, %v2324_v18, %v2326_v59  ;;  %v2333_v49 = vrot.slane %v5827_v42, 1  ;;  %6045 = vmatprep.mubr.msk.bf16.mxu1 %vm1479_vm0, %v6935_v0  ;;  %v2833_v11 = vsel %vm1810_vm3, %v2741_v36, 0.0 }
 0x270   : > { %v2187_v45 = vpop.f32.mrf.mxu1  ;;  %v2606_v32 = vpop.f32.mrf.mxu0  ;;  %v2465_v61 = vsel %vm2433_vm10, %v2327_v14, 0.0  ;;  %v2745_v2 = vsel %vm1713_vm1, %v2742_v5, %v2744_v3  ;;  %v7563_v58 = vadd.f32 %v2833_v11, %v2495_v57  ;;  %v2498_v54 = vadd.f32 %v2466_v21, %v7301_v6 }
 0x271   : > { %v2751_v62 = vrot.slane %v5863_v47, 7  ;;  %v2330_v59 = vrot.slane %v2187_v45, 1  ;;  %v2748_v30 = vrot.slane %v2606_v32, 7  ;;  %v2497_v43 = vadd.f32 %v2465_v61, %v7299_v17 }
 0x272   : > { %v5828_v0 = vpop.f32.mrf.mxu1  ;;  %v7567_v46 = vpop.f32.mrf.mxu0  ;;  %v2835_v16 = vsel %vm8642_vm8, %v2745_v2, 0.0  ;;  %v2836_v36 = vsel %vm8640_vm7, %v2747_v34, 0.0  ;;  %v2464_v3 = vsel %vm8641_vm11, %v2325_v10, 0.0  ;;  %v2743_v40 = vsel %vm1713_vm1, %v2740_v29, %v2742_v5 }
 0x273   : > { %v2408_v6 = vsel %vm2314_vm9, 0.0, %v2330_v59  ;;  %v2826_v18 = vsel %vm1713_vm1, 0.0, %v2748_v30  ;;  %v2335_v57 = vrot.slane %v5828_v0, 1  ;;  %v2753_v17 = vrot.slane %v7567_v46, 7 }
 0x274   : > { %v2190_v42 = vpop.f32.mrf.mxu1  ;;  %v2609_v47 = vpop.f32.mrf.mxu0  ;;  %v7579_v21 = vadd.f32 %v2835_v16, %v2497_v43  ;;  %v7581_v14 = vadd.f32 %v2836_v36, %v2498_v54  ;;  %v2496_v34 = vadd.f32 %v2464_v3, %v7282_v31  ;;  %vm8696_vm7 = vcmp.ge.s32.totalorder %v7240_v12, 0 }
 0x275   : > { %v2834_v10 = vsel %vm8696_vm7, %v2743_v40, 0.0  ;;  %v2336_v29 = vsel %vm2314_vm9, %v2333_v49, %v2335_v57  ;;  %v2331_v5 = vrot.slane %v2190_v42, 1  ;;  %v2749_v11 = vrot.slane %v2609_v47, 7 }
 0x276   : > { %vm8697_vm11 = vcmp.lt.s32.totalorder %v7435_v35, 8  ;;  %v5831_v32 = vpop.f32.mrf.mxu1  ;;  %v5867_v61 = vpop.f32.mrf.mxu0  ;;  %6046 = vmatmul.mubr.msk.bf16.gmra.mxu1 %vm1479_vm0, %v6938_v60  ;;  %v7591_v2 = vadd.f32 %v2834_v10, %v2496_v34  ;;  %vm8698_vm8 = vcmp.ge.s32.totalorder %v7432_v38, 0  ;;  %v2470_v54 = vsel %vm2430_vm12, %v2336_v29, 0.0 }
 0x277   : > { %v2467_v45 = vsel %vm8697_vm11, %v2408_v6, 0.0  ;;  %v2837_v31 = vsel %vm8698_vm8, %v2826_v18, 0.0  ;;  %v2754_v43 = vsel %vm1713_vm1, %v2751_v62, %v2753_v17  ;;  %v7601_v0 = vsel %vm1808_vm5, %v7424_v53, 0.0  ;;  %6049 = vmatprep.mubr.msk.bf16.mxu1 %vm1479_vm0, %v6965_v33 }
 0x278   : > { %v2332_v46 = vsel %vm2314_vm9, %v2330_v59, %v2331_v5  ;;  %v2334_v16 = vsel %vm2314_vm9, %v2331_v5, %v2333_v49  ;;  %v2341_v60 = vrot.slane %v5831_v32, 1  ;;  %v2203_v36 = vpop.f32.mrf.mxu1  ;;  %v2622_v3 = vpop.f32.mrf.mxu0  ;;  %v2752_v6 = vsel %vm1713_vm1, %v2749_v11, %v2751_v62 }
 0x279   : > { %v2469_v40 = vsel %vm2429_vm13, %v2334_v16, 0.0  ;;  %v7610_v18 = vadd.f32 %v2837_v31, %v2467_v45  ;;  %v2502_v53 = vadd.f32 %v2470_v54, %v7329_v25  ;;  %v2759_v42 = vrot.slane %v5867_v61, 7 }
 0x27a   : > { %v2337_v47 = vrot.slane %v2203_v36, 1  ;;  %v2755_v59 = vrot.slane %v2622_v3, 7  ;;  %v2501_v49 = vadd.f32 %v2469_v40, %v7327_v48  ;;  %v5832_v34 = vpop.f32.mrf.mxu1  ;;  %v5868_v10 = vpop.f32.mrf.mxu0  ;;  %v2839_v33 = vsel %vm1808_vm5, %v2752_v6, 0.0 }
 0x27b   : > { %v2840_v29 = vsel %vm1809_vm4, %v2754_v43, 0.0  ;;  %v2468_v62 = vsel %vm2428_vm14, %v2332_v46, 0.0  ;;  %v2750_v5 = vsel %vm1713_vm1, %v2748_v30, %v2749_v11  ;;  %v2343_v45 = vrot.slane %v5832_v34, 1 }
 0x27c   : > { %v2338_v25 = vsel %vm2314_vm9, %v2335_v57, %v2337_v47  ;;  %v2761_v32 = vrot.slane %v5868_v10, 7  ;;  %v7622_v61 = vadd.f32 %v2839_v33, %v2501_v49  ;;  %v2206_v48 = vpop.f32.mrf.mxu1  ;;  %v2625_v31 = vpop.f32.mrf.mxu0  ;;  %v7624_v54 = vadd.f32 %v2840_v29, %v2502_v53 }
 0x27d   : > { %v2500_v16 = vadd.f32 %v2468_v62, %v7306_v56  ;;  %v2838_v43 = vsel %vm1807_vm2, %v2750_v5, 0.0  ;;  %v2471_v46 = vsel %vm2431_vm15, %v2338_v25, 0.0  ;;  %v2344_v30 = vsel %vm2314_vm9, %v2341_v60, %v2343_v45 }
 0x27e   : > { %v2339_v11 = vrot.slane %v2206_v48, 1  ;;  %v2757_v57 = vrot.slane %v2625_v31, 7  ;;  %v2503_v36 = vadd.f32 %v2471_v46, %v7315_v15  ;;  %v5835_v3 = vpop.f32.mrf.mxu1  ;;  %v5871_v40 = vpop.f32.mrf.mxu0  ;;  %6050 = vmatmul.mubr.msk.bf16.gmra.mxu1 %vm1479_vm0, %v6958_v19  ;;  %v2756_v56 = vsel %vm1713_vm1, %v2753_v17, %v2755_v59 }
 0x27f   : > { %v7635_v6 = vadd.f32 %v2838_v43, %v2500_v16  ;;  %v2474_v53 = vsel %vm2434_vm6, %v2344_v30, 0.0  ;;  %v2762_v49 = vsel %vm1713_vm1, %v2759_v42, %v2761_v32  ;;  %v2348_v33 = vrot.slane %v5835_v3, 1  ;;  %6053 = vmatprep.mubr.msk.bf16.mxu1 %vm1479_vm0, %v6988_v28 }
 0x280   : > { %v2340_v34 = vsel %vm2314_vm9, %v2337_v47, %v2339_v11  ;;  %v2342_v10 = vsel %vm2314_vm9, %v2339_v11, %v2341_v60  ;;  %v2766_v15 = vrot.slane %v5871_v40, 7  ;;  %v2219_v29 = vpop.f32.mrf.mxu1  ;;  %v2638_v19 = vpop.f32.mrf.mxu0  ;;  %v2760_v17 = vsel %vm1713_vm1, %v2757_v57, %v2759_v42 }
 0x281   : > { %v2473_v62 = vsel %vm2433_vm10, %v2342_v10, 0.0  ;;  %v2841_v5 = vsel %vm1810_vm3, %v2756_v56, 0.0  ;;  %v2506_v25 = vadd.f32 %v2474_v53, %v7352_v26  ;;  %v2345_v47 = vrot.slane %v2219_v29, 1  ;;  %v8702_v56 = vld [vmem:[#allocation17_spill] sm:$0xff]  ;;  %v6225_v29 = vld [vmem:[%s8612_s3 + $0x8] sm:$0xff]  }
 0x282   : > { %v2763_v45 = vrot.slane %v2638_v19, 7  ;;  %v2505_v60 = vadd.f32 %v2473_v62, %v7350_v24  ;;  %vm8699_vm7 = vcmp.ge.s32.totalorder %v7274_v23, 0  ;;  %v5836_v28 = vpop.f32.mrf.mxu1  ;;  %v7654_v48 = vpop.f32.mrf.mxu0  ;;  %v7656_v31 = vadd.f32 %v2841_v5, %v2503_v36  ;;  %6065 = vmatprep.subr.bf16.mxu0 %v6225_v29 }
 0x283   : > { %v2843_v32 = vsel %vm8699_vm7, %v2760_v17, 0.0  ;;  %vm8700_vm8 = vcmp.ge.s32.totalorder %v7268_v51, 0  ;;  %vm8701_vm11 = vcmp.lt.s32.totalorder %v7490_v7, 8  ;;  %v2758_v26 = vsel %vm1713_vm1, %v2755_v59, %v2757_v57  ;;  %v8705_v17 = vld [vmem:[#allocation13_spill] sm:$0xff]  ;;  %6066 = vmatpush3.bf16.msra.mxu0 %v6225_v29 }
 0x284   : > { %v2844_v42 = vsel %vm8700_vm8, %v2762_v49, 0.0  ;;  %v2472_v16 = vsel %vm8701_vm11, %v2340_v34, 0.0  ;;  %v2409_v43 = vsel %vm2314_vm9, 0.0, %v2345_v47  ;;  %v2827_v24 = vsel %vm1713_vm1, 0.0, %v2763_v45  ;;  %v2222_v11 = vpop.f32.mrf.mxu1  ;;  %v2641_v3 = vpop.f32.mrf.mxu0 }
 0x285   : > { %v2350_v46 = vrot.slane %v5836_v28, 1  ;;  %v2768_v30 = vrot.slane %v7654_v48, 7  ;;  %v7666_v40 = vadd.f32 %v2843_v32, %v2505_v60  ;;  %v7668_v36 = vadd.f32 %v2844_v42, %v2506_v25 }
 0x286   : > { %v2504_v53 = vadd.f32 %v2472_v16, %v8702_v56  ;;  %vm8703_vm7 = vcmp.ge.s32.totalorder %v7240_v12, 0  ;;  %v2346_v57 = vrot.slane %v2222_v11, 1  ;;  %v2764_v34 = vrot.slane %v2641_v3, 7  ;;  %v5839_v19 = vpop.f32.mrf.mxu1  ;;  %v5875_v62 = vpop.f32.mrf.mxu0  ;;  %6054 = vmatmul.mubr.msk.bf16.gmra.mxu1 %vm1479_vm0, %v8705_v17 }
 0x287   : > { %v2842_v49 = vsel %vm8703_vm7, %v2758_v26, 0.0  ;;  %v2351_v59 = vsel %vm2314_vm9, %v2348_v33, %v2350_v46  ;;  %vm8704_vm8 = vcmp.lt.s32.totalorder %v7435_v35, 8  ;;  %vm8706_vm11 = vcmp.ge.s32.totalorder %v7432_v38, 0  ;;  %v8707_v26 = vld [vmem:[#allocation14_spill] sm:$0xff] }
 0x288   : > { %v2475_v10 = vsel %vm8704_vm8, %v2409_v43, 0.0  ;;  %v7681_v5 = vadd.f32 %v2842_v49, %v2504_v53  ;;  %v2845_v25 = vsel %vm8706_vm11, %v2827_v24, 0.0  ;;  %v2478_v60 = vsel %vm2430_vm12, %v2351_v59, 0.0  ;;  %6057 = vmatprep.mubr.msk.bf16.mxu1 %vm1479_vm0, %v8707_v26  ;;  %v2235_v43 = vpop.f32.mrf.mxu1  ;;  %v2654_v24 = vpop.f32.mrf.mxu0  ;;  %v8708_v53 = vld [vmem:[#allocation35_spill] sm:$0xff] }
 0x289   : > { %v2769_v32 = vsel %vm1713_vm1, %v2766_v15, %v2768_v30  ;;  %v7690_v28 = vadd.f32 %v7408_v22, %v7601_v0  ;;  %v2347_v48 = vsel %vm2314_vm9, %v2345_v47, %v2346_v57  ;;  %v2349_v42 = vsel %vm2314_vm9, %v2346_v57, %v2348_v33 }
 0x28a   : > { %v2356_v16 = vrot.slane %v5839_v19, 1  ;;  %v2477_v11 = vsel %vm2429_vm13, %v2349_v42, 0.0  ;;  %v2767_v3 = vsel %vm1713_vm1, %v2764_v34, %v2766_v15  ;;  %v7699_v56 = vadd.f32 %v2845_v25, %v2475_v10  ;;  %v5840_v59 = vpop.f32.mrf.mxu1  ;;  %v5876_v57 = vpop.f32.mrf.mxu0 }
 0x28b   : > { %v2510_v22 = vadd.f32 %v2478_v60, %v7380_v52  ;;  %v2774_v0 = vrot.slane %v5875_v62, 7  ;;  %v2352_v47 = vrot.slane %v2235_v43, 1  ;;  %v2770_v33 = vrot.slane %v2654_v24, 7  ;;  %v8709_v43 = vld [vmem:[#allocation18_spill] sm:$0xff] }
 0x28c   : > { %v2509_v49 = vadd.f32 %v2477_v11, %v8708_v53  ;;  %v2847_v19 = vsel %vm1808_vm5, %v2767_v3, 0.0  ;;  %v2848_v17 = vsel %vm1809_vm4, %v2769_v32, 0.0  ;;  %v2476_v15 = vsel %vm2428_vm14, %v2347_v48, 0.0  ;;  %v2238_v60 = vpop.f32.mrf.mxu1  ;;  %v2657_v42 = vpop.f32.mrf.mxu0  ;;  %v8710_v11 = vld [vmem:[#allocation19_spill] sm:$0xff] }
 0x28d   : > { %v2765_v10 = vsel %vm1713_vm1, %v2763_v45, %v2764_v34  ;;  %v2353_v52 = vsel %vm2314_vm9, %v2350_v46, %v2352_v47  ;;  %v2358_v29 = vrot.slane %v5840_v59, 1  ;;  %v2776_v62 = vrot.slane %v5876_v57, 7  ;;  %v8711_v59 = vld [vmem:[#allocation11_spill] sm:$0xff] }
 0x28e   : > { %v7711_v25 = vadd.f32 %v2847_v19, %v2509_v49  ;;  %v7713_v26 = vadd.f32 %v2848_v17, %v2510_v22  ;;  %v2508_v24 = vadd.f32 %v2476_v15, %v8709_v43  ;;  %v2846_v32 = vsel %vm1807_vm2, %v2765_v10, 0.0  ;;  %v5843_v53 = vpop.f32.mrf.mxu1  ;;  %v5879_v49 = vpop.f32.mrf.mxu0  ;;  %6058 = vmatmul.mubr.msk.bf16.gmra.mxu1 %vm1479_vm0, %v8711_v59 }
 0x28f   : > { %v2479_v48 = vsel %vm2431_vm15, %v2353_v52, 0.0  ;;  %v2359_v45 = vsel %vm2314_vm9, %v2356_v16, %v2358_v29  ;;  %v2354_v34 = vrot.slane %v2238_v60, 1  ;;  %v2772_v46 = vrot.slane %v2657_v42, 7  ;;  %v8713_v60 = vld [vmem:[#allocation15_spill] sm:$0xff] }
 0x290   : > { %v2511_v3 = vadd.f32 %v2479_v48, %v8710_v11  ;;  %v7724_v22 = vadd.f32 %v2846_v32, %v2508_v24  ;;  %v2771_v57 = vsel %vm1713_vm1, %v2768_v30, %v2770_v33  ;;  %v2482_v19 = vsel %vm2434_vm6, %v2359_v45, 0.0  ;;  %6061 = vmatprep.mubr.msk.bf16.mxu1 %vm1479_vm0, %v8713_v60  ;;  %v2251_v42 = vpop.f32.mrf.mxu1  ;;  %v2670_v43 = vpop.f32.mrf.mxu0 }
 0x291   : > { %v2777_v17 = vsel %vm1713_vm1, %v2774_v0, %v2776_v62  ;;  %v2355_v15 = vsel %vm2314_vm9, %v2352_v47, %v2354_v34  ;;  %v2357_v10 = vsel %vm2314_vm9, %v2354_v34, %v2356_v16  ;;  %v2363_v52 = vrot.slane %v5843_v53, 1  ;;  %v8714_v62 = vld [vmem:[#allocation21_spill] sm:$0xff] }
 0x292   : > { %8712 = vst [vmem:[#allocation17_spill] sm:$0xff] %v7724_v22  ;;  %v2781_v29 = vrot.slane %v5879_v49, 7  ;;  %v2481_v24 = vsel %vm2433_vm10, %v2357_v10, 0.0  ;;  %v2775_v30 = vsel %vm1713_vm1, %v2772_v46, %v2774_v0  ;;  %v2849_v32 = vsel %vm1810_vm3, %v2771_v57, 0.0  ;;  %v5844_v11 = vpop.f32.mrf.mxu1  ;;  %v7743_v53 = vpop.f32.mrf.mxu0 }
 0x293   : > { %v2514_v48 = vadd.f32 %v2482_v19, %v8714_v62  ;;  %v2360_v47 = vrot.slane %v2251_v42, 1  ;;  %v2778_v45 = vrot.slane %v2670_v43, 7  ;;  %v2513_v16 = vadd.f32 %v2481_v24, %v7545_v20 }
 0x294   : > { %vm8715_vm7 = vcmp.ge.s32.totalorder %v7274_v23, 0  ;;  %v7745_v49 = vadd.f32 %v2849_v32, %v2511_v3  ;;  %vm8717_vm8 = vcmp.ge.s32.totalorder %v7268_v51, 0  ;;  %vm8718_vm11 = vcmp.lt.s32.totalorder %v7490_v7, 8  ;;  %v2254_v42 = vpop.f32.mrf.mxu1  ;;  %v2673_v43 = vpop.f32.mrf.mxu0 }
 0x295   : > { %v2851_v34 = vsel %vm8715_vm7, %v2775_v30, 0.0  ;;  %v2852_v0 = vsel %vm8717_vm8, %v2777_v17, 0.0  ;;  %v2480_v59 = vsel %vm8718_vm11, %v2355_v15, 0.0  ;;  %v2773_v57 = vsel %vm1713_vm1, %v2770_v33, %v2772_v46  ;;  %v8721_v30 = vld [vmem:[#allocation20_spill] sm:$0xff] }
 0x296   : > { %8716 = vst [vmem:[#allocation13_spill] sm:$0xff] %v7745_v49  ;;  %v2410_v19 = vsel %vm2314_vm9, 0.0, %v2360_v47  ;;  %v2828_v20 = vsel %vm1713_vm1, 0.0, %v2778_v45  ;;  %v2365_v10 = vrot.slane %v5844_v11, 1  ;;  %v2783_v60 = vrot.slane %v7743_v53, 7  ;;  %v5847_v11 = vpop.f32.mrf.mxu1  ;;  %v5883_v53 = vpop.f32.mrf.mxu0  ;;  %v8724_v49 = vld [vmem:[#allocation12_spill] sm:$0xff] }
 0x297   : > { %v7755_v24 = vadd.f32 %v2851_v34, %v2513_v16  ;;  %v7757_v3 = vadd.f32 %v2852_v0, %v2514_v48  ;;  %v2512_v17 = vadd.f32 %v2480_v59, %v8721_v30  ;;  %vm8722_vm7 = vcmp.ge.s32.totalorder %v7240_v12, 0  ;;  %6062 = vmatmul.mubr.msk.bf16.gmra.mxu1 %vm1479_vm0, %v8724_v49  ;;  %v8727_v59 = vld [vmem:[#allocation30_spill] sm:$0xff] }
 0x298   : > { %v2850_v15 = vsel %vm8722_vm7, %v2773_v57, 0.0  ;;  %v2366_v33 = vsel %vm2314_vm9, %v2363_v52, %v2365_v10  ;;  %v2361_v46 = vrot.slane %v2254_v42, 1  ;;  %v2779_v32 = vrot.slane %v2673_v43, 7  ;;  %v2267_v49 = vpop.f32.mrf.mxu1  ;;  %v2686_v30 = vpop.f32.mrf.mxu0 }
 0x299   : > { %8719 = vst [vmem:[#allocation14_spill] sm:$0xff] %v7755_v24  ;;  %8720 = vst [vmem:[#allocation35_spill] sm:$0xff] %v7757_v3  ;;  %vm8723_vm8 = vcmp.lt.s32.totalorder %v7435_v35, 8  ;;  %v7767_v16 = vadd.f32 %v2850_v15, %v2512_v17  ;;  %vm8726_vm11 = vcmp.ge.s32.totalorder %v7432_v38, 0  ;;  %v2486_v34 = vsel %vm2430_vm12, %v2366_v33, 0.0  ;;  %v8729_v33 = vld [vmem:[#allocation24_spill] sm:$0xff] }
 0x29a   : > { %v2483_v62 = vsel %vm8723_vm8, %v2410_v19, 0.0  ;;  %v2853_v48 = vsel %vm8726_vm11, %v2828_v20, 0.0  ;;  %v2784_v0 = vsel %vm1713_vm1, %v2781_v29, %v2783_v60  ;;  %vm8728_vm7 = vcmp.ge.s32.totalorder %v7274_v23, 0  ;;  %v5884_v22 = vpop.f32.mrf.mxu0 }
 0x29b   : > { %8725 = vst [vmem:[#allocation18_spill] sm:$0xff] %v7767_v16  ;;  %v1872_v57 = vsel %vm8728_vm7, %v8727_v59, 0.0  ;;  %v2362_v19 = vsel %vm2314_vm9, %v2360_v47, %v2361_v46  ;;  %v2364_v42 = vsel %vm2314_vm9, %v2361_v46, %v2363_v52  ;;  %v2371_v43 = vrot.slane %v5847_v11, 1  ;;  %v5848_v47 = vpop.f32.mrf.mxu1  ;;  %vm8735_vm8 = vmmov %vm8728_vm7 }
 0x29c   : > { %v2485_v17 = vsel %vm2429_vm13, %v2364_v42, 0.0  ;;  %v2782_v20 = vsel %vm1713_vm1, %v2779_v32, %v2781_v29  ;;  %v7782_v15 = vadd.f32 %v2853_v48, %v2483_v62  ;;  %v2518_v38 = vadd.f32 %v2486_v34, %v8729_v33  ;;  %v2689_v42 = vpop.f32.mrf.mxu0 }
 0x29d   : > { %v2789_v16 = vrot.slane %v5883_v53, 7  ;;  %v2367_v3 = vrot.slane %v2267_v49, 1  ;;  %v2785_v24 = vrot.slane %v2686_v30, 7  ;;  %v2517_v59 = vadd.f32 %v2485_v17, %v7690_v28  ;;  %v2270_v28 = vpop.f32.mrf.mxu1  ;;  %v8730_v30 = vld [vmem:[#allocation22_spill] sm:$0xff] }
 0x29e   : > { %v2855_v52 = vsel %vm1808_vm5, %v2782_v20, 0.0  ;;  %v2856_v46 = vsel %vm1809_vm4, %v2784_v0, 0.0  ;;  %v2484_v29 = vsel %vm2428_vm14, %v2362_v19, 0.0  ;;  %v2780_v62 = vsel %vm1713_vm1, %v2778_v45, %v2779_v32  ;;  %v8731_v20 = vld [vmem:[#allocation23_spill] sm:$0xff] }
 0x29f   : > { %v2368_v11 = vsel %vm2314_vm9, %v2365_v10, %v2367_v3  ;;  %v2373_v53 = vrot.slane %v5848_v47, 1  ;;  %v2791_v48 = vrot.slane %v5884_v22, 7  ;;  %v7794_v34 = vadd.f32 %v2855_v52, %v2517_v59  ;;  %v5891_v33 = vpop.f32.mrf.mxu1  ;;  %v5927_v59 = vpop.f32.mrf.mxu0 }
 0x2a0   : > { %v7796_v49 = vadd.f32 %v2856_v46, %v2518_v38  ;;  %v2516_v17 = vadd.f32 %v2484_v29, %v8730_v30  ;;  %v2854_v0 = vsel %vm1807_vm2, %v2780_v62, 0.0  ;;  %v2487_v19 = vsel %vm2431_vm15, %v2368_v11, 0.0  ;;  %v8732_v29 = vld [vmem:[#allocation27_spill] sm:$0xff] }
 0x2a1   : > { %v2374_v45 = vsel %vm2314_vm9, %v2371_v43, %v2373_v53  ;;  %v2369_v32 = vrot.slane %v2270_v28, 1  ;;  %v2787_v10 = vrot.slane %v2689_v42, 7  ;;  %v2519_v22 = vadd.f32 %v2487_v19, %v8731_v20  ;;  %v2944_v30 = vpop.f32.mrf.mxu1  ;;  %v3154_v19 = vpop.f32.mrf.mxu0  ;;  %v8734_v20 = vld [vmem:[#allocation34_spill] sm:$0xff] }
 0x2a2   : > { %v7805_v47 = vadd.f32 %v2854_v0, %v2516_v17  ;;  %v2786_v38 = vsel %vm1713_vm1, %v2783_v60, %v2785_v24  ;;  %v2490_v52 = vsel %vm2434_vm6, %v2374_v45, 0.0  ;;  %v2792_v46 = vsel %vm1713_vm1, %v2789_v16, %v2791_v48  ;;  %v8733_v0 = vld [vmem:[#allocation31_spill] sm:$0xff] }
 0x2a3   : > { %v2102_v62 = vadd.f32 %v8732_v29, %v1872_v57  ;;  %v2370_v11 = vsel %vm2314_vm9, %v2367_v3, %v2369_v32  ;;  %v2372_v53 = vsel %vm2314_vm9, %v2369_v32, %v2371_v43  ;;  %v3073_v28 = vadd.f32 %v5891_v33, %v7534_v37  ;;  %v5892_v37 = vpop.f32.mrf.mxu1  ;;  %v5928_v43 = vpop.f32.mrf.mxu0 }
 0x2a4   : > { %v3316_v42 = vrot.slane %v5927_v59, 1  ;;  %v2489_v17 = vsel %vm2433_vm10, %v2372_v53, 0.0  ;;  %v2790_v60 = vsel %vm1713_vm1, %v2787_v10, %v2789_v16  ;;  %v2522_v45 = vadd.f32 %v2490_v52, %v8733_v0 }
 0x2a5   : > { %v3071_v48 = vadd.f32 %v2944_v30, %v8734_v20  ;;  %v2521_v50 = vadd.f32 %v2489_v17, %v2102_v62  ;;  %v2859_v3 = vsel %vm8735_vm8, %v2790_v60, 0.0  ;;  %v2857_v57 = vsel %vm1810_vm3, %v2786_v38, 0.0  ;;  %v2947_v30 = vpop.f32.mrf.mxu1  ;;  %v3157_v17 = vpop.f32.mrf.mxu0 }
 0x2a6   : > { %v7824_v32 = vadd.f32 %v2857_v57, %v2519_v22  ;;  %vm8736_vm11 = vcmp.ge.s32.totalorder %v7268_v51, 0  ;;  %vm8737_vm7 = vcmp.lt.s32.totalorder %v7490_v7, 8  ;;  %v2788_v59 = vsel %vm1713_vm1, %v2785_v24, %v2787_v10  ;;  %v8738_v22 = vld [vmem:[#allocation28_spill] sm:$0xff] }
 0x2a7   : > { %v2860_v33 = vsel %vm8736_vm11, %v2792_v46, 0.0  ;;  %v2488_v16 = vsel %vm8737_vm7, %v2370_v11, 0.0  ;;  %v3074_v52 = vadd.f32 %v5892_v37, %v7528_v63  ;;  %v3318_v29 = vrot.slane %v5928_v43, 1  ;;  %v5895_v63 = vpop.f32.mrf.mxu1  ;;  %v5931_v10 = vpop.f32.mrf.mxu0 }
 0x2a8   : > { %v7832_v62 = vadd.f32 %v2859_v3, %v2521_v50  ;;  %v7834_v53 = vadd.f32 %v2860_v33, %v2522_v45  ;;  %v3313_v38 = vrot.slane %v3154_v19, 1  ;;  %v2520_v60 = vadd.f32 %v2488_v16, %v8738_v22  ;;  %v6226_v50 = vld [vmem:[%s8612_s3] sm:$0xff]  }
 0x2a9   : > { %v3319_v0 = vsel %vm2314_vm9, %v3316_v42, %v3318_v29  ;;  %v3072_v46 = vadd.f32 %v2947_v30, %v7549_v13  ;;  %v3314_v20 = vrot.slane %v3157_v17, 1  ;;  %vm8739_vm8 = vcmp.ge.s32.totalorder %v7240_v12, 0  ;;  %6067 = vmatprep.subr.bf16.mxu0 %v6226_v50  ;;  %v2960_v37 = vpop.f32.mrf.mxu1  ;;  %v3170_v43 = vpop.f32.mrf.mxu0 }
 0x2aa   : > { %v2858_v24 = vsel %vm8739_vm8, %v2788_v59, 0.0  ;;  %v3411_v19 = vsel %vm2429_vm13, %v3319_v0, 0.0  ;;  %v3077_v13 = vadd.f32 %v5895_v63, %v7579_v21  ;;  %vm8740_vm11 = vcmp.lt.s32.totalorder %v7435_v35, 8  ;;  %6068 = vmatpush3.bf16.msra.mxu0 %v6226_v50 }
 0x2ab   : > { %v7844_v11 = vadd.f32 %v2858_v24, %v2520_v60  ;;  %v3315_v45 = vsel %vm2314_vm9, %v3313_v38, %v3314_v20  ;;  %v3317_v3 = vsel %vm2314_vm9, %v3314_v20, %v3316_v42  ;;  %v7853_v33 = vadd.f32 %v3411_v19, %v3073_v28  ;;  %v5896_v21 = vpop.f32.mrf.mxu1  ;;  %v5932_v17 = vpop.f32.mrf.mxu0  ;;  %vm8741_vm8 = vmmov %vm8740_vm11 }
 0x2ac   : > { %v3410_v57 = vsel %vm2428_vm14, %v3317_v3, 0.0  ;;  %v3409_v16 = vsel %vm8740_vm11, %v3315_v45, 0.0  ;;  %v3075_v38 = vadd.f32 %v2960_v37, %v7563_v58  ;;  %v3320_v30 = vrot.slane %v3170_v43, 1  ;;  %vm8742_vm11 = vmmov %vm8737_vm7 }
 0x2ad   : > { %v7857_v59 = vadd.f32 %v3410_v57, %v3072_v46  ;;  %v7860_v42 = vadd.f32 %v3409_v16, %v3071_v48  ;;  %v3324_v22 = vrot.slane %v5931_v10, 1  ;;  %v3078_v0 = vadd.f32 %v5896_v21, %v7581_v14  ;;  %v2963_v20 = vpop.f32.mrf.mxu1  ;;  %v3173_v24 = vpop.f32.mrf.mxu0 }
 0x2ae   : > { %v3321_v60 = vsel %vm2314_vm9, %v3318_v29, %v3320_v30  ;;  %v3326_v28 = vrot.slane %v5932_v17, 1  ;;  %v3076_v48 = vadd.f32 %v2963_v20, %v7591_v2  ;;  %v3322_v63 = vrot.slane %v3173_v24, 1 }
 0x2af   : > { %v3412_v50 = vsel %vm2430_vm12, %v3321_v60, 0.0  ;;  %v5899_v19 = vpop.f32.mrf.mxu1  ;;  %v5935_v29 = vpop.f32.mrf.mxu0 }
 0x2b0   : > { %v3327_v46 = vsel %vm2314_vm9, %v3324_v22, %v3326_v28  ;;  %v3405_v58 = vsel %vm2314_vm9, %v3326_v28, 0.0  ;;  %v7871_v45 = vadd.f32 %v3412_v50, %v3074_v52  ;;  %v3323_v57 = vsel %vm2314_vm9, %v3320_v30, %v3322_v63 }
 0x2b1   : > { %v3416_v10 = vsel %vm2434_vm6, %v3405_v58, 0.0  ;;  %v3415_v14 = vsel %vm2433_vm10, %v3327_v46, 0.0  ;;  %v3325_v37 = vsel %vm2314_vm9, %v3322_v63, %v3324_v22  ;;  %v3081_v43 = vadd.f32 %v5899_v19, %v7622_v61  ;;  %v2976_v16 = vpop.f32.mrf.mxu1  ;;  %v3186_v21 = vpop.f32.mrf.mxu0 }
 0x2b2   : > { %v7875_v3 = vadd.f32 %v3416_v10, %v3078_v0  ;;  %v3414_v2 = vsel %vm8737_vm7, %v3325_v37, 0.0  ;;  %v7882_v17 = vadd.f32 %v3415_v14, %v3077_v13  ;;  %v3413_v52 = vsel %vm2431_vm15, %v3323_v57, 0.0  ;;  %vm8745_vm7 = vmmov %vm8741_vm8 }
 0x2b3   : > { %v7886_v60 = vadd.f32 %v3414_v2, %v3076_v48  ;;  %v3079_v0 = vadd.f32 %v2976_v16, %v7610_v18  ;;  %v7889_v28 = vadd.f32 %v3413_v52, %v3075_v38  ;;  %v5900_v30 = vpop.f32.mrf.mxu1  ;;  %v5936_v22 = vpop.f32.mrf.mxu0  ;;  %v3331_v20 = vrot.slane %v5935_v29, 1 }
 0x2b4   : > { %v3082_v61 = vadd.f32 %v5900_v30, %v7624_v54  ;;  %v3333_v24 = vrot.slane %v5936_v22, 1  ;;  %v3328_v58 = vrot.slane %v3186_v21, 1 }
 0x2b5   : > { %v2979_v50 = vpop.f32.mrf.mxu1  ;;  %v3189_v46 = vpop.f32.mrf.mxu0 }
 0x2b6   : > { %v3334_v13 = vsel %vm2314_vm9, %v3331_v20, %v3333_v24  ;;  %v3080_v63 = vadd.f32 %v2979_v50, %v7635_v6  ;;  %v3329_v10 = vrot.slane %v3189_v46, 1 }
 0x2b7   : > { %v5903_v48 = vpop.f32.mrf.mxu1  ;;  %v5939_v19 = vpop.f32.mrf.mxu0  ;;  %v3419_v18 = vsel %vm2429_vm13, %v3334_v13, 0.0 }
 0x2b8   : > { %v3330_v38 = vsel %vm2314_vm9, %v3328_v58, %v3329_v10  ;;  %v3332_v29 = vsel %vm2314_vm9, %v3329_v10, %v3331_v20  ;;  %v3085_v54 = vadd.f32 %v5903_v48, %v7666_v40  ;;  %v7901_v2 = vadd.f32 %v3419_v18, %v3081_v43 }
 0x2b9   : > { %v3418_v14 = vsel %vm2428_vm14, %v3332_v29, 0.0  ;;  %v2992_v57 = vpop.f32.mrf.mxu1  ;;  %v3202_v37 = vpop.f32.mrf.mxu0  ;;  %v3417_v6 = vsel %vm8741_vm8, %v3330_v38, 0.0  ;;  %v3339_v40 = vrot.slane %v5939_v19, 1  ;;  %vm8750_vm8 = vmmov %vm8742_vm11 }
 0x2ba   : > { %v7905_v16 = vadd.f32 %v3418_v14, %v3080_v63  ;;  %v3083_v21 = vadd.f32 %v2992_v57, %v7656_v31  ;;  %v3335_v52 = vrot.slane %v3202_v37, 1  ;;  %v7908_v30 = vadd.f32 %v3417_v6, %v3079_v0 }
 0x2bb   : > { %v5904_v22 = vpop.f32.mrf.mxu1  ;;  %v5940_v20 = vpop.f32.mrf.mxu0 }
 0x2bc   : > { %v3336_v50 = vsel %vm2314_vm9, %v3333_v24, %v3335_v52  ;;  %v3086_v46 = vadd.f32 %v5904_v22, %v7668_v36  ;;  %v3341_v58 = vrot.slane %v5940_v20, 1 }
 0x2bd   : > { %v2995_v43 = vpop.f32.mrf.mxu1  ;;  %v3205_v13 = vpop.f32.mrf.mxu0  ;;  %v3420_v10 = vsel %vm2430_vm12, %v3336_v50, 0.0 }
 0x2be   : > { %v3342_v63 = vsel %vm2314_vm9, %v3339_v40, %v3341_v58  ;;  %v3406_v31 = vsel %vm2314_vm9, %v3341_v58, 0.0  ;;  %v3084_v0 = vadd.f32 %v2995_v43, %v7681_v5  ;;  %v3337_v48 = vrot.slane %v3205_v13, 1 }
 0x2bf   : > { %v3424_v19 = vsel %vm2434_vm6, %v3406_v31, 0.0  ;;  %v5907_v18 = vpop.f32.mrf.mxu1  ;;  %v5943_v24 = vpop.f32.mrf.mxu0  ;;  %v7919_v38 = vadd.f32 %v3420_v10, %v3082_v61  ;;  %v3423_v36 = vsel %vm2433_vm10, %v3342_v63, 0.0 }
 0x2c0   : > { %v7923_v29 = vadd.f32 %v3424_v19, %v3086_v46  ;;  %v3338_v14 = vsel %vm2314_vm9, %v3335_v52, %v3337_v48  ;;  %v3340_v57 = vsel %vm2314_vm9, %v3337_v48, %v3339_v40  ;;  %v3089_v37 = vadd.f32 %v5907_v18, %v7711_v25  ;;  %v8743_v48 = vld [vmem:[#allocation17_spill] sm:$0xff] }
 0x2c1   : > { %v3422_v5 = vsel %vm8742_vm11, %v3340_v57, 0.0  ;;  %v3008_v6 = vpop.f32.mrf.mxu1  ;;  %v3218_v22 = vpop.f32.mrf.mxu0  ;;  %v7930_v20 = vadd.f32 %v3423_v36, %v3085_v54  ;;  %v3421_v61 = vsel %vm2431_vm15, %v3338_v14, 0.0  ;;  %v3346_v43 = vrot.slane %v5943_v24, 1  ;;  %v8744_v14 = vld [vmem:[#allocation14_spill] sm:$0xff]  ;;  %vm8751_vm11 = vmmov %vm8745_vm7 }
 0x2c2   : > { %v7934_v50 = vadd.f32 %v3422_v5, %v3084_v0  ;;  %v3087_v46 = vadd.f32 %v3008_v6, %v7699_v56  ;;  %v7937_v58 = vadd.f32 %v3421_v61, %v3083_v21  ;;  %v3343_v31 = vrot.slane %v3218_v22, 1 }
 0x2c3   : > { %v5908_v52 = vpop.f32.mrf.mxu1  ;;  %v5944_v40 = vpop.f32.mrf.mxu0 }
 0x2c4   : > { %v3090_v25 = vadd.f32 %v5908_v52, %v7713_v26  ;;  %v3348_v13 = vrot.slane %v5944_v40, 1  ;;  %v8746_v40 = vld [vmem:[#allocation13_spill] sm:$0xff] }
 0x2c5   : > { %v3011_v10 = vpop.f32.mrf.mxu1  ;;  %v3221_v63 = vpop.f32.mrf.mxu0 }
 0x2c6   : > { %v3349_v54 = vsel %vm2314_vm9, %v3346_v43, %v3348_v13  ;;  %v3088_v19 = vadd.f32 %v3011_v10, %v8743_v48  ;;  %v3344_v18 = vrot.slane %v3221_v63, 1 }
 0x2c7   : > { %v5911_v0 = vpop.f32.mrf.mxu1  ;;  %v5947_v36 = vpop.f32.mrf.mxu0  ;;  %v3427_v56 = vsel %vm2429_vm13, %v3349_v54, 0.0 }
 0x2c8   : > { %v3345_v21 = vsel %vm2314_vm9, %v3343_v31, %v3344_v18  ;;  %v3347_v24 = vsel %vm2314_vm9, %v3344_v18, %v3346_v43  ;;  %v3093_v26 = vadd.f32 %v5911_v0, %v8744_v14  ;;  %v7949_v22 = vadd.f32 %v3427_v56, %v3089_v37  ;;  %v8747_v0 = vld [vmem:[#allocation35_spill] sm:$0xff] }
 0x2c9   : > { %v3426_v57 = vsel %vm2428_vm14, %v3347_v24, 0.0  ;;  %v3024_v5 = vpop.f32.mrf.mxu1  ;;  %v3234_v6 = vpop.f32.mrf.mxu0  ;;  %v3425_v61 = vsel %vm8745_vm7, %v3345_v21, 0.0  ;;  %v3354_v48 = vrot.slane %v5947_v36, 1  ;;  %vm8752_vm7 = vmmov %vm8750_vm8 }
 0x2ca   : > { %v7953_v52 = vadd.f32 %v3426_v57, %v3088_v19  ;;  %v3091_v10 = vadd.f32 %v3024_v5, %v8746_v40  ;;  %v3350_v63 = vrot.slane %v3234_v6, 1  ;;  %v7956_v31 = vadd.f32 %v3425_v61, %v3087_v46  ;;  %v8748_v5 = vld [vmem:[#allocation18_spill] sm:$0xff] }
 0x2cb   : > { %v5912_v43 = vpop.f32.mrf.mxu1  ;;  %v5948_v54 = vpop.f32.mrf.mxu0 }
 0x2cc   : > { %v3351_v18 = vsel %vm2314_vm9, %v3348_v13, %v3350_v63  ;;  %v3094_v24 = vadd.f32 %v5912_v43, %v8747_v0  ;;  %v3356_v14 = vrot.slane %v5948_v54, 1 }
 0x2cd   : > { %v3027_v37 = vpop.f32.mrf.mxu1  ;;  %v3237_v56 = vpop.f32.mrf.mxu0  ;;  %v3428_v21 = vsel %vm2430_vm12, %v3351_v18, 0.0 }
 0x2ce   : > { %v3357_v19 = vsel %vm2314_vm9, %v3354_v48, %v3356_v14  ;;  %v3407_v57 = vsel %vm2314_vm9, %v3356_v14, 0.0  ;;  %v3092_v46 = vadd.f32 %v3027_v37, %v8748_v5  ;;  %v3352_v6 = vrot.slane %v3237_v56, 1 }
 0x2cf   : > { %v3432_v36 = vsel %vm2434_vm6, %v3407_v57, 0.0  ;;  %v5915_v61 = vpop.f32.mrf.mxu1  ;;  %v5951_v13 = vpop.f32.mrf.mxu0  ;;  %v7967_v40 = vadd.f32 %v3428_v21, %v3090_v25  ;;  %v3431_v43 = vsel %vm2433_vm10, %v3357_v19, 0.0 }
 0x2d0   : > { %v7971_v54 = vadd.f32 %v3432_v36, %v3094_v24  ;;  %v3353_v18 = vsel %vm2314_vm9, %v3350_v63, %v3352_v6  ;;  %v3355_v0 = vsel %vm2314_vm9, %v3352_v6, %v3354_v48  ;;  %v3097_v14 = vadd.f32 %v5915_v61, %v7794_v34 }
 0x2d1   : > { %v3430_v37 = vsel %vm8750_vm8, %v3355_v0, 0.0  ;;  %v3040_v56 = vpop.f32.mrf.mxu1  ;;  %v3250_v57 = vpop.f32.mrf.mxu0  ;;  %v7978_v5 = vadd.f32 %v3431_v43, %v3093_v26  ;;  %v3429_v25 = vsel %vm2431_vm15, %v3353_v18, 0.0  ;;  %v3361_v6 = vrot.slane %v5951_v13, 1 }
 0x2d2   : > { %8749 = vst [vmem:[#allocation19_spill] sm:$0xff] %v7971_v54  ;;  %v7982_v21 = vadd.f32 %v3430_v37, %v3092_v46  ;;  %v3095_v24 = vadd.f32 %v3040_v56, %v7782_v15  ;;  %v7985_v19 = vadd.f32 %v3429_v25, %v3091_v10  ;;  %v3358_v54 = vrot.slane %v3250_v57, 1 }
 0x2d3   : > { %v5916_v63 = vpop.f32.mrf.mxu1  ;;  %v5952_v48 = vpop.f32.mrf.mxu0  ;;  %vm8756_vm8 = vcmp.ge.s32.totalorder %v7268_v51, 0 }
 0x2d4   : > { %v3098_v34 = vadd.f32 %v5916_v63, %v7796_v49  ;;  %v3363_v36 = vrot.slane %v5952_v48, 1 }
 0x2d5   : > { %v3043_v61 = vpop.f32.mrf.mxu1  ;;  %v3253_v0 = vpop.f32.mrf.mxu0 }
 0x2d6   : > { %v3364_v26 = vsel %vm2314_vm9, %v3361_v6, %v3363_v36  ;;  %v3096_v43 = vadd.f32 %v3043_v61, %v7805_v47  ;;  %v3359_v18 = vrot.slane %v3253_v0, 1 }
 0x2d7   : > { %v5919_v46 = vpop.f32.mrf.mxu1  ;;  %v5955_v37 = vpop.f32.mrf.mxu0  ;;  %v3435_v15 = vsel %vm2429_vm13, %v3364_v26, 0.0 }
 0x2d8   : > { %v3360_v10 = vsel %vm2314_vm9, %v3358_v54, %v3359_v18  ;;  %v3362_v13 = vsel %vm2314_vm9, %v3359_v18, %v3361_v6  ;;  %v3101_v49 = vadd.f32 %v5919_v46, %v7832_v62  ;;  %v7997_v63 = vadd.f32 %v3435_v15, %v3097_v14 }
 0x2d9   : > { %v3434_v56 = vsel %vm2428_vm14, %v3362_v13, 0.0  ;;  %v3056_v57 = vpop.f32.mrf.mxu1  ;;  %v3266_v25 = vpop.f32.mrf.mxu0  ;;  %v3433_v47 = vsel %vm8751_vm11, %v3360_v10, 0.0  ;;  %v3369_v62 = vrot.slane %v5955_v37, 1  ;;  %vm8757_vm11 = vcmp.ge.s32.totalorder %v7274_v23, 0 }
 0x2da   : > { %v8001_v48 = vadd.f32 %v3434_v56, %v3096_v43  ;;  %v3099_v61 = vadd.f32 %v3056_v57, %v7824_v32  ;;  %v3365_v0 = vrot.slane %v3266_v25, 1  ;;  %v8004_v54 = vadd.f32 %v3433_v47, %v3095_v24 }
 0x2db   : > { %v5920_v6 = vpop.f32.mrf.mxu1  ;;  %v5956_v26 = vpop.f32.mrf.mxu0 }
 0x2dc   : > { %v3366_v18 = vsel %vm2314_vm9, %v3363_v36, %v3365_v0  ;;  %v3102_v46 = vadd.f32 %v5920_v6, %v7834_v53  ;;  %v3371_v13 = vrot.slane %v5956_v26, 1 }
 0x2dd   : > { %v3059_v14 = vpop.f32.mrf.mxu1  ;;  %v3269_v15 = vpop.f32.mrf.mxu0  ;;  %v3436_v10 = vsel %vm2430_vm12, %v3366_v18, 0.0 }
 0x2de   : > { %v3372_v43 = vsel %vm2314_vm9, %v3369_v62, %v3371_v13  ;;  %v3408_v32 = vsel %vm2314_vm9, %v3371_v13, 0.0  ;;  %v3100_v24 = vadd.f32 %v3059_v14, %v7844_v11  ;;  %v3367_v56 = vrot.slane %v3269_v15, 1 }
 0x2df   : > { %v3440_v37 = vsel %vm2434_vm6, %v3408_v32, 0.0  ;;  %v5963_v57 = vpop.f32.mrf.mxu1  ;;  %v5999_v36 = vpop.f32.mrf.mxu0  ;;  %v8015_v25 = vadd.f32 %v3436_v10, %v3098_v34  ;;  %v3439_v53 = vsel %vm2433_vm10, %v3372_v43, 0.0 }
 0x2e0   : > { %v8019_v47 = vadd.f32 %v3440_v37, %v3102_v46  ;;  %v3368_v6 = vsel %vm2314_vm9, %v3365_v0, %v3367_v56  ;;  %v3370_v26 = vsel %vm2314_vm9, %v3367_v56, %v3369_v62  ;;  %v8025_v55 = vadd.f32 %v3439_v53, %v3101_v49 }
 0x2e1   : > { %v3438_v11 = vsel %vm8752_vm7, %v3370_v26, 0.0  ;;  %v3524_v18 = vpop.f32.mrf.mxu1  ;;  %v3894_v13 = vpop.f32.mrf.mxu0  ;;  %v3437_v34 = vsel %vm2431_vm15, %v3368_v6, 0.0  ;;  %v3686_v43 = vrot.slane %v5963_v57, 7  ;;  %vm8758_vm7 = vcmp.ge.s32.totalorder %v7240_v12, 0 }
 0x2e2   : > { %v8029_v14 = vadd.f32 %v3438_v11, %v3100_v24  ;;  %v8031_v15 = vadd.f32 %v3437_v34, %v3099_v61  ;;  %v3683_v56 = vrot.slane %v3524_v18, 7  ;;  %v8753_v11 = vld [vmem:[#allocation25_spill] sm:$0xff] }
 0x2e3   : > { %v5964_v46 = vpop.f32.mrf.mxu1  ;;  %v6000_v10 = vpop.f32.mrf.mxu0  ;;  %vm8754_vm6 = vcmp.ge.s32.totalorder %v8753_v11, 0 }
 0x2e4   : > { %v3688_v0 = vrot.slane %v5964_v46, 7 }
 0x2e5   : > { %v3527_v32 = vpop.f32.mrf.mxu1  ;;  %v3896_v62 = vpop.f32.mrf.mxu0 }
 0x2e6   : > { %v3689_v37 = vsel %vm1713_vm1, %v3686_v43, %v3688_v0  ;;  %v3684_v26 = vrot.slane %v3527_v32, 7 }
 0x2e7   : > { %v3781_v49 = vsel %vm1808_vm5, %v3689_v37, 0.0  ;;  %v5967_v53 = vpop.f32.mrf.mxu1  ;;  %v6003_v13 = vpop.f32.mrf.mxu0 }
 0x2e8   : > { %v3813_v24 = vadd.f32 %v3781_v49, %v7853_v33  ;;  %v3687_v61 = vsel %vm1713_vm1, %v3684_v26, %v3686_v43  ;;  %v3685_v6 = vsel %vm1713_vm1, %v3683_v56, %v3684_v26  ;;  %v3694_v33 = vrot.slane %v5967_v53, 7 }
 0x2e9   : > { %v3780_v57 = vsel %vm1807_vm2, %v3687_v61, 0.0  ;;  %v3779_v18 = vsel %vm8754_vm6, %v3685_v6, 0.0  ;;  %v3540_v34 = vpop.f32.mrf.mxu1  ;;  %v3909_v46 = vpop.f32.mrf.mxu0 }
 0x2ea   : > { %v8043_v32 = vadd.f32 %v6000_v10, %v3813_v24  ;;  %v3812_v37 = vadd.f32 %v3780_v57, %v7857_v59  ;;  %v3811_v4 = vadd.f32 %v3779_v18, %v7860_v42  ;;  %v3690_v44 = vrot.slane %v3540_v34, 7 }
 0x2eb   : > { %v5968_v49 = vpop.f32.mrf.mxu1  ;;  %v6004_v43 = vpop.f32.mrf.mxu0 }
 0x2ec   : > { %v8047_v27 = vadd.f32 %v3896_v62, %v3811_v4  ;;  %v3691_v56 = vsel %vm1713_vm1, %v3688_v0, %v3690_v44  ;;  %v3696_v26 = vrot.slane %v5968_v49, 7  ;;  %v8050_v61 = vadd.f32 %v5999_v36, %v3812_v37 }
 0x2ed   : > { %v3782_v7 = vsel %vm1809_vm4, %v3691_v56, 0.0  ;;  %v3543_v10 = vpop.f32.mrf.mxu1  ;;  %v3912_v24 = vpop.f32.mrf.mxu0 }
 0x2ee   : > { %v3814_v59 = vadd.f32 %v3782_v7, %v7871_v45  ;;  %v3775_v42 = vsel %vm1713_vm1, %v3696_v26, 0.0  ;;  %v3697_v53 = vsel %vm1713_vm1, %v3694_v33, %v3696_v26  ;;  %v3692_v57 = vrot.slane %v3543_v10, 7 }
 0x2ef   : > { %v3786_v4 = vsel %vm8756_vm8, %v3775_v42, 0.0  ;;  %v3785_v0 = vsel %vm8757_vm11, %v3697_v53, 0.0  ;;  %v5971_v36 = vpop.f32.mrf.mxu1  ;;  %v6007_v62 = vpop.f32.mrf.mxu0 }
 0x2f0   : > { %v8061_v18 = vadd.f32 %v3909_v46, %v3814_v59  ;;  %v8064_v34 = vadd.f32 %v3786_v4, %v7875_v3  ;;  %v3817_v7 = vadd.f32 %v3785_v0, %v7882_v17  ;;  %v3695_v45 = vsel %vm1713_vm1, %v3692_v57, %v3694_v33 }
 0x2f1   : > { %v3784_v37 = vsel %vm8758_vm7, %v3695_v45, 0.0  ;;  %v3693_v49 = vsel %vm1713_vm1, %v3690_v44, %v3692_v57  ;;  %v3556_v56 = vpop.f32.mrf.mxu1  ;;  %v3925_v26 = vpop.f32.mrf.mxu0  ;;  %v3701_v53 = vrot.slane %v5971_v36, 7 }
 0x2f2   : > { %v8071_v10 = vadd.f32 %v6004_v43, %v3817_v7  ;;  %v3816_v42 = vadd.f32 %v3784_v37, %v7886_v60  ;;  %v3783_v46 = vsel %vm1810_vm3, %v3693_v49, 0.0  ;;  %v3698_v45 = vrot.slane %v3556_v56, 7 }
 0x2f3   : > { %v3815_v3 = vadd.f32 %v3783_v46, %v7889_v28  ;;  %v5972_v59 = vpop.f32.mrf.mxu1  ;;  %v6008_v17 = vpop.f32.mrf.mxu0 }
 0x2f4   : > { %v3703_v33 = vrot.slane %v5972_v59, 7  ;;  %v8077_v4 = vadd.f32 %v6003_v13, %v3816_v42 }
 0x2f5   : > { %v8079_v0 = vadd.f32 %v3912_v24, %v3815_v3  ;;  %v3559_v44 = vpop.f32.mrf.mxu1  ;;  %v3927_v57 = vpop.f32.mrf.mxu0 }
 0x2f6   : > { %v3704_v43 = vsel %vm1713_vm1, %v3701_v53, %v3703_v33  ;;  %v3699_v7 = vrot.slane %v3559_v44, 7 }
 0x2f7   : > { %v3789_v60 = vsel %vm1808_vm5, %v3704_v43, 0.0  ;;  %v5975_v37 = vpop.f32.mrf.mxu1  ;;  %v6011_v49 = vpop.f32.mrf.mxu0 }
 0x2f8   : > { %v3821_v28 = vadd.f32 %v3789_v60, %v7901_v2  ;;  %v3702_v36 = vsel %vm1713_vm1, %v3699_v7, %v3701_v53  ;;  %v3700_v13 = vsel %vm1713_vm1, %v3698_v45, %v3699_v7  ;;  %v3709_v2 = vrot.slane %v5975_v37, 7 }
 0x2f9   : > { %v3788_v24 = vsel %vm1807_vm2, %v3702_v36, 0.0  ;;  %v3787_v56 = vsel %vm8754_vm6, %v3700_v13, 0.0  ;;  %v3572_v26 = vpop.f32.mrf.mxu1  ;;  %v3940_v42 = vpop.f32.mrf.mxu0 }
 0x2fa   : > { %v8091_v46 = vadd.f32 %v6008_v17, %v3821_v28  ;;  %v3820_v3 = vadd.f32 %v3788_v24, %v7905_v16  ;;  %v3819_v59 = vadd.f32 %v3787_v56, %v7908_v30  ;;  %v3705_v44 = vrot.slane %v3572_v26, 7 }
 0x2fb   : > { %v5976_v43 = vpop.f32.mrf.mxu1  ;;  %v6012_v53 = vpop.f32.mrf.mxu0 }
 0x2fc   : > { %v8095_v60 = vadd.f32 %v3927_v57, %v3819_v59  ;;  %v3706_v45 = vsel %vm1713_vm1, %v3703_v33, %v3705_v44  ;;  %v3711_v7 = vrot.slane %v5976_v43, 7  ;;  %v8098_v36 = vadd.f32 %v6007_v62, %v3820_v3 }
 0x2fd   : > { %v3790_v13 = vsel %vm1809_vm4, %v3706_v45, 0.0  ;;  %v3575_v17 = vpop.f32.mrf.mxu1  ;;  %v3943_v28 = vpop.f32.mrf.mxu0 }
 0x2fe   : > { %v3822_v16 = vadd.f32 %v3790_v13, %v7919_v38  ;;  %v3776_v30 = vsel %vm1713_vm1, %v3711_v7, 0.0  ;;  %v3712_v37 = vsel %vm1713_vm1, %v3709_v2, %v3711_v7  ;;  %v3707_v24 = vrot.slane %v3575_v17, 7 }
 0x2ff   : > { %v3794_v57 = vsel %vm8756_vm8, %v3776_v30, 0.0  ;;  %v3793_v33 = vsel %vm8757_vm11, %v3712_v37, 0.0  ;;  %v5979_v62 = vpop.f32.mrf.mxu1  ;;  %v6015_v56 = vpop.f32.mrf.mxu0 }
 0x300   : > { %v8109_v26 = vadd.f32 %v3940_v42, %v3822_v16  ;;  %v8112_v3 = vadd.f32 %v3794_v57, %v7923_v29  ;;  %v3825_v38 = vadd.f32 %v3793_v33, %v7930_v20  ;;  %v3710_v59 = vsel %vm1713_vm1, %v3707_v24, %v3709_v2 }
 0x301   : > { %v3792_v43 = vsel %vm8758_vm7, %v3710_v59, 0.0  ;;  %v3708_v45 = vsel %vm1713_vm1, %v3705_v44, %v3707_v24  ;;  %v3588_v7 = vpop.f32.mrf.mxu1  ;;  %v3956_v13 = vpop.f32.mrf.mxu0  ;;  %v3716_v37 = vrot.slane %v5979_v62, 7 }
 0x302   : > { %v8119_v17 = vadd.f32 %v6012_v53, %v3825_v38  ;;  %v3824_v30 = vadd.f32 %v3792_v43, %v7934_v50  ;;  %v3791_v42 = vsel %vm1810_vm3, %v3708_v45, 0.0  ;;  %v3713_v59 = vrot.slane %v3588_v7, 7 }
 0x303   : > { %v3823_v29 = vadd.f32 %v3791_v42, %v7937_v58  ;;  %v5980_v16 = vpop.f32.mrf.mxu1  ;;  %v6016_v20 = vpop.f32.mrf.mxu0 }
 0x304   : > { %v3718_v2 = vrot.slane %v5980_v16, 7  ;;  %v8125_v57 = vadd.f32 %v6011_v49, %v3824_v30 }
 0x305   : > { %v8127_v33 = vadd.f32 %v3943_v28, %v3823_v29  ;;  %v3591_v44 = vpop.f32.mrf.mxu1  ;;  %v3958_v24 = vpop.f32.mrf.mxu0 }
 0x306   : > { %v3719_v53 = vsel %vm1713_vm1, %v3716_v37, %v3718_v2  ;;  %v3714_v38 = vrot.slane %v3591_v44, 7 }
 0x307   : > { %v3797_v50 = vsel %vm1808_vm5, %v3719_v53, 0.0  ;;  %v5983_v43 = vpop.f32.mrf.mxu1  ;;  %v6019_v45 = vpop.f32.mrf.mxu0 }
 0x308   : > { %v3829_v58 = vadd.f32 %v3797_v50, %v7949_v22  ;;  %v3717_v62 = vsel %vm1713_vm1, %v3714_v38, %v3716_v37  ;;  %v3715_v49 = vsel %vm1713_vm1, %v3713_v59, %v3714_v38  ;;  %v3724_v22 = vrot.slane %v5983_v43, 7 }
 0x309   : > { %v3796_v28 = vsel %vm1807_vm2, %v3717_v62, 0.0  ;;  %v3795_v7 = vsel %vm8754_vm6, %v3715_v49, 0.0  ;;  %v3604_v13 = vpop.f32.mrf.mxu1  ;;  %v3971_v30 = vpop.f32.mrf.mxu0 }
 0x30a   : > { %v8139_v42 = vadd.f32 %v6016_v20, %v3829_v58  ;;  %v3828_v29 = vadd.f32 %v3796_v28, %v7953_v52  ;;  %v3827_v16 = vadd.f32 %v3795_v7, %v7956_v31  ;;  %v3720_v44 = vrot.slane %v3604_v13, 7 }
 0x30b   : > { %v5984_v53 = vpop.f32.mrf.mxu1  ;;  %v6020_v37 = vpop.f32.mrf.mxu0 }
 0x30c   : > { %v8143_v50 = vadd.f32 %v3958_v24, %v3827_v16  ;;  %v3721_v59 = vsel %vm1713_vm1, %v3718_v2, %v3720_v44  ;;  %v3726_v38 = vrot.slane %v5984_v53, 7  ;;  %v8146_v62 = vadd.f32 %v6015_v56, %v3828_v29  ;;  %v8759_v29 = vld [vmem:[#allocation19_spill] sm:$0xff] }
 0x30d   : > { %v3798_v49 = vsel %vm1809_vm4, %v3721_v59, 0.0  ;;  %v3607_v20 = vpop.f32.mrf.mxu1  ;;  %v3974_v58 = vpop.f32.mrf.mxu0 }
 0x30e   : > { %v3830_v52 = vadd.f32 %v3798_v49, %v7967_v40  ;;  %v3777_v31 = vsel %vm1713_vm1, %v3726_v38, 0.0  ;;  %v3727_v43 = vsel %vm1713_vm1, %v3724_v22, %v3726_v38  ;;  %v3722_v28 = vrot.slane %v3607_v20, 7 }
 0x30f   : > { %v3802_v24 = vsel %vm8756_vm8, %v3777_v31, 0.0  ;;  %v3801_v2 = vsel %vm8757_vm11, %v3727_v43, 0.0  ;;  %v5987_v56 = vpop.f32.mrf.mxu1  ;;  %v6023_v7 = vpop.f32.mrf.mxu0 }
 0x310   : > { %v8157_v13 = vadd.f32 %v3971_v30, %v3830_v52  ;;  %v8160_v16 = vadd.f32 %v3802_v24, %v8759_v29  ;;  %v3833_v40 = vadd.f32 %v3801_v2, %v7978_v5  ;;  %v3725_v53 = vsel %vm1713_vm1, %v3722_v28, %v3724_v22 }
 0x311   : > { %v3800_v59 = vsel %vm8758_vm7, %v3725_v53, 0.0  ;;  %v3723_v38 = vsel %vm1713_vm1, %v3720_v44, %v3722_v28  ;;  %v3620_v49 = vpop.f32.mrf.mxu1  ;;  %v3987_v20 = vpop.f32.mrf.mxu0  ;;  %v3731_v5 = vrot.slane %v5987_v56, 7 }
 0x312   : > { %v8167_v31 = vadd.f32 %v6020_v37, %v3833_v40  ;;  %v3832_v43 = vadd.f32 %v3800_v59, %v7982_v21  ;;  %v3799_v30 = vsel %vm1810_vm3, %v3723_v38, 0.0  ;;  %v3728_v44 = vrot.slane %v3620_v49, 7 }
 0x313   : > { %v3831_v52 = vadd.f32 %v3799_v30, %v7985_v19  ;;  %v5988_v24 = vpop.f32.mrf.mxu1 }
 0x314   : > { %v3733_v2 = vrot.slane %v5988_v24, 7  ;;  %v8173_v22 = vadd.f32 %v6019_v45, %v3832_v43 }
 0x315   : > { %v8175_v29 = vadd.f32 %v3974_v58, %v3831_v52  ;;  %v3623_v53 = vpop.f32.mrf.mxu1 }
 0x316   : > { %v3734_v28 = vsel %vm1713_vm1, %v3731_v5, %v3733_v2  ;;  %v3729_v37 = vrot.slane %v3623_v53, 7 }
 0x317   : > { %v3805_v21 = vsel %vm1808_vm5, %v3734_v28, 0.0  ;;  %v5991_v40 = vpop.f32.mrf.mxu1  ;;  %vm8761_vm5 = vmmov %vm8757_vm11 }
 0x318   : > { %v8181_v59 = vadd.f32 %v3805_v21, %v7997_v63  ;;  %v3732_v19 = vsel %vm1713_vm1, %v3729_v37, %v3731_v5  ;;  %v3730_v56 = vsel %vm1713_vm1, %v3728_v44, %v3729_v37  ;;  %v3739_v63 = vrot.slane %v5991_v40, 7  ;;  %v8215_v37 = vld [vmem:[%s8615_s6] ss:$0 sm:$0xff] }
 0x319   : > { %v3804_v45 = vsel %vm1807_vm2, %v3732_v19, 0.0  ;;  %v3803_v58 = vsel %vm8754_vm6, %v3730_v56, 0.0  ;;  %v3636_v38 = vpop.f32.mrf.mxu1  ;;  %vm8760_vm2 = vmmov %vm8756_vm8  ;;  %v8229_v19 = vld [vmem:[%s8616_s7] ss:$0 sm:$0xff] }
 0x31a   : > { %v3836_v49 = vadd.f32 %v3804_v45, %v8001_v48  ;;  %v8191_v39 = vadd.f32 %v3803_v58, %v8004_v54  ;;  %v3735_v20 = vrot.slane %v3636_v38, 7 }
 0x31b   : > { %v5992_v43 = vpop.f32.mrf.mxu1 }
 0x31c   : > { %v3736_v30 = vsel %vm1713_vm1, %v3733_v2, %v3735_v20  ;;  %v3741_v52 = vrot.slane %v5992_v43, 7  ;;  %v8194_v24 = vadd.f32 %v6023_v7, %v3836_v49 }
 0x31d   : > { %v3806_v1 = vsel %vm1809_vm4, %v3736_v30, 0.0  ;;  %v3639_v5 = vpop.f32.mrf.mxu1  ;;  %vm8762_vm4 = vmmov %vm8758_vm7 }
 0x31e   : > { %v8199_v11 = vadd.f32 %v3806_v1, %v8015_v25  ;;  %v3778_v48 = vsel %vm1713_vm1, %v3741_v52, 0.0  ;;  %v3742_v54 = vsel %vm1713_vm1, %v3739_v63, %v3741_v52  ;;  %v3737_v53 = vrot.slane %v3639_v5, 7 }
 0x31f   : > { %v3810_v44 = vsel %vm8760_vm2, %v3778_v48, 0.0  ;;  %v3809_v2 = vsel %vm8761_vm5, %v3742_v54, 0.0  ;;  %v6035_v7 = vpop.f32.mrf.mxu1 }
 0x320   : > { %v3842_v28 = vadd.f32 %v3810_v44, %v8019_v47  ;;  %v8209_v6 = vadd.f32 %v3809_v2, %v8025_v55  ;;  %v3740_v25 = vsel %vm1713_vm1, %v3737_v53, %v3739_v63  ;;  %v3738_v21 = vsel %vm1713_vm1, %v3735_v20, %v3737_v53 }
 0x321   : > { %v3808_v51 = vsel %vm8762_vm4, %v3740_v25, 0.0  ;;  %v4100_v23 = vpop.f32.mrf.mxu1  ;;  %v3807_v55 = vsel %vm1810_vm3, %v3738_v21, 0.0  ;;  %v4252_v58 = vrot.slane %v6035_v7, 1  ;;  %vm8763_vm1 = vcmp.lt.s32.totalorder %v7435_v35, 8 }
 0x322   : > { %v4433_v40 = vmul.f32 %v8215_v37, %v3842_v28  ;;  %v8222_v47 = vadd.f32 %v3808_v51, %v8029_v14  ;;  %v8232_v56 = vadd.f32 %v3807_v55, %v8031_v15  ;;  %v8764_v55 = vld [vmem:[#allocation33_spill] sm:$0xff]  ;;  %vm8769_vm8 = vmmov %vm8763_vm1 }
 0x323   : > { %v6036_v12 = vpop.f32.mrf.mxu1  ;;  %vm8765_vm3 = vcmp.lt.s32.totalorder %v8764_v55, 8  ;;  %vm8771_vm7 = vmmov %vm8763_vm1 }
 0x324   : > { %v8235_v45 = vadd.f32 %v8229_v19, %v4433_v40  ;;  %v4254_v38 = vrot.slane %v6036_v12, 1  ;;  %vm8770_vm11 = vmmov %vm8765_vm3 }
 0x325   : > { %v4102_v49 = vpop.f32.mrf.mxu1  ;;  %vm8772_vm6 = vmmov %vm8765_vm3 }
 0x326   : > { %v4255_v14 = vsel %vm2314_vm9, %v4252_v58, %v4254_v38  ;;  %v4251_v20 = vrot.slane %v4102_v49, 1  ;;  %vm8773_vm2 = vmmov %vm8763_vm1 }
 0x327   : > { %v4336_v8 = vsel %vm2428_vm14, %v4255_v14, 0.0  ;;  %v6039_v43 = vpop.f32.mrf.mxu1 }
 0x328   : > { %v4364_v63 = vadd.f32 %v4336_v8, %v8050_v61  ;;  %v4253_v30 = vsel %vm2314_vm9, %v4251_v20, %v4252_v58  ;;  %v4260_v44 = vrot.slane %v6039_v43, 1  ;;  %v4409_v61 = vmul.f32 %v8215_v37, %v8064_v34 }
 0x329   : > { %v4335_v15 = vsel %vm8763_vm1, %v4253_v30, 0.0  ;;  %v4115_v52 = vpop.f32.mrf.mxu1 }
 0x32a   : > { %v4403_v1 = vmul.f32 %v8215_v37, %v4364_v63  ;;  %v4363_v5 = vadd.f32 %v4335_v15, %v8047_v27  ;;  %v4256_v48 = vrot.slane %v4115_v52, 1 }
 0x32b   : > { %v6040_v54 = vpop.f32.mrf.mxu1 }
 0x32c   : > { %v4402_v53 = vmul.f32 %v8215_v37, %v4363_v5  ;;  %v4257_v2 = vsel %vm2314_vm9, %v4254_v38, %v4256_v48  ;;  %v4262_v7 = vrot.slane %v6040_v54, 1  ;;  %v4442_v51 = vadd.f32 %v8229_v19, %v4403_v1 }
 0x32d   : > { %v4337_v28 = vsel %vm2429_vm13, %v4257_v2, 0.0  ;;  %v4118_v25 = vpop.f32.mrf.mxu1  ;;  %v4448_v5 = vadd.f32 %v8229_v19, %v4409_v61 }
 0x32e   : > { %v4365_v21 = vadd.f32 %v4337_v28, %v8043_v32  ;;  %v4263_v27 = vsel %vm2314_vm9, %v4260_v44, %v4262_v7  ;;  %v4331_v23 = vsel %vm2314_vm9, %v4262_v7, 0.0  ;;  %v4258_v40 = vrot.slane %v4118_v25, 1 }
 0x32f   : > { %v4340_v12 = vsel %vm8765_vm3, %v4263_v27, 0.0  ;;  %v4341_v38 = vsel %vm2433_vm10, %v4331_v23, 0.0  ;;  %v6043_v34 = vpop.f32.mrf.mxu1  ;;  %v4441_v49 = vadd.f32 %v8229_v19, %v4402_v53  ;;  %v4474_v1 = vmax.f32 %v4442_v51, 0.0 }
 0x330   : > { %v4404_v14 = vmul.f32 %v8215_v37, %v4365_v21  ;;  %v4368_v20 = vadd.f32 %v4340_v12, %v8077_v4  ;;  %v4369_v32 = vadd.f32 %v4341_v38, %v8071_v10  ;;  %v4259_v8 = vsel %vm2314_vm9, %v4256_v48, %v4258_v40 }
 0x331   : > { %v4261_v43 = vsel %vm2314_vm9, %v4258_v40, %v4260_v44  ;;  %v4338_v30 = vsel %vm2430_vm12, %v4259_v8, 0.0  ;;  %v4131_v15 = vpop.f32.mrf.mxu1  ;;  %v4473_v52 = vmax.f32 %v4441_v49, 0.0  ;;  %v4265_v51 = vrot.slane %v6043_v34, 1 }
 0x332   : > { %v4407_v54 = vmul.f32 %v8215_v37, %v4368_v20  ;;  %v4408_v53 = vmul.f32 %v8215_v37, %v4369_v32  ;;  %v4339_v4 = vsel %vm2431_vm15, %v4261_v43, 0.0  ;;  %v4366_v10 = vadd.f32 %v4338_v30, %v8061_v18 }
 0x333   : > { %v4367_v48 = vadd.f32 %v4339_v4, %v8079_v0  ;;  %v6044_v44 = vpop.f32.mrf.mxu1  ;;  %v4505_v7 = vpack.c.bf16 %v4474_v1, %v4473_v52  ;;  %v4443_v28 = vadd.f32 %v8229_v19, %v4404_v14  ;;  %v4480_v18 = vmax.f32 %v4448_v5, 0.0 }
 0x334   : > { %v4447_v25 = vadd.f32 %v8229_v19, %v4408_v53  ;;  %v4267_v21 = vrot.slane %v6044_v44, 1  ;;  %v4405_v61 = vmul.f32 %v8215_v37, %v4366_v10  ;;  %v4446_v40 = vadd.f32 %v8229_v19, %v4407_v54 }
 0x335   : > { %v4406_v27 = vmul.f32 %v8215_v37, %v4367_v48  ;;  %6069 = vmatprep.mubr.msk.bf16.mxu0 %vm1479_vm0, %v4505_v7  ;;  %v4133_v23 = vpop.f32.mrf.mxu1  ;;  %v4475_v32 = vmax.f32 %v4443_v28, 0.0 }
 0x336   : > { %v4479_v12 = vmax.f32 %v4447_v25, 0.0  ;;  %v4268_v0 = vsel %vm2314_vm9, %v4265_v51, %v4267_v21  ;;  %v4264_v38 = vrot.slane %v4133_v23, 1  ;;  %v4444_v49 = vadd.f32 %v8229_v19, %v4405_v61 }
 0x337   : > { %v4343_v34 = vsel %vm2428_vm14, %v4268_v0, 0.0  ;;  %v6047_v14 = vpop.f32.mrf.mxu1  ;;  %v4445_v20 = vadd.f32 %v8229_v19, %v4406_v27  ;;  %v4478_v54 = vmax.f32 %v4446_v40, 0.0  ;;  %v4417_v61 = vmul.f32 %v8215_v37, %v8112_v3 }
 0x338   : > { %v4508_v8 = vpack.c.bf16 %v4480_v18, %v4479_v12  ;;  %v4372_v43 = vadd.f32 %v4343_v34, %v8098_v36  ;;  %v4266_v30 = vsel %vm2314_vm9, %v4264_v38, %v4265_v51  ;;  %v4476_v15 = vmax.f32 %v4444_v49, 0.0 }
 0x339   : > { %v4342_v52 = vsel %vm8769_vm8, %v4266_v30, 0.0  ;;  %v4146_v1 = vpop.f32.mrf.mxu1  ;;  %v4477_v5 = vmax.f32 %v4445_v20, 0.0  ;;  %v4273_v36 = vrot.slane %v6047_v14, 1 }
 0x33a   : > { %v4411_v53 = vmul.f32 %v8215_v37, %v4372_v43  ;;  %v4371_v4 = vadd.f32 %v4342_v52, %v8095_v60  ;;  %v4269_v10 = vrot.slane %v4146_v1, 1  ;;  %v4506_v48 = vpack.c.bf16 %v4476_v15, %v4475_v32 }
 0x33b   : > { %v6048_v44 = vpop.f32.mrf.mxu1  ;;  %v4507_v7 = vpack.c.bf16 %v4478_v54, %v4477_v5  ;;  %v4456_v1 = vadd.f32 %v8229_v19, %v4417_v61 }
 0x33c   : > { %v4410_v28 = vmul.f32 %v8215_v37, %v4371_v4  ;;  %v4270_v25 = vsel %vm2314_vm9, %v4267_v21, %v4269_v10  ;;  %v4275_v51 = vrot.slane %v6048_v44, 1  ;;  %6070 = vmatmul.mubr.msk.bf16.vlgmr.msra.gmra.mxu0 %vm1479_vm0, %v4506_v48  ;;  %v4450_v60 = vadd.f32 %v8229_v19, %v4411_v53 }
 0x33d   : > { %v4344_v27 = vsel %vm2429_vm13, %v4270_v25, 0.0  ;;  %v4149_v23 = vpop.f32.mrf.mxu1  ;;  %6073 = vmatprep.mubr.msk.bf16.mxu0 %vm1479_vm0, %v4507_v7 }
 0x33e   : > { %v4373_v40 = vadd.f32 %v4344_v27, %v8091_v46  ;;  %v4276_v18 = vsel %vm2314_vm9, %v4273_v36, %v4275_v51  ;;  %v4332_v12 = vsel %vm2314_vm9, %v4275_v51, 0.0  ;;  %v4271_v0 = vrot.slane %v4149_v23, 1 }
 0x33f   : > { %v4347_v3 = vsel %vm8770_vm11, %v4276_v18, 0.0  ;;  %v4348_v21 = vsel %vm2433_vm10, %v4332_v12, 0.0  ;;  %v6051_v38 = vpop.f32.mrf.mxu1  ;;  %v4449_v49 = vadd.f32 %v8229_v19, %v4410_v28  ;;  %v4482_v52 = vmax.f32 %v4450_v60, 0.0 }
 0x340   : > { %v4412_v34 = vmul.f32 %v8215_v37, %v4373_v40  ;;  %v4376_v46 = vadd.f32 %v4347_v3, %v8125_v57  ;;  %v4377_v14 = vadd.f32 %v4348_v21, %v8119_v17  ;;  %v4272_v20 = vsel %vm2314_vm9, %v4269_v10, %v4271_v0 }
 0x341   : > { %v4274_v32 = vsel %vm2314_vm9, %v4271_v0, %v4273_v36  ;;  %v4345_v43 = vsel %vm2430_vm12, %v4272_v20, 0.0  ;;  %v4162_v30 = vpop.f32.mrf.mxu1  ;;  %v4481_v15 = vmax.f32 %v4449_v49, 0.0  ;;  %v4278_v7 = vrot.slane %v6051_v38, 1  ;;  %v8339_v20 = vpop.f32.mrf.mxu0 }
 0x342   : > { %v4415_v5 = vmul.f32 %v8215_v37, %v4376_v46  ;;  %v4416_v54 = vmul.f32 %v8215_v37, %v4377_v14  ;;  %v4346_v57 = vsel %vm2431_vm15, %v4274_v32, 0.0  ;;  %v4374_v17 = vadd.f32 %v4345_v43, %v8109_v26 }
 0x343   : > { %v4375_v53 = vadd.f32 %v4346_v57, %v8127_v33  ;;  %v6052_v4 = vpop.f32.mrf.mxu1  ;;  %v4509_v10 = vpack.c.bf16 %v4482_v52, %v4481_v15  ;;  %v4451_v48 = vadd.f32 %v8229_v19, %v4412_v34  ;;  %v4488_v26 = vmax.f32 %v4456_v1, 0.0 }
 0x344   : > { %v4455_v44 = vadd.f32 %v8229_v19, %v4416_v54  ;;  %v4280_v28 = vrot.slane %v6052_v4, 1  ;;  %v4413_v36 = vmul.f32 %v8215_v37, %v4374_v17  ;;  %6074 = vmatmul.mubr.msk.bf16.gmra.mxu0 %vm1479_vm0, %v4508_v8  ;;  %v4454_v61 = vadd.f32 %v8229_v19, %v4415_v5 }
 0x345   : > { %v4414_v25 = vmul.f32 %v8215_v37, %v4375_v53  ;;  %v4164_v51 = vpop.f32.mrf.mxu1  ;;  %6077 = vmatprep.mubr.msk.bf16.mxu0 %vm1479_vm0, %v4509_v10  ;;  %v4483_v0 = vmax.f32 %v4451_v48, 0.0  ;;  %v4425_v17 = vmul.f32 %v8215_v37, %v8160_v16  ;;  %v3989_v10 = vpop.f32.mrf.mxu0 }
 0x346   : > { %v4487_v27 = vmax.f32 %v4455_v44, 0.0  ;;  %v4281_v33 = vsel %vm2314_vm9, %v4278_v7, %v4280_v28  ;;  %v4277_v23 = vrot.slane %v4164_v51, 1  ;;  %v4452_v60 = vadd.f32 %v8229_v19, %v4413_v36 }
 0x347   : > { %v4350_v40 = vsel %vm2428_vm14, %v4281_v33, 0.0  ;;  %v6055_v18 = vpop.f32.mrf.mxu1  ;;  %v4453_v12 = vadd.f32 %v8229_v19, %v4414_v25  ;;  %v4486_v14 = vmax.f32 %v4454_v61, 0.0 }
 0x348   : > { %v4512_v8 = vpack.c.bf16 %v4488_v26, %v4487_v27  ;;  %v4380_v3 = vadd.f32 %v4350_v40, %v8146_v62  ;;  %v4279_v21 = vsel %vm2314_vm9, %v4277_v23, %v4278_v7  ;;  %v4484_v38 = vmax.f32 %v4452_v60, 0.0 }
 0x349   : > { %v4349_v49 = vsel %vm8771_vm7, %v4279_v21, 0.0  ;;  %v4177_v34 = vpop.f32.mrf.mxu1  ;;  %v4485_v46 = vmax.f32 %v4453_v12, 0.0  ;;  %v4286_v5 = vrot.slane %v6055_v18, 1  ;;  %v4464_v12 = vadd.f32 %v8229_v19, %v4425_v17 }
 0x34a   : > { %v4419_v32 = vmul.f32 %v8215_v37, %v4380_v3  ;;  %v4379_v43 = vadd.f32 %v4349_v49, %v8143_v50  ;;  %v4282_v30 = vrot.slane %v4177_v34, 1  ;;  %v4510_v52 = vpack.c.bf16 %v4484_v38, %v4483_v0  ;;  %v6027_v0 = vpop.f32.mrf.mxu0 }
 0x34b   : > { %v6056_v15 = vpop.f32.mrf.mxu1  ;;  %v4511_v1 = vpack.c.bf16 %v4486_v14, %v4485_v46 }
 0x34c   : > { %v4418_v62 = vmul.f32 %v8215_v37, %v4379_v43  ;;  %v4283_v54 = vsel %vm2314_vm9, %v4280_v28, %v4282_v30  ;;  %v4288_v57 = vrot.slane %v6056_v15, 1  ;;  %6078 = vmatmul.mubr.msk.bf16.gmra.mxu0 %vm1479_vm0, %v4510_v52  ;;  %v4458_v50 = vadd.f32 %v8229_v19, %v4419_v32 }
 0x34d   : > { %v4351_v53 = vsel %vm2429_vm13, %v4283_v54, 0.0  ;;  %v4180_v4 = vpop.f32.mrf.mxu1  ;;  %6081 = vmatprep.mubr.msk.bf16.mxu0 %vm1479_vm0, %v4511_v1 }
 0x34e   : > { %v4381_v48 = vadd.f32 %v4351_v53, %v8139_v42  ;;  %v4289_v44 = vsel %vm2314_vm9, %v4286_v5, %v4288_v57  ;;  %v4333_v7 = vsel %vm2314_vm9, %v4288_v57, 0.0  ;;  %v4284_v28 = vrot.slane %v4180_v4, 1 }
 0x34f   : > { %v4354_v16 = vsel %vm8772_vm6, %v4289_v44, 0.0  ;;  %v4355_v36 = vsel %vm2433_vm10, %v4333_v7, 0.0  ;;  %v6059_v25 = vpop.f32.mrf.mxu1  ;;  %v4457_v51 = vadd.f32 %v8229_v19, %v4418_v62  ;;  %v4490_v18 = vmax.f32 %v4458_v50, 0.0  ;;  %v4002_v62 = vpop.f32.mrf.mxu0 }
 0x350   : > { %v4420_v61 = vmul.f32 %v8215_v37, %v4381_v48  ;;  %v4384_v42 = vadd.f32 %v4354_v16, %v8173_v22  ;;  %v4385_v26 = vadd.f32 %v4355_v36, %v8167_v31  ;;  %v4285_v27 = vsel %vm2314_vm9, %v4282_v30, %v4284_v28 }
 0x351   : > { %v4287_v33 = vsel %vm2314_vm9, %v4284_v28, %v4286_v5  ;;  %v4352_v23 = vsel %vm2430_vm12, %v4285_v27, 0.0  ;;  %v4193_v60 = vpop.f32.mrf.mxu1  ;;  %v4489_v40 = vmax.f32 %v4457_v51, 0.0  ;;  %v4291_v32 = vrot.slane %v6059_v25, 1  ;;  %v6028_v25 = vpop.f32.mrf.mxu0 }
 0x352   : > { %v4423_v3 = vmul.f32 %v8215_v37, %v4384_v42  ;;  %v4424_v21 = vmul.f32 %v8215_v37, %v4385_v26  ;;  %v4353_v31 = vsel %vm2431_vm15, %v4287_v33, 0.0  ;;  %v4382_v22 = vadd.f32 %v4352_v23, %v8157_v13 }
 0x353   : > { %v4383_v38 = vadd.f32 %v4353_v31, %v8175_v29  ;;  %v6060_v49 = vpop.f32.mrf.mxu1  ;;  %v4513_v34 = vpack.c.bf16 %v4490_v18, %v4489_v40  ;;  %v4459_v46 = vadd.f32 %v8229_v19, %v4420_v61  ;;  %v4496_v13 = vmax.f32 %v4464_v12, 0.0 }
 0x354   : > { %v4463_v14 = vadd.f32 %v8229_v19, %v4424_v21  ;;  %v4293_v43 = vrot.slane %v6060_v49, 1  ;;  %v4421_v30 = vmul.f32 %v8215_v37, %v4382_v22  ;;  %6082 = vmatmul.mubr.msk.bf16.gmra.mxu0 %vm1479_vm0, %v4512_v8  ;;  %v4462_v1 = vadd.f32 %v8229_v19, %v4423_v3  ;;  %v4005_v21 = vpop.f32.mrf.mxu0 }
 0x355   : > { %v4422_v15 = vmul.f32 %v8215_v37, %v4383_v38  ;;  %v4195_v52 = vpop.f32.mrf.mxu1  ;;  %6085 = vmatprep.mubr.msk.bf16.mxu0 %vm1479_vm0, %v4513_v34  ;;  %v4041_v57 = vadd.f32 %v3989_v10, %v8191_v39  ;;  %v4491_v50 = vmax.f32 %v4459_v46, 0.0  ;;  %v4043_v42 = vadd.f32 %v8339_v20, %v8181_v59 }
 0x356   : > { %v4495_v29 = vmax.f32 %v4463_v14, 0.0  ;;  %v4294_v5 = vsel %vm2314_vm9, %v4291_v32, %v4293_v43  ;;  %v4290_v54 = vrot.slane %v4195_v52, 1  ;;  %v4460_v17 = vadd.f32 %v8229_v19, %v4421_v30 }
 0x357   : > { %v4357_v53 = vsel %vm2428_vm14, %v4294_v5, 0.0  ;;  %v6063_v4 = vpop.f32.mrf.mxu1  ;;  %v4461_v8 = vadd.f32 %v8229_v19, %v4422_v15  ;;  %v4494_v10 = vmax.f32 %v4462_v1, 0.0  ;;  %v4044_v18 = vadd.f32 %v4002_v62, %v8199_v11  ;;  %vm8774_vm14 = vmmov %vm8765_vm3 }
 0x358   : > { %v4516_v48 = vpack.c.bf16 %v4496_v13, %v4495_v29  ;;  %v4388_v44 = vadd.f32 %v4357_v53, %v8194_v24  ;;  %v4292_v7 = vsel %vm2314_vm9, %v4290_v54, %v4291_v32  ;;  %v4492_v28 = vmax.f32 %v4460_v17, 0.0 }
 0x359   : > { %v4356_v16 = vsel %vm8773_vm2, %v4292_v7, 0.0  ;;  %v4208_v36 = vpop.f32.mrf.mxu1  ;;  %v4493_v39 = vmax.f32 %v4461_v8, 0.0  ;;  %v4299_v26 = vrot.slane %v6063_v4, 1  ;;  %v4047_v12 = vadd.f32 %v6028_v25, %v8209_v6  ;;  %v6244_v25 = vld [vmem:[%s6515_s11] sm:$0xff]  }
 0x35a   : > { %v4427_v9 = vmul.f32 %v8215_v37, %v4388_v44  ;;  %v4387_v51 = vadd.f32 %v4356_v16, %v4041_v57  ;;  %v4295_v61 = vrot.slane %v4208_v36, 1  ;;  %v4514_v24 = vpack.c.bf16 %v4492_v28, %v4491_v50  ;;  %v8442_v28 = vld [vmem:[%s8618_s9] ss:$0 sm:$0xff]  ;;  %v6243_v16 = vld [vmem:[%s6515_s11 + $0x8] sm:$0xff]  }
 0x35b   : > { %v6064_v27 = vpop.f32.mrf.mxu1  ;;  %v4515_v33 = vpack.c.bf16 %v4494_v10, %v4493_v39  ;;  %v4046_v59 = vadd.f32 %v6027_v0, %v8222_v47  ;;  %v4045_v11 = vadd.f32 %v4005_v21, %v8232_v56  ;;  %v4504_v57 = vmax.f32 %v8235_v45, 0.0  ;;  %v8437_v45 = vld [vmem:[%s8617_s8] ss:$0 sm:$0xff] }
 0x35c   : > { %v4426_v23 = vmul.f32 %v8215_v37, %v4387_v51  ;;  %v4296_v35 = vsel %vm2314_vm9, %v4293_v43, %v4295_v61  ;;  %v4301_v60 = vrot.slane %v6064_v27, 1  ;;  %v4466_v40 = vadd.f32 %v8229_v19, %v4427_v9  ;;  %6086 = vmatmul.mubr.msk.bf16.gmra.mxu0 %vm1479_vm0, %v4514_v24 }
 0x35d   : > { %v4358_v3 = vsel %vm2429_vm13, %v4296_v35, 0.0  ;;  %v4211_v20 = vpop.f32.mrf.mxu1  ;;  %6089 = vmatprep.mubr.msk.bf16.mxu0 %vm1479_vm0, %v4515_v33  ;;  %v4826_v36 = vunpack.c.l.bf16 %v6243_v16  ;;  %v4824_v9 = vunpack.c.l.bf16 %v6244_v25 }
 0x35e   : > { %v4389_v31 = vadd.f32 %v4358_v3, %v4043_v42  ;;  %v4302_v22 = vsel %vm2314_vm9, %v4299_v26, %v4301_v60  ;;  %v4334_v38 = vsel %vm2314_vm9, %v4301_v60, 0.0  ;;  %v4297_v49 = vrot.slane %v4211_v20, 1  ;;  %v6245_v3 = vld [vmem:[%s6515_s11 + $0x18] sm:$0xff]  }
 0x35f   : > { %v4361_v41 = vsel %vm8774_vm14, %v4302_v22, 0.0  ;;  %v4362_v6 = vsel %vm2433_vm10, %v4334_v38, 0.0  ;;  %v4465_v47 = vadd.f32 %v8229_v19, %v4426_v23  ;;  %v4498_v14 = vmax.f32 %v4466_v40, 0.0 }
 0x360   : > { %v4392_v0 = vadd.f32 %v4361_v41, %v4046_v59  ;;  %v4393_v34 = vadd.f32 %v4362_v6, %v4047_v12  ;;  %v4298_v46 = vsel %vm2314_vm9, %v4295_v61, %v4297_v49  ;;  %v4428_v32 = vmul.f32 %v8215_v37, %v4389_v31 }
 0x361   : > { %v4300_v43 = vsel %vm2314_vm9, %v4297_v49, %v4299_v26  ;;  %v4359_v56 = vsel %vm2430_vm12, %v4298_v46, 0.0  ;;  %v4497_v30 = vmax.f32 %v4465_v47, 0.0  ;;  %v4827_v26 = vunpack.c.h.bf16 %v6243_v16  ;;  %v6246_v49 = vld [vmem:[%s6515_s11 + $0x10] sm:$0xff]  }
 0x362   : > { %v4431_v55 = vmul.f32 %v8215_v37, %v4392_v0  ;;  %v4432_v58 = vmul.f32 %v8215_v37, %v4393_v34  ;;  %v4360_v15 = vsel %vm2431_vm15, %v4300_v43, 0.0  ;;  %v4390_v52 = vadd.f32 %v4359_v56, %v4044_v18 }
 0x363   : > { %v4391_v1 = vadd.f32 %v4360_v15, %v4045_v11  ;;  %v4517_v13 = vpack.c.bf16 %v4498_v14, %v4497_v30  ;;  %v4467_v29 = vadd.f32 %v8229_v19, %v4428_v32  ;;  %v4825_v23 = vunpack.c.h.bf16 %v6244_v25 }
 0x364   : > { %v4471_v62 = vadd.f32 %v8229_v19, %v4432_v58  ;;  %v4429_v5 = vmul.f32 %v8215_v37, %v4390_v52  ;;  %6090 = vmatmul.mubr.msk.bf16.gmra.mxu0 %vm1479_vm0, %v4516_v48  ;;  %v4470_v54 = vadd.f32 %v8229_v19, %v4431_v55  ;;  %v4830_v59 = vunpack.c.l.bf16 %v6245_v3 }
 0x365   : > { %v4430_v63 = vmul.f32 %v8215_v37, %v4391_v1  ;;  %6093 = vmatprep.mubr.msk.bf16.mxu0 %vm1479_vm0, %v4517_v13  ;;  %v4499_v8 = vmax.f32 %v4467_v29, 0.0  ;;  %v4828_v11 = vunpack.c.l.bf16 %v6246_v49  ;;  %v4831_v46 = vunpack.c.h.bf16 %v6245_v3 }
 0x366   : > { %v4503_v17 = vmax.f32 %v4471_v62, 0.0  ;;  %v4468_v2 = vadd.f32 %v8229_v19, %v4429_v5  ;;  %v4502_v37 = vmax.f32 %v4470_v54, 0.0  ;;  %v4829_v55 = vunpack.c.h.bf16 %v6246_v49  ;;  %v6247_v62 = vld [vmem:[%s6515_s11 + $0x28] sm:$0xff]  }
 0x367   : > { %v4469_v53 = vadd.f32 %v8229_v19, %v4430_v63  ;;  %v4834_v29 = vunpack.c.l.bf16 %v6247_v62 }
 0x368   : > { %v4520_v4 = vpack.c.bf16 %v4504_v57, %v4503_v17  ;;  %v4500_v50 = vmax.f32 %v4468_v2, 0.0  ;;  %v6248_v2 = vld [vmem:[%s6515_s11 + $0x20] sm:$0xff]  }
 0x369   : > { %v4501_v44 = vmax.f32 %v4469_v53, 0.0  ;;  %v4832_v53 = vunpack.c.l.bf16 %v6248_v2 }
 0x36a   : > { %v4518_v48 = vpack.c.bf16 %v4500_v50, %v4499_v8 }
 0x36b   : > { %v4519_v7 = vpack.c.bf16 %v4502_v37, %v4501_v44 }
 0x36c   : > { %6094 = vmatmul.mubr.msk.bf16.gmra.mxu0 %vm1479_vm0, %v4518_v48  ;;  %v4835_v48 = vunpack.c.h.bf16 %v6247_v62 }
 0x36d   : > { %6097 = vmatprep.mubr.msk.bf16.mxu0 %vm1479_vm0, %v4519_v7 }
 0x374   : > { %6098 = vmatmul.mubr.msk.bf16.gmra.mxu0 %vm1479_vm0, %v4520_v4 }
 0x3fc   : > { %v6071_v19 = vpop.f32.mrf.mxu0 }
 0x3fd   : > { %v4755_v39 = vmul.f32 %v6071_v19, %v8437_v45 }
 0x3fe   : > { %v4619_v10 = vpop.f32.mrf.mxu0 }
 0x3ff   : > { %v4794_v51 = vadd.f32 %v8442_v28, %v4755_v39  ;;  %v4753_v61 = vmul.f32 %v8437_v45, %v4619_v10  ;;  %v4833_v10 = vunpack.c.h.bf16 %v6248_v2 }
 0x400   : > { %v6072_v42 = vpop.f32.mrf.mxu0 }
 0x401   : > { %v4858_v27 = vadd.f32 %v4826_v36, %v4794_v51  ;;  %v4792_v24 = vadd.f32 %v8442_v28, %v4753_v61  ;;  %v4756_v33 = vmul.f32 %v6072_v42, %v8437_v45 }
 0x402   : > { %v4622_v35 = vpop.f32.mrf.mxu0 }
 0x403   : > { %v4890_v60 = vmax.f32 %v4858_v27, 0.0  ;;  %v4856_v40 = vadd.f32 %v4824_v9, %v4792_v24  ;;  %v4795_v18 = vadd.f32 %v8442_v28, %v4756_v33  ;;  %v4754_v12 = vmul.f32 %v8437_v45, %v4622_v35 }
 0x404   : > { %v6075_v20 = vpop.f32.mrf.mxu0 }
 0x405   : > { %4922 = vst [vmem:[%s8455_s18 + $0x10] sm:$0xff] %v4890_v60  ;;  %v4888_v21 = vmax.f32 %v4856_v40, 0.0  ;;  %v4859_v31 = vadd.f32 %v4827_v26, %v4795_v18  ;;  %v4793_v22 = vadd.f32 %v8442_v28, %v4754_v12  ;;  %v4759_v38 = vmul.f32 %v6075_v20, %v8437_v45  ;;  %v6249_v26 = vld [vmem:[%s6515_s11 + $0x38] sm:$0xff]   ;;  %v6250_v40 = vld [vmem:[%s6515_s11 + $0x30] sm:$0xff]  }
 0x406   : > { %v4635_v41 = vpop.f32.mrf.mxu0  ;;  %v4838_v27 = vunpack.c.l.bf16 %v6249_v26  ;;  %v4836_v18 = vunpack.c.l.bf16 %v6250_v40 }
 0x407   : > { %4920 = vst [vmem:[%s8455_s18] sm:$0xff] %v4888_v21  ;;  %v4891_v6 = vmax.f32 %v4859_v31, 0.0  ;;  %v4857_v47 = vadd.f32 %v4825_v23, %v4793_v22  ;;  %v4798_v0 = vadd.f32 %v8442_v28, %v4759_v38  ;;  %v4757_v34 = vmul.f32 %v8437_v45, %v4635_v41 }
 0x408   : > { %v6076_v14 = vpop.f32.mrf.mxu0  ;;  %v4839_v31 = vunpack.c.h.bf16 %v6249_v26 }
 0x409   : > { %4923 = vst [vmem:[%s8455_s18 + $0x18] sm:$0xff] %v4891_v6  ;;  %v4889_v32 = vmax.f32 %v4857_v47, 0.0  ;;  %v4862_v43 = vadd.f32 %v4830_v59, %v4798_v0  ;;  %v4796_v56 = vadd.f32 %v8442_v28, %v4757_v34  ;;  %v4760_v30 = vmul.f32 %v6076_v14, %v8437_v45 }
 0x40a   : > { %v4638_v58 = vpop.f32.mrf.mxu0  ;;  %v4837_v6 = vunpack.c.h.bf16 %v6250_v40 }
 0x40b   : > { %4921 = vst [vmem:[%s8455_s18 + $0x8] sm:$0xff] %v4889_v32  ;;  %v4894_v15 = vmax.f32 %v4862_v43, 0.0  ;;  %v4860_v52 = vadd.f32 %v4828_v11, %v4796_v56  ;;  %v4799_v1 = vadd.f32 %v8442_v28, %v4760_v30  ;;  %v4758_v13 = vmul.f32 %v8437_v45, %v4638_v58  ;;  %v6251_v32 = vld [vmem:[%s6515_s11 + $0x48] sm:$0xff]  }
 0x40c   : > { %v6079_v5 = vpop.f32.mrf.mxu0  ;;  %v4842_v43 = vunpack.c.l.bf16 %v6251_v32 }
 0x40d   : > { %4926 = vst [vmem:[%s8455_s18 + $0x30] sm:$0xff] %v4894_v15  ;;  %v4892_v63 = vmax.f32 %v4860_v52, 0.0  ;;  %v4863_v54 = vadd.f32 %v4831_v46, %v4799_v1  ;;  %v4797_v57 = vadd.f32 %v8442_v28, %v4758_v13  ;;  %v4763_v17 = vmul.f32 %v6079_v5, %v8437_v45  ;;  %v6252_v52 = vld [vmem:[%s6515_s11 + $0x40] sm:$0xff]  }
 0x40e   : > { %v4651_v4 = vpop.f32.mrf.mxu0  ;;  %v4840_v1 = vunpack.c.l.bf16 %v6252_v52 }
 0x40f   : > { %4924 = vst [vmem:[%s8455_s18 + $0x20] sm:$0xff] %v4892_v63  ;;  %v4895_v8 = vmax.f32 %v4863_v54, 0.0  ;;  %v4861_v50 = vadd.f32 %v4829_v55, %v4797_v57  ;;  %v4802_v44 = vadd.f32 %v8442_v28, %v4763_v17  ;;  %v4761_v37 = vmul.f32 %v8437_v45, %v4651_v4 }
 0x410   : > { %v6080_v7 = vpop.f32.mrf.mxu0  ;;  %v4843_v54 = vunpack.c.h.bf16 %v6251_v32 }
 0x411   : > { %4927 = vst [vmem:[%s8455_s18 + $0x38] sm:$0xff] %v4895_v8  ;;  %v4893_v19 = vmax.f32 %v4861_v50, 0.0  ;;  %v4866_v16 = vadd.f32 %v4834_v29, %v4802_v44  ;;  %v4800_v36 = vadd.f32 %v8442_v28, %v4761_v37  ;;  %v4764_v39 = vmul.f32 %v6080_v7, %v8437_v45 }
 0x412   : > { %v4654_v25 = vpop.f32.mrf.mxu0  ;;  %v4841_v8 = vunpack.c.h.bf16 %v6252_v52 }
 0x413   : > { %4925 = vst [vmem:[%s8455_s18 + $0x28] sm:$0xff] %v4893_v19  ;;  %v4898_v9 = vmax.f32 %v4866_v16, 0.0  ;;  %v4864_v51 = vadd.f32 %v4832_v53, %v4800_v36  ;;  %v4803_v61 = vadd.f32 %v8442_v28, %v4764_v39  ;;  %v4762_v42 = vmul.f32 %v8437_v45, %v4654_v25  ;;  %v6253_v19 = vld [vmem:[%s6515_s11 + $0x58] sm:$0xff]  }
 0x414   : > { %v6083_v24 = vpop.f32.mrf.mxu0  ;;  %v4846_v16 = vunpack.c.l.bf16 %v6253_v19 }
 0x415   : > { %4930 = vst [vmem:[%s8455_s18 + $0x50] sm:$0xff] %v4898_v9  ;;  %v4896_v33 = vmax.f32 %v4864_v51, 0.0  ;;  %v4867_v23 = vadd.f32 %v4835_v48, %v4803_v61  ;;  %v4801_v35 = vadd.f32 %v8442_v28, %v4762_v42  ;;  %v4767_v60 = vmul.f32 %v6083_v24, %v8437_v45  ;;  %v6254_v51 = vld [vmem:[%s6515_s11 + $0x50] sm:$0xff]  }
 0x416   : > { %v4667_v12 = vpop.f32.mrf.mxu0  ;;  %v4844_v61 = vunpack.c.l.bf16 %v6254_v51 }
 0x417   : > { %4928 = vst [vmem:[%s8455_s18 + $0x40] sm:$0xff] %v4896_v33  ;;  %v4899_v3 = vmax.f32 %v4867_v23, 0.0  ;;  %v4865_v59 = vadd.f32 %v4833_v10, %v4801_v35  ;;  %v4806_v20 = vadd.f32 %v8442_v28, %v4767_v60  ;;  %v4765_v21 = vmul.f32 %v8437_v45, %v4667_v12 }
 0x418   : > { %v6084_v22 = vpop.f32.mrf.mxu0  ;;  %v4847_v23 = vunpack.c.h.bf16 %v6253_v19 }
 0x419   : > { %4931 = vst [vmem:[%s8455_s18 + $0x58] sm:$0xff] %v4899_v3  ;;  %v4897_v38 = vmax.f32 %v4865_v59, 0.0  ;;  %v4870_v49 = vadd.f32 %v4838_v27, %v4806_v20  ;;  %v4804_v11 = vadd.f32 %v8442_v28, %v4765_v21  ;;  %v4768_v41 = vmul.f32 %v6084_v22, %v8437_v45 }
 0x41a   : > { %v4670_v47 = vpop.f32.mrf.mxu0  ;;  %v4845_v3 = vunpack.c.h.bf16 %v6254_v51 }
 0x41b   : > { %4929 = vst [vmem:[%s8455_s18 + $0x48] sm:$0xff] %v4897_v38  ;;  %v4902_v0 = vmax.f32 %v4870_v49, 0.0  ;;  %v4868_v34 = vadd.f32 %v4836_v18, %v4804_v11  ;;  %v4807_v46 = vadd.f32 %v8442_v28, %v4768_v41  ;;  %v4766_v14 = vmul.f32 %v8437_v45, %v4670_v47  ;;  %v6255_v38 = vld [vmem:[%s6515_s11 + $0x68] sm:$0xff]  }
 0x41c   : > { %v6087_v56 = vpop.f32.mrf.mxu0  ;;  %v4850_v49 = vunpack.c.l.bf16 %v6255_v38 }
 0x41d   : > { %4934 = vst [vmem:[%s8455_s18 + $0x70] sm:$0xff] %v4902_v0  ;;  %v4900_v30 = vmax.f32 %v4868_v34, 0.0  ;;  %v4871_v55 = vadd.f32 %v4839_v31, %v4807_v46  ;;  %v4805_v58 = vadd.f32 %v8442_v28, %v4766_v14  ;;  %v4771_v15 = vmul.f32 %v6087_v56, %v8437_v45  ;;  %v6256_v34 = vld [vmem:[%s6515_s11 + $0x60] sm:$0xff]  }
 0x41e   : > { %v4683_v13 = vpop.f32.mrf.mxu0  ;;  %v4848_v46 = vunpack.c.l.bf16 %v6256_v34 }
 0x41f   : > { %4932 = vst [vmem:[%s8455_s18 + $0x60] sm:$0xff] %v4900_v30  ;;  %v4903_v62 = vmax.f32 %v4871_v55, 0.0  ;;  %v4869_v29 = vadd.f32 %v4837_v6, %v4805_v58  ;;  %v4810_v5 = vadd.f32 %v8442_v28, %v4771_v15  ;;  %v4769_v63 = vmul.f32 %v8437_v45, %v4683_v13 }
 0x420   : > { %v6088_v57 = vpop.f32.mrf.mxu0  ;;  %v4851_v55 = vunpack.c.h.bf16 %v6255_v38 }
 0x421   : > { %4935 = vst [vmem:[%s8455_s18 + $0x78] sm:$0xff] %v4903_v62  ;;  %v4901_v17 = vmax.f32 %v4869_v29, 0.0  ;;  %v4874_v2 = vadd.f32 %v4842_v43, %v4810_v5  ;;  %v4808_v53 = vadd.f32 %v8442_v28, %v4769_v63  ;;  %v4772_v4 = vmul.f32 %v6088_v57, %v8437_v45 }
 0x422   : > { %v4686_v50 = vpop.f32.mrf.mxu0  ;;  %v4849_v62 = vunpack.c.h.bf16 %v6256_v34 }
 0x423   : > { %4933 = vst [vmem:[%s8455_s18 + $0x68] sm:$0xff] %v4901_v17  ;;  %v4906_v44 = vmax.f32 %v4874_v2, 0.0  ;;  %v4872_v37 = vadd.f32 %v4840_v1, %v4808_v53  ;;  %v4811_v48 = vadd.f32 %v8442_v28, %v4772_v4  ;;  %v4770_v7 = vmul.f32 %v8437_v45, %v4686_v50  ;;  %v6257_v17 = vld [vmem:[%s6515_s11 + $0x78] sm:$0xff]  }
 0x424   : > { %v6091_v36 = vpop.f32.mrf.mxu0  ;;  %v4854_v2 = vunpack.c.l.bf16 %v6257_v17 }
 0x425   : > { %4938 = vst [vmem:[%s8455_s18 + $0x90] sm:$0xff] %v4906_v44  ;;  %v4904_v39 = vmax.f32 %v4872_v37, 0.0  ;;  %v4875_v10 = vadd.f32 %v4843_v54, %v4811_v48  ;;  %v4809_v25 = vadd.f32 %v8442_v28, %v4770_v7  ;;  %v4775_v9 = vmul.f32 %v6091_v36, %v8437_v45  ;;  %v6258_v37 = vld [vmem:[%s6515_s11 + $0x70] sm:$0xff]   ;;  %s5344_s11 = sshll.u32 %s6435_s17, 12  ;;  %s6356_s17 = smov [#allocation5]  }
 0x426   : > { %v4699_v42 = vpop.f32.mrf.mxu0  ;;  %v4852_v48 = vunpack.c.l.bf16 %v6258_v37  ;;  %s8562_s30 = scalar_lea.hbm %s8619_s10, %s5344_s11  ;;  %s6291_s22 = sshll.u32 %s6356_s17, 4  ;;  %s6292_s22 = int_to_ptr.vmem [resolvable:$false] %s6291_s22 }
 0x427   : > { %4936 = vst [vmem:[%s8455_s18 + $0x80] sm:$0xff] %v4904_v39  ;;  %v4907_v26 = vmax.f32 %v4875_v10, 0.0  ;;  %v4873_v27 = vadd.f32 %v4841_v8, %v4809_v25  ;;  %v4814_v24 = vadd.f32 %v8442_v28, %v4775_v9  ;;  %v4773_v33 = vmul.f32 %v8437_v45, %v4699_v42  ;;  %s6293_s12 = scalar_lea.vmem %s6292_s22, 8192  ;;  %p6294_p5 = scmp.lt.s32.totalorder %s8564_s24, %s6292_s22 }
 0x428   : > { %v6092_v35 = vpop.f32.mrf.mxu0  ;;  %v4855_v10 = vunpack.c.h.bf16 %v6257_v17  ;;  %p6295_p7 = scmp.lt.s32.totalorder %s6293_s12, %s6287_s23 }
 0x429   : > { %4939 = vst [vmem:[%s8455_s18 + $0x98] sm:$0xff] %v4907_v26  ;;  %v4905_v60 = vmax.f32 %v4873_v27, 0.0  ;;  %v4878_v40 = vadd.f32 %v4846_v16, %v4814_v24  ;;  %v4812_v18 = vadd.f32 %v8442_v28, %v4773_v33  ;;  %v4776_v12 = vmul.f32 %v6092_v35, %v8437_v45 }
 0x42a   : > { %v4702_v59 = vpop.f32.mrf.mxu0  ;;  %v4853_v26 = vunpack.c.h.bf16 %v6258_v37  ;;  %p6296_p8 = por %p6295_p7, %p6294_p5 }
 0x42b   : > { %4937 = vst [vmem:[%s8455_s18 + $0x88] sm:$0xff] %v4905_v60  ;;  %v4910_v20 = vmax.f32 %v4878_v40, 0.0  ;;  %v4876_v21 = vadd.f32 %v4844_v61, %v4812_v18  ;;  %v4815_v31 = vadd.f32 %v8442_v28, %v4776_v12  ;;  %v4774_v22 = vmul.f32 %v8437_v45, %v4702_v59 }
 0x42c   : > { %v6095_v11 = vpop.f32.mrf.mxu0  ;;  %p6297_p10 = pnand %p6296_p8, %p6290_p4 }
 0x42d   : > { %4942 = vst [vmem:[%s8455_s18 + $0xb0] sm:$0xff] %v4910_v20  ;;  %v4908_v41 = vmax.f32 %v4876_v21, 0.0  ;;  %v4879_v6 = vadd.f32 %v4847_v23, %v4815_v31  ;;  %v4813_v47 = vadd.f32 %v8442_v28, %v4774_v22  ;;  %v4779_v0 = vmul.f32 %v6095_v11, %v8437_v45 }
 0x42e   : > { %v4715_v14 = vpop.f32.mrf.mxu0 }
 0x42f   : > { %4940 = vst [vmem:[%s8455_s18 + $0xa0] sm:$0xff] %v4908_v41  ;;  %v4911_v32 = vmax.f32 %v4879_v6, 0.0  ;;  %v4877_v43 = vadd.f32 %v4845_v3, %v4813_v47  ;;  %v4818_v56 = vadd.f32 %v8442_v28, %v4779_v0  ;;  %v4777_v30 = vmul.f32 %v8437_v45, %v4715_v14 }
 0x430   : > { %v6096_v58 = vpop.f32.mrf.mxu0 }
 0x431   : > { %4943 = vst [vmem:[%s8455_s18 + $0xb8] sm:$0xff] %v4911_v32  ;;  %v4909_v15 = vmax.f32 %v4877_v43, 0.0  ;;  %v4882_v52 = vadd.f32 %v4850_v49, %v4818_v56  ;;  %v4816_v1 = vadd.f32 %v8442_v28, %v4777_v30  ;;  %v4780_v13 = vmul.f32 %v6096_v58, %v8437_v45 }
 0x432   : > { %v4718_v29 = vpop.f32.mrf.mxu0 }
 0x433   : > { %4941 = vst [vmem:[%s8455_s18 + $0xa8] sm:$0xff] %v4909_v15  ;;  %v4914_v5 = vmax.f32 %v4882_v52, 0.0  ;;  %v4880_v63 = vadd.f32 %v4848_v46, %v4816_v1  ;;  %v4819_v54 = vadd.f32 %v8442_v28, %v4780_v13  ;;  %v4778_v57 = vmul.f32 %v8437_v45, %v4718_v29 }
 0x434   : > { %v6099_v53 = vpop.f32.mrf.mxu0 }
 0x435   : > { %4946 = vst [vmem:[%s8455_s18 + $0xd0] sm:$0xff] %v4914_v5  ;;  %v4912_v4 = vmax.f32 %v4880_v63, 0.0  ;;  %v4883_v8 = vadd.f32 %v4851_v55, %v4819_v54  ;;  %v4817_v50 = vadd.f32 %v8442_v28, %v4778_v57  ;;  %v4783_v44 = vmul.f32 %v6099_v53, %v8437_v45 }
 0x436   : > { %v4731_v7 = vpop.f32.mrf.mxu0 }
 0x437   : > { %4944 = vst [vmem:[%s8455_s18 + $0xc0] sm:$0xff] %v4912_v4  ;;  %v4915_v19 = vmax.f32 %v4883_v8, 0.0  ;;  %v4881_v16 = vadd.f32 %v4849_v62, %v4817_v50  ;;  %v4822_v36 = vadd.f32 %v8442_v28, %v4783_v44  ;;  %v4781_v39 = vmul.f32 %v8437_v45, %v4731_v7 }
 0x438   : > { %v6100_v25 = vpop.f32.mrf.mxu0 }
 0x439   : > { %4947 = vst [vmem:[%s8455_s18 + $0xd8] sm:$0xff] %v4915_v19  ;;  %v4913_v9 = vmax.f32 %v4881_v16, 0.0  ;;  %v4886_v51 = vadd.f32 %v4854_v2, %v4822_v36  ;;  %v4820_v61 = vadd.f32 %v8442_v28, %v4781_v39  ;;  %v4784_v42 = vmul.f32 %v6100_v25, %v8437_v45 }
 0x43a   : > { %v4734_v27 = vpop.f32.mrf.mxu0 }
 0x43b   : > { %4945 = vst [vmem:[%s8455_s18 + $0xc8] sm:$0xff] %v4913_v9  ;;  %v4918_v24 = vmax.f32 %v4886_v51, 0.0  ;;  %v4884_v33 = vadd.f32 %v4852_v48, %v4820_v61  ;;  %v4823_v23 = vadd.f32 %v8442_v28, %v4784_v42  ;;  %v4782_v35 = vmul.f32 %v8437_v45, %v4734_v27 }
 0x43d   : > { %4950 = vst [vmem:[%s8455_s18 + $0xf0] sm:$0xff] %v4918_v24  ;;  %v4916_v60 = vmax.f32 %v4884_v33, 0.0  ;;  %v4887_v40 = vadd.f32 %v4855_v10, %v4823_v23  ;;  %v4821_v18 = vadd.f32 %v8442_v28, %v4782_v35 }
 0x43f   : > { %4948 = vst [vmem:[%s8455_s18 + $0xe0] sm:$0xff] %v4916_v60  ;;  %v4919_v12 = vmax.f32 %v4887_v40, 0.0  ;;  %v4885_v3 = vadd.f32 %v4853_v26, %v4821_v18 }
 0x441   : > { %4951 = vst [vmem:[%s8455_s18 + $0xf8] sm:$0xff] %v4919_v12  ;;  %v4917_v45 = vmax.f32 %v4885_v3, 0.0 }
 0x443   : > { %4949 = vst [vmem:[%s8455_s18 + $0xe8] sm:$0xff] %v4917_v45 }
 0x444   : > { %6300 = shalt.err (!%p6297_p10)
}
 0x445   : > { %s6301_s20 = scalar_lea.hbm %s8562_s30, 4096  ;;  %s6305_s18 = scalar_lea.hbm %s8619_s10, 8192 }
 0x446   : > { %p6302_p0 = scmp.ne.s32.totalorder %s8562_s30, %s6301_s20  ;;  %p6306_p1 = scmp.lt.s32.totalorder %s8562_s30, %s8619_s10 }
 0x447   : > { %p6307_p3 = scmp.lt.s32.totalorder %s6305_s18, %s6301_s20 }
 0x448   : > { %p6303_p2 = pnand %p6302_p0, %p8775_p12 }
 0x449   : > { %p6308_p6 = por %p6307_p3, %p6306_p1 }
 0x44a   : > { %p6304_p9 = pneg %p6303_p2 }
 0x44c   : > { %p6309_p11 = pnand %p6308_p6, %p6304_p9 }
 0x44e   : > { %6312 = shalt.err (!%p6309_p11)
}
 0x44f   : > { %s6357_s15 = smov 128   ;;  %s6358_s23 = smov 8  }
 0x450   : > { %6119 = dma.vmem_to_hbm [thread:$0]  (%p8775_p12), %s8564_s24, 4096, %s8562_s30, %s4953_s29, %s6357_s15, %s6357_s15, %s6358_s23  }
 0x451 PF: > { %s4981_s17 = sand.u32 1, %s6339_s13   ;;  %p8776_p13 = scmp.ne.s32.totalorder %s8661_s26, 0 }
 0x452   : > { %p8777_p4 = scmp.ge.s32.totalorder %s6351_s16, 2  ;;  %s4982_s22 = scalar_lea.sflag [#allocation4], %s4981_s17 }
 0x454   : > { %p6126_p5 = pnand %p8777_p4, %p8776_p13 }
 0x456   : > { %p6127_p7 = pneg %p6126_p5 }
 0x458   : > { %6334 = dma.done.wait (%p6127_p7), %s4982_s22, 4096  }
 0x459   : > { %6336 = vsyncadd (%p6127_p7), %s4982_s22, 4294963200  ;;  %s8778_s16 = sld [smem:[#allocation9_spill]]  ;;  %s8781_s13 = smov %s6343_s14 }
 0x45a   : > { %s8779_s12 = sld [smem:[#allocation8_spill]] }
 0x45b   : > { %s8780_s15 = sld [smem:[#allocation10_spill]] }
 0x45f   : > { %p23_p8 = scmp.ge.s32.totalorder %s8778_s16, 4  }
 0x460   : > { %s8782_s14 = smov %s8779_s12 }
 0x461   :  { %25 = sbr.rel (!%p23_p8) target bundleno = 5 (0x5), region = 115 }
 0x466   :  { %4987 = vsyncpa [#allocation3], 1 }
 0x467   :  { %4989 = vsyncpa [#allocation3 + $0x1], 1 }
 0x468   :  { %4990 = vsyncpa [#allocation4], 1 }
 0x469   :  { %4992 = vsyncpa [#allocation4 + $0x1], 1 }

</bundles_post_ra>
